<compile_context>
chip_gen: v5e
topology: v5e:2x2
jax: 0.10.0
libtpu: 0.0.40
codegen_flags: <defaults>
</compile_context>

<pallas_src>
import functools

import numpy as np
import jax
import jax.numpy as jnp
from jax import lax
from jax.experimental import pallas as pl
from jax.experimental.pallas import tpu as pltpu


def _round_up(x, m):
    return (x + m - 1) // m * m


# ----------------------------- Pallas kernel --------------------------------

def ssa_forward_kernel(tok_ref,    # SMEM (B*T,) int32 token ids, index b*T + t
                       emb_ref,    # ANY/HBM (VOCAB, Ep) embedding table (lane-padded)
                       wih_ref,    # VMEM (Ep, 4*Hp)  input->gates, gate order (i,f,o,g)
                       whh_ref,    # VMEM (Hp, 4*Hp)  hidden->gates, gate order (i,f,o,g)
                       b_ref,      # VMEM (1, 4*Hp)   b_ih + b_hh, gate order (i,f,o,g)
                       weff_ref,   # VMEM (Hp, 2)     fused conv2 @ linear_final weights
                       beff_ref,   # VMEM (1, 2)      fused bias
                       pred_ref,   # VMEM (Bp, 2)     output: log-softmax predictions
                       x_sc,       # scratch (T*Bp, Ep)   time-major embedded input
                       gx_sc,      # scratch (T*Bp, 4*Hp) hoisted input projection
                       hs_sc,      # scratch (T*Bp, Hp)   stacked hidden states
                       sem,        # DMA semaphores (T*B,)
                       *, T, B, Bp, Hp):
    # 0) Zero only the padded-batch rows of x (disjoint from the DMA destinations,
    #    so no write-ordering hazard).  Padded lanes come pre-zeroed from the table.
    if Bp > B:
        for t in range(T):
            x_sc[t * Bp + B:t * Bp + Bp, :] = jnp.zeros((Bp - B, x_sc.shape[1]),
                                                        jnp.float32)

    # 1) In-kernel embedding gather: DMA the T*B needed rows HBM -> VMEM, time-major.
    copies = []
    for t in range(T):
        for b in range(B):
            cp = pltpu.make_async_copy(
                emb_ref.at[pl.ds(tok_ref[b * T + t], 1), :],
                x_sc.at[pl.ds(t * Bp + b, 1), :],
                sem.at[t * B + b])
            cp.start()
            copies.append(cp)
    for cp in copies:
        cp.wait()

    # 2) Hoisted, batched input projection for ALL timesteps: one MXU pass on a
    #    (T*Bp, Ep) LHS instead of T tiny per-step matmuls on the serial path.
    gx_sc[...] = (jnp.dot(x_sc[...], wih_ref[...],
                          preferred_element_type=jnp.float32)
                  + b_ref[...])

    # 3) Serial LSTM recurrence, fully unrolled (T is small & static). Only
    #    h @ W_hh remains recurrent. Gate order (i, f, o, g): the three sigmoid
    #    gates are one contiguous 3*Hp-lane slice; each block is 128-lane aligned.
    whh = whh_ref[...]                                   # hoisted: single load node
    h = jnp.zeros((Bp, Hp), jnp.float32)
    c = jnp.zeros((Bp, Hp), jnp.float32)
    for t in range(T):
        gates = (gx_sc[t * Bp:(t + 1) * Bp, :]
                 + jnp.dot(h, whh, preferred_element_type=jnp.float32))
        sig = jax.nn.sigmoid(gates[:, :3 * Hp])          # i, f, o in one EUP pass
        i_g = sig[:, 0 * Hp:1 * Hp]
        f_g = sig[:, 1 * Hp:2 * Hp]
        o_g = sig[:, 2 * Hp:3 * Hp]
        g_g = jnp.tanh(gates[:, 3 * Hp:4 * Hp])
        c = f_g * c + i_g * g_g
        h = o_g * jnp.tanh(c)
        hs_sc[t * Bp:(t + 1) * Bp, :] = h
    # NOTE: padded h/c lanes stay exactly 0 because whh/wih/bias padded columns and
    # padded input lanes are exactly 0 (g = tanh(0) = 0, c0 = 0).  Load-bearing.

    # 4) Fused output head (conv2 H->20 then linear_final 20->2 folded into one
    #    (Hp, 2) matmul) applied once to all stacked hidden states.
    logits = (jnp.dot(hs_sc[...], weff_ref[...],
                      preferred_element_type=jnp.float32)
              + beff_ref[...])                               # (T*Bp, 2)
    heat = jnp.sqrt(jnp.maximum(logits, 0.0))                # sqrt(relu(.)) per step

    acc = heat[0:Bp, :]
    for t in range(1, T):
        acc = acc + heat[t * Bp:(t + 1) * Bp, :]
    mean_hm = acc * (1.0 / T)                                # mean over timesteps
    pred_ref[...] = jax.nn.log_softmax(mean_hm, axis=-1)     # F.log_softmax dim=1


# ------------------------ one-time parameter preparation ----------------------

def prepare_params(params, *, dtype=jnp.float32):
    """Pad / fuse all constant weights ONCE (call at param-load time, not per step)."""
    E, four_h = params["w_ih_t"].shape
    H = four_h // 4
    Ep = _round_up(E, 128)
    Hp = _round_up(H, 128)

    # PyTorch gate order is (i, f, g, o); kernel uses (i, f, o, g) so the three
    # sigmoid gates are contiguous.
    GATE_ORDER = (0, 1, 3, 2)

    def pad_gates(w, rows_in, rows_out):
        out = jnp.zeros((rows_out, 4 * Hp), dtype)
        for dst, src in enumerate(GATE_ORDER):
            out = out.at[:rows_in, dst * Hp:dst * Hp + H].set(
                w[:, src * H:(src + 1) * H].astype(dtype))
        return out

    wih_p = pad_gates(params["w_ih_t"], E, Ep)
    whh_p = pad_gates(params["w_hh_t"], H, Hp)
    b_p = pad_gates(params["b_ih"] + params["b_hh"], 1, 1)    # pre-summed biases

    # exact algebraic fusion of conv2 (H->20) and linear_final (20->2)
    w_eff = (params["w_conv"] @ params["w_lin"]).astype(dtype)                  # (H, 2)
    b_eff = (params["b_conv"] @ params["w_lin"] + params["b_lin"]).astype(dtype)  # (1, 2)
    weff_p = jnp.zeros((Hp, 2), dtype).at[:H, :].set(w_eff)

    # lane-padded embedding table (stays in HBM; rows are DMA-gathered in-kernel)
    V = params["embedding"].shape[0]
    emb_p = jnp.zeros((V, Ep), dtype).at[:, :E].set(params["embedding"].astype(dtype))

    return {"emb_p": emb_p, "wih_p": wih_p, "whh_p": whh_p, "b_p": b_p,
            "weff_p": weff_p, "b_eff": b_eff}


# ------------------------------ per-call wrapper -------------------------------

def structured_self_attention_forward(tokens, prepped):
    B, T = tokens.shape
    Ep = prepped["emb_p"].shape[1]
    Hp = prepped["whh_p"].shape[0]
    Bp = _round_up(max(B, 8), 8)                      # sublane-pad batch
    f32 = jnp.float32

    kernel = functools.partial(ssa_forward_kernel, T=T, B=B, Bp=Bp, Hp=Hp)

    vmem = pl.BlockSpec(memory_space=pltpu.MemorySpace.VMEM)
    smem = pl.BlockSpec(memory_space=pltpu.MemorySpace.SMEM)
    hbm = pl.BlockSpec(memory_space=pl.ANY)

    flops = (2 * T * Bp * Ep * 4 * Hp        # input projection
             + 2 * T * Bp * Hp * 4 * Hp      # recurrence
             + 2 * T * Bp * Hp * 2)          # fused head
    transcendentals = 6 * T * Bp * Hp
    bytes_accessed = 4 * (T * B * Ep + Ep * 4 * Hp + Hp * 4 * Hp + 4 * Hp
                          + Hp * 2 + 2 + Bp * 2)

    pred = pl.pallas_call(
        kernel,
        out_shape=jax.ShapeDtypeStruct((Bp, 2), f32),
        in_specs=[smem, hbm, vmem, vmem, vmem, vmem, vmem],
        out_specs=vmem,
        scratch_shapes=[
            pltpu.VMEM((T * Bp, Ep), f32),        # gathered, time-major input
            pltpu.VMEM((T * Bp, 4 * Hp), f32),    # hoisted input-projection gates
            pltpu.VMEM((T * Bp, Hp), f32),        # stacked hidden states
            pltpu.SemaphoreType.DMA((T * B,)),    # one sem per gathered row
        ],
        cost_estimate=pl.CostEstimate(flops=int(flops),
                                      transcendentals=int(transcendentals),
                                      bytes_accessed=int(bytes_accessed)),
    )(tokens.reshape(-1).astype(jnp.int32),
      prepped["emb_p"], prepped["wih_p"], prepped["whh_p"], prepped["b_p"],
      prepped["weff_p"], prepped["b_eff"])

    return pred[:B]


# --------------------------- pure-JAX reference -------------------------------

def reference_forward(tokens, params):
    emb = params["embedding"][tokens]                 # (B, T, E)
    B, T, E = emb.shape
    H = params["w_hh_t"].shape[0]
    h0 = jnp.zeros((B, H), jnp.float32)
    c0 = jnp.zeros((B, H), jnp.float32)

    def step(carry, x_t):
        h, c = carry
        gates = (x_t @ params["w_ih_t"] + params["b_ih"]
                 + h @ params["w_hh_t"] + params["b_hh"])
        i_g = jax.nn.sigmoid(gates[:, 0 * H:1 * H])
        f_g = jax.nn.sigmoid(gates[:, 1 * H:2 * H])
        g_g = jnp.tanh(gates[:, 2 * H:3 * H])
        o_g = jax.nn.sigmoid(gates[:, 3 * H:4 * H])
        c_new = f_g * c + i_g * g_g
        h_new = o_g * jnp.tanh(c_new)
        return (h_new, c_new), h_new

    (_, _), hs = lax.scan(step, (h0, c0), jnp.transpose(emb, (1, 0, 2)))
    outputs = jnp.transpose(hs, (1, 0, 2))            # (B, T, H)
    feats = outputs @ params["w_conv"] + params["b_conv"]      # (B, T, 20)
    logits = feats @ params["w_lin"] + params["b_lin"]         # (B, T, 2)
    heat = jnp.sqrt(jnp.maximum(logits, 0.0))
    heat = jnp.transpose(heat, (0, 2, 1))             # (B, 2, T)  == heatmaps
    mean_hm = jnp.mean(heat, axis=2)                  # (B, 2)
    return jax.nn.log_softmax(mean_hm, axis=1)


# --------------------------------- main ---------------------------------------

if __name__ == "__main__":
    # Small shapes consistent with the module's forward:
    B = 2           # batch_size
    T = 8           # max_len (LSTM timesteps)
    E = 100         # emb_dim (module default)
    H = 100         # lstm_hid_dim; must be 100 so Conv2d(1,20,(1,100)) output width == 1
    VOCAB = 50

    key = jax.random.PRNGKey(0)
    ks = jax.random.split(key, 10)
    bound = 1.0 / np.sqrt(H)

    embedding = jax.random.normal(ks[0], (VOCAB, E), jnp.float32)
    embedding = embedding.at[0].set(0.0)              # padding_idx=0

    params = {
        "embedding": embedding,
        # LSTM params (stored transposed: (in, 4H))
        "w_ih_t": jax.random.uniform(ks[1], (E, 4 * H), jnp.float32, -bound, bound),
        "w_hh_t": jax.random.uniform(ks[2], (H, 4 * H), jnp.float32, -bound, bound),
        "b_ih":   jax.random.uniform(ks[3], (1, 4 * H), jnp.float32, -bound, bound),
        "b_hh":   jax.random.uniform(ks[4], (1, 4 * H), jnp.float32, -bound, bound),
        # conv2: Conv2d(1, 20, (1, 100)) -> weight (20,1,1,100) flattened+transposed (H, 20)
        "w_conv": jax.random.uniform(ks[5], (H, 20), jnp.float32, -0.1, 0.1),
        "b_conv": jax.random.uniform(ks[6], (1, 20), jnp.float32, -0.1, 0.1),
        # linear_final: Linear(20, 2) stored transposed (20, 2)
        "w_lin":  jax.random.uniform(ks[7], (20, 2), jnp.float32,
                                     -1.0 / np.sqrt(20), 1.0 / np.sqrt(20)),
        "b_lin":  jax.random.uniform(ks[8], (1, 2), jnp.float32,
                                     -1.0 / np.sqrt(20), 1.0 / np.sqrt(20)),
    }
    # TODO(synk): conv1 / l2_matrix_norm / attention helpers are unused in forward.

    tokens = jax.random.randint(ks[9], (B, T), 1, VOCAB, dtype=jnp.int32)

    # One-time weight padding / fusion (off the per-call path).
    prepped = jax.block_until_ready(prepare_params(params))

    forward = jax.jit(structured_self_attention_forward)
    pred = jax.block_until_ready(forward(tokens, prepped))

    ref = reference_forward(tokens, params)
    np.testing.assert_allclose(np.asarray(pred), np.asarray(ref), atol=2e-3, rtol=2e-3)

    print("KERNEL_OK")
</pallas_src>

<mosaic_0001>
module attributes {stable_mosaic.version = 11 : i64} {
  func.func @ssa_forward_kernel(%arg0: memref<16xi32, #tpu.memory_space<smem>>, %arg1: memref<50x128xf32, #tpu.memory_space<any>>, %arg2: memref<128x512xf32, #tpu.memory_space<vmem>>, %arg3: memref<128x512xf32, #tpu.memory_space<vmem>>, %arg4: memref<1x512xf32, #tpu.memory_space<vmem>>, %arg5: memref<128x2xf32, #tpu.memory_space<vmem>>, %arg6: memref<1x2xf32, #tpu.memory_space<vmem>>, %arg7: memref<8x2xf32, #tpu.memory_space<vmem>>, %arg8: memref<64x128xf32, #tpu.memory_space<vmem>>, %arg9: memref<64x512xf32, #tpu.memory_space<vmem>>, %arg10: memref<64x128xf32, #tpu.memory_space<vmem>>, %arg11: memref<16x!tpu.dma_semaphore, #tpu.memory_space<semaphore_mem>>) attributes {dimension_semantics = [], scalar_prefetch = 0 : i64, scratch_operands = 4 : i64, tpu.core_type = #tpu.core_type<tc>} {
    %cst = arith.constant 0.000000e+00 : f32
    %0 = vector.broadcast %cst : f32 to vector<6x128xf32>
    %c2 = arith.constant 2 : index
    %c0 = arith.constant 0 : index
    %1 = vector.load %arg8[%c2, %c0] : memref<64x128xf32, #tpu.memory_space<vmem>>, vector<6x128xf32>
    tpu.vector_store %arg8[%c2, %c0], %0 {strides = array<i32>} : memref<64x128xf32, #tpu.memory_space<vmem>>, vector<6x128xf32>,
    %cst_0 = arith.constant 0.000000e+00 : f32
    %2 = vector.broadcast %cst_0 : f32 to vector<6x128xf32>
    %c10 = arith.constant 10 : index
    %c0_1 = arith.constant 0 : index
    %3 = vector.load %arg8[%c10, %c0_1] : memref<64x128xf32, #tpu.memory_space<vmem>>, vector<6x128xf32>
    tpu.vector_store %arg8[%c10, %c0_1], %2 {strides = array<i32>} : memref<64x128xf32, #tpu.memory_space<vmem>>, vector<6x128xf32>,
    %cst_2 = arith.constant 0.000000e+00 : f32
    %4 = vector.broadcast %cst_2 : f32 to vector<6x128xf32>
    %c18 = arith.constant 18 : index
    %c0_3 = arith.constant 0 : index
    %5 = vector.load %arg8[%c18, %c0_3] : memref<64x128xf32, #tpu.memory_space<vmem>>, vector<6x128xf32>
    tpu.vector_store %arg8[%c18, %c0_3], %4 {strides = array<i32>} : memref<64x128xf32, #tpu.memory_space<vmem>>, vector<6x128xf32>,
    %cst_4 = arith.constant 0.000000e+00 : f32
    %6 = vector.broadcast %cst_4 : f32 to vector<6x128xf32>
    %c26 = arith.constant 26 : index
    %c0_5 = arith.constant 0 : index
    %7 = vector.load %arg8[%c26, %c0_5] : memref<64x128xf32, #tpu.memory_space<vmem>>, vector<6x128xf32>
    tpu.vector_store %arg8[%c26, %c0_5], %6 {strides = array<i32>} : memref<64x128xf32, #tpu.memory_space<vmem>>, vector<6x128xf32>,
    %cst_6 = arith.constant 0.000000e+00 : f32
    %8 = vector.broadcast %cst_6 : f32 to vector<6x128xf32>
    %c34 = arith.constant 34 : index
    %c0_7 = arith.constant 0 : index
    %9 = vector.load %arg8[%c34, %c0_7] : memref<64x128xf32, #tpu.memory_space<vmem>>, vector<6x128xf32>
    tpu.vector_store %arg8[%c34, %c0_7], %8 {strides = array<i32>} : memref<64x128xf32, #tpu.memory_space<vmem>>, vector<6x128xf32>,
    %cst_8 = arith.constant 0.000000e+00 : f32
    %10 = vector.broadcast %cst_8 : f32 to vector<6x128xf32>
    %c42 = arith.constant 42 : index
    %c0_9 = arith.constant 0 : index
    %11 = vector.load %arg8[%c42, %c0_9] : memref<64x128xf32, #tpu.memory_space<vmem>>, vector<6x128xf32>
    tpu.vector_store %arg8[%c42, %c0_9], %10 {strides = array<i32>} : memref<64x128xf32, #tpu.memory_space<vmem>>, vector<6x128xf32>,
    %cst_10 = arith.constant 0.000000e+00 : f32
    %12 = vector.broadcast %cst_10 : f32 to vector<6x128xf32>
    %c50 = arith.constant 50 : index
    %c0_11 = arith.constant 0 : index
    %13 = vector.load %arg8[%c50, %c0_11] : memref<64x128xf32, #tpu.memory_space<vmem>>, vector<6x128xf32>
    tpu.vector_store %arg8[%c50, %c0_11], %12 {strides = array<i32>} : memref<64x128xf32, #tpu.memory_space<vmem>>, vector<6x128xf32>,
    %cst_12 = arith.constant 0.000000e+00 : f32
    %14 = vector.broadcast %cst_12 : f32 to vector<6x128xf32>
    %c58 = arith.constant 58 : index
    %c0_13 = arith.constant 0 : index
    %15 = vector.load %arg8[%c58, %c0_13] : memref<64x128xf32, #tpu.memory_space<vmem>>, vector<6x128xf32>
    tpu.vector_store %arg8[%c58, %c0_13], %14 {strides = array<i32>} : memref<64x128xf32, #tpu.memory_space<vmem>>, vector<6x128xf32>,
    %c0_14 = arith.constant 0 : index
    %16 = memref.load %arg0[%c0_14] : memref<16xi32, #tpu.memory_space<smem>>
    %c0_i32 = arith.constant 0 : i32
    %c0_i32_15 = arith.constant 0 : i32
    %17 = tpu.memref_slice %arg1[%16, %c0_i32_15] : memref<50x128xf32, #tpu.memory_space<any>> -> memref<1x128xf32, #tpu.memory_space<any>>
    %c0_i32_16 = arith.constant 0 : i32
    %c0_i32_17 = arith.constant 0 : i32
    %18 = tpu.memref_slice %arg8[%c0_i32_16, %c0_i32_17] : memref<64x128xf32, #tpu.memory_space<vmem>> -> memref<1x128xf32, #tpu.memory_space<vmem>>
    %19 = tpu.memref_slice %arg11[%c0_i32] : memref<16x!tpu.dma_semaphore, #tpu.memory_space<semaphore_mem>> -> memref<1x!tpu.dma_semaphore, #tpu.memory_space<semaphore_mem>>
    %20 = tpu.memref_squeeze %19 : memref<1x!tpu.dma_semaphore, #tpu.memory_space<semaphore_mem>> -> memref<!tpu.dma_semaphore, #tpu.memory_space<semaphore_mem>>
    tpu.enqueue_dma source(%17 : memref<1x128xf32, #tpu.memory_space<any>>) target(%18 : memref<1x128xf32, #tpu.memory_space<vmem>>) target_semaphore(%20 : memref<!tpu.dma_semaphore, #tpu.memory_space<semaphore_mem>>)
    %c8 = arith.constant 8 : index
    %21 = memref.load %arg0[%c8] : memref<16xi32, #tpu.memory_space<smem>>
    %c1_i32 = arith.constant 1 : i32
    %c0_i32_18 = arith.constant 0 : i32
    %22 = tpu.memref_slice %arg1[%21, %c0_i32_18] : memref<50x128xf32, #tpu.memory_space<any>> -> memref<1x128xf32, #tpu.memory_space<any>>
    %c1_i32_19 = arith.constant 1 : i32
    %c0_i32_20 = arith.constant 0 : i32
    %23 = tpu.memref_slice %arg8[%c1_i32_19, %c0_i32_20] : memref<64x128xf32, #tpu.memory_space<vmem>> -> memref<1x128xf32, #tpu.memory_space<vmem>>
    %24 = tpu.memref_slice %arg11[%c1_i32] : memref<16x!tpu.dma_semaphore, #tpu.memory_space<semaphore_mem>> -> memref<1x!tpu.dma_semaphore, #tpu.memory_space<semaphore_mem>>
    %25 = tpu.memref_squeeze %24 : memref<1x!tpu.dma_semaphore, #tpu.memory_space<semaphore_mem>> -> memref<!tpu.dma_semaphore, #tpu.memory_space<semaphore_mem>>
    tpu.enqueue_dma source(%22 : memref<1x128xf32, #tpu.memory_space<any>>) target(%23 : memref<1x128xf32, #tpu.memory_space<vmem>>) target_semaphore(%25 : memref<!tpu.dma_semaphore, #tpu.memory_space<semaphore_mem>>)
    %c1 = arith.constant 1 : index
    %26 = memref.load %arg0[%c1] : memref<16xi32, #tpu.memory_space<smem>>
    %c2_i32 = arith.constant 2 : i32
    %c0_i32_21 = arith.constant 0 : i32
    %27 = tpu.memref_slice %arg1[%26, %c0_i32_21] : memref<50x128xf32, #tpu.memory_space<any>> -> memref<1x128xf32, #tpu.memory_space<any>>
    %c8_i32 = arith.constant 8 : i32
    %c0_i32_22 = arith.constant 0 : i32
    %28 = tpu.memref_slice %arg8[%c8_i32, %c0_i32_22] : memref<64x128xf32, #tpu.memory_space<vmem>> -> memref<1x128xf32, #tpu.memory_space<vmem>>
    %29 = tpu.memref_slice %arg11[%c2_i32] : memref<16x!tpu.dma_semaphore, #tpu.memory_space<semaphore_mem>> -> memref<1x!tpu.dma_semaphore, #tpu.memory_space<semaphore_mem>>
    %30 = tpu.memref_squeeze %29 : memref<1x!tpu.dma_semaphore, #tpu.memory_space<semaphore_mem>> -> memref<!tpu.dma_semaphore, #tpu.memory_space<semaphore_mem>>
    tpu.enqueue_dma source(%27 : memref<1x128xf32, #tpu.memory_space<any>>) target(%28 : memref<1x128xf32, #tpu.memory_space<vmem>>) target_semaphore(%30 : memref<!tpu.dma_semaphore, #tpu.memory_space<semaphore_mem>>)
    %c9 = arith.constant 9 : index
    %31 = memref.load %arg0[%c9] : memref<16xi32, #tpu.memory_space<smem>>
    %c3_i32 = arith.constant 3 : i32
    %c0_i32_23 = arith.constant 0 : i32
    %32 = tpu.memref_slice %arg1[%31, %c0_i32_23] : memref<50x128xf32, #tpu.memory_space<any>> -> memref<1x128xf32, #tpu.memory_space<any>>
    %c9_i32 = arith.constant 9 : i32
    %c0_i32_24 = arith.constant 0 : i32
    %33 = tpu.memref_slice %arg8[%c9_i32, %c0_i32_24] : memref<64x128xf32, #tpu.memory_space<vmem>> -> memref<1x128xf32, #tpu.memory_space<vmem>>
    %34 = tpu.memref_slice %arg11[%c3_i32] : memref<16x!tpu.dma_semaphore, #tpu.memory_space<semaphore_mem>> -> memref<1x!tpu.dma_semaphore, #tpu.memory_space<semaphore_mem>>
    %35 = tpu.memref_squeeze %34 : memref<1x!tpu.dma_semaphore, #tpu.memory_space<semaphore_mem>> -> memref<!tpu.dma_semaphore, #tpu.memory_space<semaphore_mem>>
    tpu.enqueue_dma source(%32 : memref<1x128xf32, #tpu.memory_space<any>>) target(%33 : memref<1x128xf32, #tpu.memory_space<vmem>>) target_semaphore(%35 : memref<!tpu.dma_semaphore, #tpu.memory_space<semaphore_mem>>)
    %c2_25 = arith.constant 2 : index
    %36 = memref.load %arg0[%c2_25] : memref<16xi32, #tpu.memory_space<smem>>
    %c4_i32 = arith.constant 4 : i32
    %c0_i32_26 = arith.constant 0 : i32
    %37 = tpu.memref_slice %arg1[%36, %c0_i32_26] : memref<50x128xf32, #tpu.memory_space<any>> -> memref<1x128xf32, #tpu.memory_space<any>>
    %c16_i32 = arith.constant 16 : i32
    %c0_i32_27 = arith.constant 0 : i32
    %38 = tpu.memref_slice %arg8[%c16_i32, %c0_i32_27] : memref<64x128xf32, #tpu.memory_space<vmem>> -> memref<1x128xf32, #tpu.memory_space<vmem>>
    %39 = tpu.memref_slice %arg11[%c4_i32] : memref<16x!tpu.dma_semaphore, #tpu.memory_space<semaphore_mem>> -> memref<1x!tpu.dma_semaphore, #tpu.memory_space<semaphore_mem>>
    %40 = tpu.memref_squeeze %39 : memref<1x!tpu.dma_semaphore, #tpu.memory_space<semaphore_mem>> -> memref<!tpu.dma_semaphore, #tpu.memory_space<semaphore_mem>>
    tpu.enqueue_dma source(%37 : memref<1x128xf32, #tpu.memory_space<any>>) target(%38 : memref<1x128xf32, #tpu.memory_space<vmem>>) target_semaphore(%40 : memref<!tpu.dma_semaphore, #tpu.memory_space<semaphore_mem>>)
    %c10_28 = arith.constant 10 : index
    %41 = memref.load %arg0[%c10_28] : memref<16xi32, #tpu.memory_space<smem>>
    %c5_i32 = arith.constant 5 : i32
    %c0_i32_29 = arith.constant 0 : i32
    %42 = tpu.memref_slice %arg1[%41, %c0_i32_29] : memref<50x128xf32, #tpu.memory_space<any>> -> memref<1x128xf32, #tpu.memory_space<any>>
    %c17_i32 = arith.constant 17 : i32
    %c0_i32_30 = arith.constant 0 : i32
    %43 = tpu.memref_slice %arg8[%c17_i32, %c0_i32_30] : memref<64x128xf32, #tpu.memory_space<vmem>> -> memref<1x128xf32, #tpu.memory_space<vmem>>
    %44 = tpu.memref_slice %arg11[%c5_i32] : memref<16x!tpu.dma_semaphore, #tpu.memory_space<semaphore_mem>> -> memref<1x!tpu.dma_semaphore, #tpu.memory_space<semaphore_mem>>
    %45 = tpu.memref_squeeze %44 : memref<1x!tpu.dma_semaphore, #tpu.memory_space<semaphore_mem>> -> memref<!tpu.dma_semaphore, #tpu.memory_space<semaphore_mem>>
    tpu.enqueue_dma source(%42 : memref<1x128xf32, #tpu.memory_space<any>>) target(%43 : memref<1x128xf32, #tpu.memory_space<vmem>>) target_semaphore(%45 : memref<!tpu.dma_semaphore, #tpu.memory_space<semaphore_mem>>)
    %c3 = arith.constant 3 : index
    %46 = memref.load %arg0[%c3] : memref<16xi32, #tpu.memory_space<smem>>
    %c6_i32 = arith.constant 6 : i32
    %c0_i32_31 = arith.constant 0 : i32
    %47 = tpu.memref_slice %arg1[%46, %c0_i32_31] : memref<50x128xf32, #tpu.memory_space<any>> -> memref<1x128xf32, #tpu.memory_space<any>>
    %c24_i32 = arith.constant 24 : i32
    %c0_i32_32 = arith.constant 0 : i32
    %48 = tpu.memref_slice %arg8[%c24_i32, %c0_i32_32] : memref<64x128xf32, #tpu.memory_space<vmem>> -> memref<1x128xf32, #tpu.memory_space<vmem>>
    %49 = tpu.memref_slice %arg11[%c6_i32] : memref<16x!tpu.dma_semaphore, #tpu.memory_space<semaphore_mem>> -> memref<1x!tpu.dma_semaphore, #tpu.memory_space<semaphore_mem>>
    %50 = tpu.memref_squeeze %49 : memref<1x!tpu.dma_semaphore, #tpu.memory_space<semaphore_mem>> -> memref<!tpu.dma_semaphore, #tpu.memory_space<semaphore_mem>>
    tpu.enqueue_dma source(%47 : memref<1x128xf32, #tpu.memory_space<any>>) target(%48 : memref<1x128xf32, #tpu.memory_space<vmem>>) target_semaphore(%50 : memref<!tpu.dma_semaphore, #tpu.memory_space<semaphore_mem>>)
    %c11 = arith.constant 11 : index
    %51 = memref.load %arg0[%c11] : memref<16xi32, #tpu.memory_space<smem>>
    %c7_i32 = arith.constant 7 : i32
    %c0_i32_33 = arith.constant 0 : i32
    %52 = tpu.memref_slice %arg1[%51, %c0_i32_33] : memref<50x128xf32, #tpu.memory_space<any>> -> memref<1x128xf32, #tpu.memory_space<any>>
    %c25_i32 = arith.constant 25 : i32
    %c0_i32_34 = arith.constant 0 : i32
    %53 = tpu.memref_slice %arg8[%c25_i32, %c0_i32_34] : memref<64x128xf32, #tpu.memory_space<vmem>> -> memref<1x128xf32, #tpu.memory_space<vmem>>
    %54 = tpu.memref_slice %arg11[%c7_i32] : memref<16x!tpu.dma_semaphore, #tpu.memory_space<semaphore_mem>> -> memref<1x!tpu.dma_semaphore, #tpu.memory_space<semaphore_mem>>
    %55 = tpu.memref_squeeze %54 : memref<1x!tpu.dma_semaphore, #tpu.memory_space<semaphore_mem>> -> memref<!tpu.dma_semaphore, #tpu.memory_space<semaphore_mem>>
    tpu.enqueue_dma source(%52 : memref<1x128xf32, #tpu.memory_space<any>>) target(%53 : memref<1x128xf32, #tpu.memory_space<vmem>>) target_semaphore(%55 : memref<!tpu.dma_semaphore, #tpu.memory_space<semaphore_mem>>)
    %c4 = arith.constant 4 : index
    %56 = memref.load %arg0[%c4] : memref<16xi32, #tpu.memory_space<smem>>
    %c8_i32_35 = arith.constant 8 : i32
    %c0_i32_36 = arith.constant 0 : i32
    %57 = tpu.memref_slice %arg1[%56, %c0_i32_36] : memref<50x128xf32, #tpu.memory_space<any>> -> memref<1x128xf32, #tpu.memory_space<any>>
    %c32_i32 = arith.constant 32 : i32
    %c0_i32_37 = arith.constant 0 : i32
    %58 = tpu.memref_slice %arg8[%c32_i32, %c0_i32_37] : memref<64x128xf32, #tpu.memory_space<vmem>> -> memref<1x128xf32, #tpu.memory_space<vmem>>
    %59 = tpu.memref_slice %arg11[%c8_i32_35] : memref<16x!tpu.dma_semaphore, #tpu.memory_space<semaphore_mem>> -> memref<1x!tpu.dma_semaphore, #tpu.memory_space<semaphore_mem>>
    %60 = tpu.memref_squeeze %59 : memref<1x!tpu.dma_semaphore, #tpu.memory_space<semaphore_mem>> -> memref<!tpu.dma_semaphore, #tpu.memory_space<semaphore_mem>>
    tpu.enqueue_dma source(%57 : memref<1x128xf32, #tpu.memory_space<any>>) target(%58 : memref<1x128xf32, #tpu.memory_space<vmem>>) target_semaphore(%60 : memref<!tpu.dma_semaphore, #tpu.memory_space<semaphore_mem>>)
    %c12 = arith.constant 12 : index
    %61 = memref.load %arg0[%c12] : memref<16xi32, #tpu.memory_space<smem>>
    %c9_i32_38 = arith.constant 9 : i32
    %c0_i32_39 = arith.constant 0 : i32
    %62 = tpu.memref_slice %arg1[%61, %c0_i32_39] : memref<50x128xf32, #tpu.memory_space<any>> -> memref<1x128xf32, #tpu.memory_space<any>>
    %c33_i32 = arith.constant 33 : i32
    %c0_i32_40 = arith.constant 0 : i32
    %63 = tpu.memref_slice %arg8[%c33_i32, %c0_i32_40] : memref<64x128xf32, #tpu.memory_space<vmem>> -> memref<1x128xf32, #tpu.memory_space<vmem>>
    %64 = tpu.memref_slice %arg11[%c9_i32_38] : memref<16x!tpu.dma_semaphore, #tpu.memory_space<semaphore_mem>> -> memref<1x!tpu.dma_semaphore, #tpu.memory_space<semaphore_mem>>
    %65 = tpu.memref_squeeze %64 : memref<1x!tpu.dma_semaphore, #tpu.memory_space<semaphore_mem>> -> memref<!tpu.dma_semaphore, #tpu.memory_space<semaphore_mem>>
    tpu.enqueue_dma source(%62 : memref<1x128xf32, #tpu.memory_space<any>>) target(%63 : memref<1x128xf32, #tpu.memory_space<vmem>>) target_semaphore(%65 : memref<!tpu.dma_semaphore, #tpu.memory_space<semaphore_mem>>)
    %c5 = arith.constant 5 : index
    %66 = memref.load %arg0[%c5] : memref<16xi32, #tpu.memory_space<smem>>
    %c10_i32 = arith.constant 10 : i32
    %c0_i32_41 = arith.constant 0 : i32
    %67 = tpu.memref_slice %arg1[%66, %c0_i32_41] : memref<50x128xf32, #tpu.memory_space<any>> -> memref<1x128xf32, #tpu.memory_space<any>>
    %c40_i32 = arith.constant 40 : i32
    %c0_i32_42 = arith.constant 0 : i32
    %68 = tpu.memref_slice %arg8[%c40_i32, %c0_i32_42] : memref<64x128xf32, #tpu.memory_space<vmem>> -> memref<1x128xf32, #tpu.memory_space<vmem>>
    %69 = tpu.memref_slice %arg11[%c10_i32] : memref<16x!tpu.dma_semaphore, #tpu.memory_space<semaphore_mem>> -> memref<1x!tpu.dma_semaphore, #tpu.memory_space<semaphore_mem>>
    %70 = tpu.memref_squeeze %69 : memref<1x!tpu.dma_semaphore, #tpu.memory_space<semaphore_mem>> -> memref<!tpu.dma_semaphore, #tpu.memory_space<semaphore_mem>>
    tpu.enqueue_dma source(%67 : memref<1x128xf32, #tpu.memory_space<any>>) target(%68 : memref<1x128xf32, #tpu.memory_space<vmem>>) target_semaphore(%70 : memref<!tpu.dma_semaphore, #tpu.memory_space<semaphore_mem>>)
    %c13 = arith.constant 13 : index
    %71 = memref.load %arg0[%c13] : memref<16xi32, #tpu.memory_space<smem>>
    %c11_i32 = arith.constant 11 : i32
    %c0_i32_43 = arith.constant 0 : i32
    %72 = tpu.memref_slice %arg1[%71, %c0_i32_43] : memref<50x128xf32, #tpu.memory_space<any>> -> memref<1x128xf32, #tpu.memory_space<any>>
    %c41_i32 = arith.constant 41 : i32
    %c0_i32_44 = arith.constant 0 : i32
    %73 = tpu.memref_slice %arg8[%c41_i32, %c0_i32_44] : memref<64x128xf32, #tpu.memory_space<vmem>> -> memref<1x128xf32, #tpu.memory_space<vmem>>
    %74 = tpu.memref_slice %arg11[%c11_i32] : memref<16x!tpu.dma_semaphore, #tpu.memory_space<semaphore_mem>> -> memref<1x!tpu.dma_semaphore, #tpu.memory_space<semaphore_mem>>
    %75 = tpu.memref_squeeze %74 : memref<1x!tpu.dma_semaphore, #tpu.memory_space<semaphore_mem>> -> memref<!tpu.dma_semaphore, #tpu.memory_space<semaphore_mem>>
    tpu.enqueue_dma source(%72 : memref<1x128xf32, #tpu.memory_space<any>>) target(%73 : memref<1x128xf32, #tpu.memory_space<vmem>>) target_semaphore(%75 : memref<!tpu.dma_semaphore, #tpu.memory_space<semaphore_mem>>)
    %c6 = arith.constant 6 : index
    %76 = memref.load %arg0[%c6] : memref<16xi32, #tpu.memory_space<smem>>
    %c12_i32 = arith.constant 12 : i32
    %c0_i32_45 = arith.constant 0 : i32
    %77 = tpu.memref_slice %arg1[%76, %c0_i32_45] : memref<50x128xf32, #tpu.memory_space<any>> -> memref<1x128xf32, #tpu.memory_space<any>>
    %c48_i32 = arith.constant 48 : i32
    %c0_i32_46 = arith.constant 0 : i32
    %78 = tpu.memref_slice %arg8[%c48_i32, %c0_i32_46] : memref<64x128xf32, #tpu.memory_space<vmem>> -> memref<1x128xf32, #tpu.memory_space<vmem>>
    %79 = tpu.memref_slice %arg11[%c12_i32] : memref<16x!tpu.dma_semaphore, #tpu.memory_space<semaphore_mem>> -> memref<1x!tpu.dma_semaphore, #tpu.memory_space<semaphore_mem>>
    %80 = tpu.memref_squeeze %79 : memref<1x!tpu.dma_semaphore, #tpu.memory_space<semaphore_mem>> -> memref<!tpu.dma_semaphore, #tpu.memory_space<semaphore_mem>>
    tpu.enqueue_dma source(%77 : memref<1x128xf32, #tpu.memory_space<any>>) target(%78 : memref<1x128xf32, #tpu.memory_space<vmem>>) target_semaphore(%80 : memref<!tpu.dma_semaphore, #tpu.memory_space<semaphore_mem>>)
    %c14 = arith.constant 14 : index
    %81 = memref.load %arg0[%c14] : memref<16xi32, #tpu.memory_space<smem>>
    %c13_i32 = arith.constant 13 : i32
    %c0_i32_47 = arith.constant 0 : i32
    %82 = tpu.memref_slice %arg1[%81, %c0_i32_47] : memref<50x128xf32, #tpu.memory_space<any>> -> memref<1x128xf32, #tpu.memory_space<any>>
    %c49_i32 = arith.constant 49 : i32
    %c0_i32_48 = arith.constant 0 : i32
    %83 = tpu.memref_slice %arg8[%c49_i32, %c0_i32_48] : memref<64x128xf32, #tpu.memory_space<vmem>> -> memref<1x128xf32, #tpu.memory_space<vmem>>
    %84 = tpu.memref_slice %arg11[%c13_i32] : memref<16x!tpu.dma_semaphore, #tpu.memory_space<semaphore_mem>> -> memref<1x!tpu.dma_semaphore, #tpu.memory_space<semaphore_mem>>
    %85 = tpu.memref_squeeze %84 : memref<1x!tpu.dma_semaphore, #tpu.memory_space<semaphore_mem>> -> memref<!tpu.dma_semaphore, #tpu.memory_space<semaphore_mem>>
    tpu.enqueue_dma source(%82 : memref<1x128xf32, #tpu.memory_space<any>>) target(%83 : memref<1x128xf32, #tpu.memory_space<vmem>>) target_semaphore(%85 : memref<!tpu.dma_semaphore, #tpu.memory_space<semaphore_mem>>)
    %c7 = arith.constant 7 : index
    %86 = memref.load %arg0[%c7] : memref<16xi32, #tpu.memory_space<smem>>
    %c14_i32 = arith.constant 14 : i32
    %c0_i32_49 = arith.constant 0 : i32
    %87 = tpu.memref_slice %arg1[%86, %c0_i32_49] : memref<50x128xf32, #tpu.memory_space<any>> -> memref<1x128xf32, #tpu.memory_space<any>>
    %c56_i32 = arith.constant 56 : i32
    %c0_i32_50 = arith.constant 0 : i32
    %88 = tpu.memref_slice %arg8[%c56_i32, %c0_i32_50] : memref<64x128xf32, #tpu.memory_space<vmem>> -> memref<1x128xf32, #tpu.memory_space<vmem>>
    %89 = tpu.memref_slice %arg11[%c14_i32] : memref<16x!tpu.dma_semaphore, #tpu.memory_space<semaphore_mem>> -> memref<1x!tpu.dma_semaphore, #tpu.memory_space<semaphore_mem>>
    %90 = tpu.memref_squeeze %89 : memref<1x!tpu.dma_semaphore, #tpu.memory_space<semaphore_mem>> -> memref<!tpu.dma_semaphore, #tpu.memory_space<semaphore_mem>>
    tpu.enqueue_dma source(%87 : memref<1x128xf32, #tpu.memory_space<any>>) target(%88 : memref<1x128xf32, #tpu.memory_space<vmem>>) target_semaphore(%90 : memref<!tpu.dma_semaphore, #tpu.memory_space<semaphore_mem>>)
    %c15 = arith.constant 15 : index
    %91 = memref.load %arg0[%c15] : memref<16xi32, #tpu.memory_space<smem>>
    %c15_i32 = arith.constant 15 : i32
    %c0_i32_51 = arith.constant 0 : i32
    %92 = tpu.memref_slice %arg1[%91, %c0_i32_51] : memref<50x128xf32, #tpu.memory_space<any>> -> memref<1x128xf32, #tpu.memory_space<any>>
    %c57_i32 = arith.constant 57 : i32
    %c0_i32_52 = arith.constant 0 : i32
    %93 = tpu.memref_slice %arg8[%c57_i32, %c0_i32_52] : memref<64x128xf32, #tpu.memory_space<vmem>> -> memref<1x128xf32, #tpu.memory_space<vmem>>
    %94 = tpu.memref_slice %arg11[%c15_i32] : memref<16x!tpu.dma_semaphore, #tpu.memory_space<semaphore_mem>> -> memref<1x!tpu.dma_semaphore, #tpu.memory_space<semaphore_mem>>
    %95 = tpu.memref_squeeze %94 : memref<1x!tpu.dma_semaphore, #tpu.memory_space<semaphore_mem>> -> memref<!tpu.dma_semaphore, #tpu.memory_space<semaphore_mem>>
    tpu.enqueue_dma source(%92 : memref<1x128xf32, #tpu.memory_space<any>>) target(%93 : memref<1x128xf32, #tpu.memory_space<vmem>>) target_semaphore(%95 : memref<!tpu.dma_semaphore, #tpu.memory_space<semaphore_mem>>)
    %c0_i32_53 = arith.constant 0 : i32
    %c0_i32_54 = arith.constant 0 : i32
    %96 = tpu.memref_slice %arg1[%16, %c0_i32_54] : memref<50x128xf32, #tpu.memory_space<any>> -> memref<1x128xf32, #tpu.memory_space<any>>
    %c0_i32_55 = arith.constant 0 : i32
    %c0_i32_56 = arith.constant 0 : i32
    %97 = tpu.memref_slice %arg8[%c0_i32_55, %c0_i32_56] : memref<64x128xf32, #tpu.memory_space<vmem>> -> memref<1x128xf32, #tpu.memory_space<vmem>>
    %98 = tpu.memref_slice %arg11[%c0_i32_53] : memref<16x!tpu.dma_semaphore, #tpu.memory_space<semaphore_mem>> -> memref<1x!tpu.dma_semaphore, #tpu.memory_space<semaphore_mem>>
    %99 = tpu.memref_squeeze %98 : memref<1x!tpu.dma_semaphore, #tpu.memory_space<semaphore_mem>> -> memref<!tpu.dma_semaphore, #tpu.memory_space<semaphore_mem>>
    tpu.wait_dma2 semaphore(%99 : memref<!tpu.dma_semaphore, #tpu.memory_space<semaphore_mem>>) src(%96 : memref<1x128xf32, #tpu.memory_space<any>>) dst(%97 : memref<1x128xf32, #tpu.memory_space<vmem>>)
    %c1_i32_57 = arith.constant 1 : i32
    %c0_i32_58 = arith.constant 0 : i32
    %100 = tpu.memref_slice %arg1[%21, %c0_i32_58] : memref<50x128xf32, #tpu.memory_space<any>> -> memref<1x128xf32, #tpu.memory_space<any>>
    %c1_i32_59 = arith.constant 1 : i32
    %c0_i32_60 = arith.constant 0 : i32
    %101 = tpu.memref_slice %arg8[%c1_i32_59, %c0_i32_60] : memref<64x128xf32, #tpu.memory_space<vmem>> -> memref<1x128xf32, #tpu.memory_space<vmem>>
    %102 = tpu.memref_slice %arg11[%c1_i32_57] : memref<16x!tpu.dma_semaphore, #tpu.memory_space<semaphore_mem>> -> memref<1x!tpu.dma_semaphore, #tpu.memory_space<semaphore_mem>>
    %103 = tpu.memref_squeeze %102 : memref<1x!tpu.dma_semaphore, #tpu.memory_space<semaphore_mem>> -> memref<!tpu.dma_semaphore, #tpu.memory_space<semaphore_mem>>
    tpu.wait_dma2 semaphore(%103 : memref<!tpu.dma_semaphore, #tpu.memory_space<semaphore_mem>>) src(%100 : memref<1x128xf32, #tpu.memory_space<any>>) dst(%101 : memref<1x128xf32, #tpu.memory_space<vmem>>)
    %c2_i32_61 = arith.constant 2 : i32
    %c0_i32_62 = arith.constant 0 : i32
    %104 = tpu.memref_slice %arg1[%26, %c0_i32_62] : memref<50x128xf32, #tpu.memory_space<any>> -> memref<1x128xf32, #tpu.memory_space<any>>
    %c8_i32_63 = arith.constant 8 : i32
    %c0_i32_64 = arith.constant 0 : i32
    %105 = tpu.memref_slice %arg8[%c8_i32_63, %c0_i32_64] : memref<64x128xf32, #tpu.memory_space<vmem>> -> memref<1x128xf32, #tpu.memory_space<vmem>>
    %106 = tpu.memref_slice %arg11[%c2_i32_61] : memref<16x!tpu.dma_semaphore, #tpu.memory_space<semaphore_mem>> -> memref<1x!tpu.dma_semaphore, #tpu.memory_space<semaphore_mem>>
    %107 = tpu.memref_squeeze %106 : memref<1x!tpu.dma_semaphore, #tpu.memory_space<semaphore_mem>> -> memref<!tpu.dma_semaphore, #tpu.memory_space<semaphore_mem>>
    tpu.wait_dma2 semaphore(%107 : memref<!tpu.dma_semaphore, #tpu.memory_space<semaphore_mem>>) src(%104 : memref<1x128xf32, #tpu.memory_space<any>>) dst(%105 : memref<1x128xf32, #tpu.memory_space<vmem>>)
    %c3_i32_65 = arith.constant 3 : i32
    %c0_i32_66 = arith.constant 0 : i32
    %108 = tpu.memref_slice %arg1[%31, %c0_i32_66] : memref<50x128xf32, #tpu.memory_space<any>> -> memref<1x128xf32, #tpu.memory_space<any>>
    %c9_i32_67 = arith.constant 9 : i32
    %c0_i32_68 = arith.constant 0 : i32
    %109 = tpu.memref_slice %arg8[%c9_i32_67, %c0_i32_68] : memref<64x128xf32, #tpu.memory_space<vmem>> -> memref<1x128xf32, #tpu.memory_space<vmem>>
    %110 = tpu.memref_slice %arg11[%c3_i32_65] : memref<16x!tpu.dma_semaphore, #tpu.memory_space<semaphore_mem>> -> memref<1x!tpu.dma_semaphore, #tpu.memory_space<semaphore_mem>>
    %111 = tpu.memref_squeeze %110 : memref<1x!tpu.dma_semaphore, #tpu.memory_space<semaphore_mem>> -> memref<!tpu.dma_semaphore, #tpu.memory_space<semaphore_mem>>
    tpu.wait_dma2 semaphore(%111 : memref<!tpu.dma_semaphore, #tpu.memory_space<semaphore_mem>>) src(%108 : memref<1x128xf32, #tpu.memory_space<any>>) dst(%109 : memref<1x128xf32, #tpu.memory_space<vmem>>)
    %c4_i32_69 = arith.constant 4 : i32
    %c0_i32_70 = arith.constant 0 : i32
    %112 = tpu.memref_slice %arg1[%36, %c0_i32_70] : memref<50x128xf32, #tpu.memory_space<any>> -> memref<1x128xf32, #tpu.memory_space<any>>
    %c16_i32_71 = arith.constant 16 : i32
    %c0_i32_72 = arith.constant 0 : i32
    %113 = tpu.memref_slice %arg8[%c16_i32_71, %c0_i32_72] : memref<64x128xf32, #tpu.memory_space<vmem>> -> memref<1x128xf32, #tpu.memory_space<vmem>>
    %114 = tpu.memref_slice %arg11[%c4_i32_69] : memref<16x!tpu.dma_semaphore, #tpu.memory_space<semaphore_mem>> -> memref<1x!tpu.dma_semaphore, #tpu.memory_space<semaphore_mem>>
    %115 = tpu.memref_squeeze %114 : memref<1x!tpu.dma_semaphore, #tpu.memory_space<semaphore_mem>> -> memref<!tpu.dma_semaphore, #tpu.memory_space<semaphore_mem>>
    tpu.wait_dma2 semaphore(%115 : memref<!tpu.dma_semaphore, #tpu.memory_space<semaphore_mem>>) src(%112 : memref<1x128xf32, #tpu.memory_space<any>>) dst(%113 : memref<1x128xf32, #tpu.memory_space<vmem>>)
    %c5_i32_73 = arith.constant 5 : i32
    %c0_i32_74 = arith.constant 0 : i32
    %116 = tpu.memref_slice %arg1[%41, %c0_i32_74] : memref<50x128xf32, #tpu.memory_space<any>> -> memref<1x128xf32, #tpu.memory_space<any>>
    %c17_i32_75 = arith.constant 17 : i32
    %c0_i32_76 = arith.constant 0 : i32
    %117 = tpu.memref_slice %arg8[%c17_i32_75, %c0_i32_76] : memref<64x128xf32, #tpu.memory_space<vmem>> -> memref<1x128xf32, #tpu.memory_space<vmem>>
    %118 = tpu.memref_slice %arg11[%c5_i32_73] : memref<16x!tpu.dma_semaphore, #tpu.memory_space<semaphore_mem>> -> memref<1x!tpu.dma_semaphore, #tpu.memory_space<semaphore_mem>>
    %119 = tpu.memref_squeeze %118 : memref<1x!tpu.dma_semaphore, #tpu.memory_space<semaphore_mem>> -> memref<!tpu.dma_semaphore, #tpu.memory_space<semaphore_mem>>
    tpu.wait_dma2 semaphore(%119 : memref<!tpu.dma_semaphore, #tpu.memory_space<semaphore_mem>>) src(%116 : memref<1x128xf32, #tpu.memory_space<any>>) dst(%117 : memref<1x128xf32, #tpu.memory_space<vmem>>)
    %c6_i32_77 = arith.constant 6 : i32
    %c0_i32_78 = arith.constant 0 : i32
    %120 = tpu.memref_slice %arg1[%46, %c0_i32_78] : memref<50x128xf32, #tpu.memory_space<any>> -> memref<1x128xf32, #tpu.memory_space<any>>
    %c24_i32_79 = arith.constant 24 : i32
    %c0_i32_80 = arith.constant 0 : i32
    %121 = tpu.memref_slice %arg8[%c24_i32_79, %c0_i32_80] : memref<64x128xf32, #tpu.memory_space<vmem>> -> memref<1x128xf32, #tpu.memory_space<vmem>>
    %122 = tpu.memref_slice %arg11[%c6_i32_77] : memref<16x!tpu.dma_semaphore, #tpu.memory_space<semaphore_mem>> -> memref<1x!tpu.dma_semaphore, #tpu.memory_space<semaphore_mem>>
    %123 = tpu.memref_squeeze %122 : memref<1x!tpu.dma_semaphore, #tpu.memory_space<semaphore_mem>> -> memref<!tpu.dma_semaphore, #tpu.memory_space<semaphore_mem>>
    tpu.wait_dma2 semaphore(%123 : memref<!tpu.dma_semaphore, #tpu.memory_space<semaphore_mem>>) src(%120 : memref<1x128xf32, #tpu.memory_space<any>>) dst(%121 : memref<1x128xf32, #tpu.memory_space<vmem>>)
    %c7_i32_81 = arith.constant 7 : i32
    %c0_i32_82 = arith.constant 0 : i32
    %124 = tpu.memref_slice %arg1[%51, %c0_i32_82] : memref<50x128xf32, #tpu.memory_space<any>> -> memref<1x128xf32, #tpu.memory_space<any>>
    %c25_i32_83 = arith.constant 25 : i32
    %c0_i32_84 = arith.constant 0 : i32
    %125 = tpu.memref_slice %arg8[%c25_i32_83, %c0_i32_84] : memref<64x128xf32, #tpu.memory_space<vmem>> -> memref<1x128xf32, #tpu.memory_space<vmem>>
    %126 = tpu.memref_slice %arg11[%c7_i32_81] : memref<16x!tpu.dma_semaphore, #tpu.memory_space<semaphore_mem>> -> memref<1x!tpu.dma_semaphore, #tpu.memory_space<semaphore_mem>>
    %127 = tpu.memref_squeeze %126 : memref<1x!tpu.dma_semaphore, #tpu.memory_space<semaphore_mem>> -> memref<!tpu.dma_semaphore, #tpu.memory_space<semaphore_mem>>
    tpu.wait_dma2 semaphore(%127 : memref<!tpu.dma_semaphore, #tpu.memory_space<semaphore_mem>>) src(%124 : memref<1x128xf32, #tpu.memory_space<any>>) dst(%125 : memref<1x128xf32, #tpu.memory_space<vmem>>)
    %c8_i32_85 = arith.constant 8 : i32
    %c0_i32_86 = arith.constant 0 : i32
    %128 = tpu.memref_slice %arg1[%56, %c0_i32_86] : memref<50x128xf32, #tpu.memory_space<any>> -> memref<1x128xf32, #tpu.memory_space<any>>
    %c32_i32_87 = arith.constant 32 : i32
    %c0_i32_88 = arith.constant 0 : i32
    %129 = tpu.memref_slice %arg8[%c32_i32_87, %c0_i32_88] : memref<64x128xf32, #tpu.memory_space<vmem>> -> memref<1x128xf32, #tpu.memory_space<vmem>>
    %130 = tpu.memref_slice %arg11[%c8_i32_85] : memref<16x!tpu.dma_semaphore, #tpu.memory_space<semaphore_mem>> -> memref<1x!tpu.dma_semaphore, #tpu.memory_space<semaphore_mem>>
    %131 = tpu.memref_squeeze %130 : memref<1x!tpu.dma_semaphore, #tpu.memory_space<semaphore_mem>> -> memref<!tpu.dma_semaphore, #tpu.memory_space<semaphore_mem>>
    tpu.wait_dma2 semaphore(%131 : memref<!tpu.dma_semaphore, #tpu.memory_space<semaphore_mem>>) src(%128 : memref<1x128xf32, #tpu.memory_space<any>>) dst(%129 : memref<1x128xf32, #tpu.memory_space<vmem>>)
    %c9_i32_89 = arith.constant 9 : i32
    %c0_i32_90 = arith.constant 0 : i32
    %132 = tpu.memref_slice %arg1[%61, %c0_i32_90] : memref<50x128xf32, #tpu.memory_space<any>> -> memref<1x128xf32, #tpu.memory_space<any>>
    %c33_i32_91 = arith.constant 33 : i32
    %c0_i32_92 = arith.constant 0 : i32
    %133 = tpu.memref_slice %arg8[%c33_i32_91, %c0_i32_92] : memref<64x128xf32, #tpu.memory_space<vmem>> -> memref<1x128xf32, #tpu.memory_space<vmem>>
    %134 = tpu.memref_slice %arg11[%c9_i32_89] : memref<16x!tpu.dma_semaphore, #tpu.memory_space<semaphore_mem>> -> memref<1x!tpu.dma_semaphore, #tpu.memory_space<semaphore_mem>>
    %135 = tpu.memref_squeeze %134 : memref<1x!tpu.dma_semaphore, #tpu.memory_space<semaphore_mem>> -> memref<!tpu.dma_semaphore, #tpu.memory_space<semaphore_mem>>
    tpu.wait_dma2 semaphore(%135 : memref<!tpu.dma_semaphore, #tpu.memory_space<semaphore_mem>>) src(%132 : memref<1x128xf32, #tpu.memory_space<any>>) dst(%133 : memref<1x128xf32, #tpu.memory_space<vmem>>)
    %c10_i32_93 = arith.constant 10 : i32
    %c0_i32_94 = arith.constant 0 : i32
    %136 = tpu.memref_slice %arg1[%66, %c0_i32_94] : memref<50x128xf32, #tpu.memory_space<any>> -> memref<1x128xf32, #tpu.memory_space<any>>
    %c40_i32_95 = arith.constant 40 : i32
    %c0_i32_96 = arith.constant 0 : i32
    %137 = tpu.memref_slice %arg8[%c40_i32_95, %c0_i32_96] : memref<64x128xf32, #tpu.memory_space<vmem>> -> memref<1x128xf32, #tpu.memory_space<vmem>>
    %138 = tpu.memref_slice %arg11[%c10_i32_93] : memref<16x!tpu.dma_semaphore, #tpu.memory_space<semaphore_mem>> -> memref<1x!tpu.dma_semaphore, #tpu.memory_space<semaphore_mem>>
    %139 = tpu.memref_squeeze %138 : memref<1x!tpu.dma_semaphore, #tpu.memory_space<semaphore_mem>> -> memref<!tpu.dma_semaphore, #tpu.memory_space<semaphore_mem>>
    tpu.wait_dma2 semaphore(%139 : memref<!tpu.dma_semaphore, #tpu.memory_space<semaphore_mem>>) src(%136 : memref<1x128xf32, #tpu.memory_space<any>>) dst(%137 : memref<1x128xf32, #tpu.memory_space<vmem>>)
    %c11_i32_97 = arith.constant 11 : i32
    %c0_i32_98 = arith.constant 0 : i32
    %140 = tpu.memref_slice %arg1[%71, %c0_i32_98] : memref<50x128xf32, #tpu.memory_space<any>> -> memref<1x128xf32, #tpu.memory_space<any>>
    %c41_i32_99 = arith.constant 41 : i32
    %c0_i32_100 = arith.constant 0 : i32
    %141 = tpu.memref_slice %arg8[%c41_i32_99, %c0_i32_100] : memref<64x128xf32, #tpu.memory_space<vmem>> -> memref<1x128xf32, #tpu.memory_space<vmem>>
    %142 = tpu.memref_slice %arg11[%c11_i32_97] : memref<16x!tpu.dma_semaphore, #tpu.memory_space<semaphore_mem>> -> memref<1x!tpu.dma_semaphore, #tpu.memory_space<semaphore_mem>>
    %143 = tpu.memref_squeeze %142 : memref<1x!tpu.dma_semaphore, #tpu.memory_space<semaphore_mem>> -> memref<!tpu.dma_semaphore, #tpu.memory_space<semaphore_mem>>
    tpu.wait_dma2 semaphore(%143 : memref<!tpu.dma_semaphore, #tpu.memory_space<semaphore_mem>>) src(%140 : memref<1x128xf32, #tpu.memory_space<any>>) dst(%141 : memref<1x128xf32, #tpu.memory_space<vmem>>)
    %c12_i32_101 = arith.constant 12 : i32
    %c0_i32_102 = arith.constant 0 : i32
    %144 = tpu.memref_slice %arg1[%76, %c0_i32_102] : memref<50x128xf32, #tpu.memory_space<any>> -> memref<1x128xf32, #tpu.memory_space<any>>
    %c48_i32_103 = arith.constant 48 : i32
    %c0_i32_104 = arith.constant 0 : i32
    %145 = tpu.memref_slice %arg8[%c48_i32_103, %c0_i32_104] : memref<64x128xf32, #tpu.memory_space<vmem>> -> memref<1x128xf32, #tpu.memory_space<vmem>>
    %146 = tpu.memref_slice %arg11[%c12_i32_101] : memref<16x!tpu.dma_semaphore, #tpu.memory_space<semaphore_mem>> -> memref<1x!tpu.dma_semaphore, #tpu.memory_space<semaphore_mem>>
    %147 = tpu.memref_squeeze %146 : memref<1x!tpu.dma_semaphore, #tpu.memory_space<semaphore_mem>> -> memref<!tpu.dma_semaphore, #tpu.memory_space<semaphore_mem>>
    tpu.wait_dma2 semaphore(%147 : memref<!tpu.dma_semaphore, #tpu.memory_space<semaphore_mem>>) src(%144 : memref<1x128xf32, #tpu.memory_space<any>>) dst(%145 : memref<1x128xf32, #tpu.memory_space<vmem>>)
    %c13_i32_105 = arith.constant 13 : i32
    %c0_i32_106 = arith.constant 0 : i32
    %148 = tpu.memref_slice %arg1[%81, %c0_i32_106] : memref<50x128xf32, #tpu.memory_space<any>> -> memref<1x128xf32, #tpu.memory_space<any>>
    %c49_i32_107 = arith.constant 49 : i32
    %c0_i32_108 = arith.constant 0 : i32
    %149 = tpu.memref_slice %arg8[%c49_i32_107, %c0_i32_108] : memref<64x128xf32, #tpu.memory_space<vmem>> -> memref<1x128xf32, #tpu.memory_space<vmem>>
    %150 = tpu.memref_slice %arg11[%c13_i32_105] : memref<16x!tpu.dma_semaphore, #tpu.memory_space<semaphore_mem>> -> memref<1x!tpu.dma_semaphore, #tpu.memory_space<semaphore_mem>>
    %151 = tpu.memref_squeeze %150 : memref<1x!tpu.dma_semaphore, #tpu.memory_space<semaphore_mem>> -> memref<!tpu.dma_semaphore, #tpu.memory_space<semaphore_mem>>
    tpu.wait_dma2 semaphore(%151 : memref<!tpu.dma_semaphore, #tpu.memory_space<semaphore_mem>>) src(%148 : memref<1x128xf32, #tpu.memory_space<any>>) dst(%149 : memref<1x128xf32, #tpu.memory_space<vmem>>)
    %c14_i32_109 = arith.constant 14 : i32
    %c0_i32_110 = arith.constant 0 : i32
    %152 = tpu.memref_slice %arg1[%86, %c0_i32_110] : memref<50x128xf32, #tpu.memory_space<any>> -> memref<1x128xf32, #tpu.memory_space<any>>
    %c56_i32_111 = arith.constant 56 : i32
    %c0_i32_112 = arith.constant 0 : i32
    %153 = tpu.memref_slice %arg8[%c56_i32_111, %c0_i32_112] : memref<64x128xf32, #tpu.memory_space<vmem>> -> memref<1x128xf32, #tpu.memory_space<vmem>>
    %154 = tpu.memref_slice %arg11[%c14_i32_109] : memref<16x!tpu.dma_semaphore, #tpu.memory_space<semaphore_mem>> -> memref<1x!tpu.dma_semaphore, #tpu.memory_space<semaphore_mem>>
    %155 = tpu.memref_squeeze %154 : memref<1x!tpu.dma_semaphore, #tpu.memory_space<semaphore_mem>> -> memref<!tpu.dma_semaphore, #tpu.memory_space<semaphore_mem>>
    tpu.wait_dma2 semaphore(%155 : memref<!tpu.dma_semaphore, #tpu.memory_space<semaphore_mem>>) src(%152 : memref<1x128xf32, #tpu.memory_space<any>>) dst(%153 : memref<1x128xf32, #tpu.memory_space<vmem>>)
    %c15_i32_113 = arith.constant 15 : i32
    %c0_i32_114 = arith.constant 0 : i32
    %156 = tpu.memref_slice %arg1[%91, %c0_i32_114] : memref<50x128xf32, #tpu.memory_space<any>> -> memref<1x128xf32, #tpu.memory_space<any>>
    %c57_i32_115 = arith.constant 57 : i32
    %c0_i32_116 = arith.constant 0 : i32
    %157 = tpu.memref_slice %arg8[%c57_i32_115, %c0_i32_116] : memref<64x128xf32, #tpu.memory_space<vmem>> -> memref<1x128xf32, #tpu.memory_space<vmem>>
    %158 = tpu.memref_slice %arg11[%c15_i32_113] : memref<16x!tpu.dma_semaphore, #tpu.memory_space<semaphore_mem>> -> memref<1x!tpu.dma_semaphore, #tpu.memory_space<semaphore_mem>>
    %159 = tpu.memref_squeeze %158 : memref<1x!tpu.dma_semaphore, #tpu.memory_space<semaphore_mem>> -> memref<!tpu.dma_semaphore, #tpu.memory_space<semaphore_mem>>
    tpu.wait_dma2 semaphore(%159 : memref<!tpu.dma_semaphore, #tpu.memory_space<semaphore_mem>>) src(%156 : memref<1x128xf32, #tpu.memory_space<any>>) dst(%157 : memref<1x128xf32, #tpu.memory_space<vmem>>)
    %c0_117 = arith.constant 0 : index
    %c0_118 = arith.constant 0 : index
    %160 = vector.load %arg8[%c0_117, %c0_118] : memref<64x128xf32, #tpu.memory_space<vmem>>, vector<64x128xf32>
    %c0_119 = arith.constant 0 : index
    %c0_120 = arith.constant 0 : index
    %161 = vector.load %arg2[%c0_119, %c0_120] : memref<128x512xf32, #tpu.memory_space<vmem>>, vector<128x512xf32>
    %cst_121 = arith.constant dense<0.000000e+00> : vector<64x512xf32>
    %162 = tpu.matmul %160, %161, %cst_121 {dimension_numbers = #tpu.dot_dimension_numbers<[1], [0], [0], [1], [0, 0, 1, 1], [], []>} : vector<64x128xf32>, vector<128x512xf32>, vector<64x512xf32> -> vector<64x512xf32>
    %c0_122 = arith.constant 0 : index
    %c0_123 = arith.constant 0 : index
    %163 = vector.load %arg4[%c0_122, %c0_123] : memref<1x512xf32, #tpu.memory_space<vmem>>, vector<1x512xf32>
    %164 = vector.broadcast %163 : vector<1x512xf32> to vector<64x512xf32>
    %165 = arith.addf %162, %164 : vector<64x512xf32>
    %c0_124 = arith.constant 0 : index
    %c0_125 = arith.constant 0 : index
    %166 = vector.load %arg9[%c0_124, %c0_125] : memref<64x512xf32, #tpu.memory_space<vmem>>, vector<64x512xf32>
    tpu.vector_store %arg9[%c0_124, %c0_125], %165 {strides = array<i32>} : memref<64x512xf32, #tpu.memory_space<vmem>>, vector<64x512xf32>,
    %c0_126 = arith.constant 0 : index
    %c0_127 = arith.constant 0 : index
    %167 = vector.load %arg3[%c0_126, %c0_127] : memref<128x512xf32, #tpu.memory_space<vmem>>, vector<128x512xf32>
    %cst_128 = arith.constant 0.000000e+00 : f32
    %168 = vector.broadcast %cst_128 : f32 to vector<8x128xf32>
    %cst_129 = arith.constant 0.000000e+00 : f32
    %169 = vector.broadcast %cst_129 : f32 to vector<8x128xf32>
    %c0_130 = arith.constant 0 : index
    %c0_131 = arith.constant 0 : index
    %170 = vector.load %arg9[%c0_130, %c0_131] : memref<64x512xf32, #tpu.memory_space<vmem>>, vector<8x512xf32>
    %cst_132 = arith.constant dense<0.000000e+00> : vector<8x512xf32>
    %171 = tpu.matmul %168, %167, %cst_132 {dimension_numbers = #tpu.dot_dimension_numbers<[1], [0], [0], [1], [0, 0, 1, 1], [], []>} : vector<8x128xf32>, vector<128x512xf32>, vector<8x512xf32> -> vector<8x512xf32>
    %172 = arith.addf %170, %171 : vector<8x512xf32>
    %173 = vector.extract_strided_slice %172 {offsets = [0, 0], sizes = [8, 384], strides = [1, 1]} : vector<8x512xf32> to vector<8x384xf32>
    %174 = arith.negf %173 : vector<8x384xf32>
    %175 = math.exp %174 : vector<8x384xf32>
    %cst_133 = arith.constant 1.000000e+00 : f32
    %176 = vector.broadcast %cst_133 : f32 to vector<8x384xf32>
    %177 = arith.addf %176, %175 : vector<8x384xf32>
    %178 = arith.divf %176, %177 : vector<8x384xf32>
    %179 = vector.extract_strided_slice %178 {offsets = [0, 0], sizes = [8, 128], strides = [1, 1]} : vector<8x384xf32> to vector<8x128xf32>
    %180 = vector.extract_strided_slice %178 {offsets = [0, 128], sizes = [8, 128], strides = [1, 1]} : vector<8x384xf32> to vector<8x128xf32>
    %181 = vector.extract_strided_slice %178 {offsets = [0, 256], sizes = [8, 128], strides = [1, 1]} : vector<8x384xf32> to vector<8x128xf32>
    %182 = vector.extract_strided_slice %172 {offsets = [0, 384], sizes = [8, 128], strides = [1, 1]} : vector<8x512xf32> to vector<8x128xf32>
    %183 = math.tanh %182 : vector<8x128xf32>
    %184 = arith.mulf %180, %169 : vector<8x128xf32>
    %185 = arith.mulf %179, %183 : vector<8x128xf32>
    %186 = arith.addf %184, %185 : vector<8x128xf32>
    %187 = math.tanh %186 : vector<8x128xf32>
    %188 = arith.mulf %181, %187 : vector<8x128xf32>
    %c0_134 = arith.constant 0 : index
    %c0_135 = arith.constant 0 : index
    %189 = vector.load %arg10[%c0_134, %c0_135] : memref<64x128xf32, #tpu.memory_space<vmem>>, vector<8x128xf32>
    tpu.vector_store %arg10[%c0_134, %c0_135], %188 {strides = array<i32>} : memref<64x128xf32, #tpu.memory_space<vmem>>, vector<8x128xf32>,
    %c8_136 = arith.constant 8 : index
    %c0_137 = arith.constant 0 : index
    %190 = vector.load %arg9[%c8_136, %c0_137] : memref<64x512xf32, #tpu.memory_space<vmem>>, vector<8x512xf32>
    %cst_138 = arith.constant dense<0.000000e+00> : vector<8x512xf32>
    %191 = tpu.matmul %188, %167, %cst_138 {dimension_numbers = #tpu.dot_dimension_numbers<[1], [0], [0], [1], [0, 0, 1, 1], [], []>} : vector<8x128xf32>, vector<128x512xf32>, vector<8x512xf32> -> vector<8x512xf32>
    %192 = arith.addf %190, %191 : vector<8x512xf32>
    %193 = vector.extract_strided_slice %192 {offsets = [0, 0], sizes = [8, 384], strides = [1, 1]} : vector<8x512xf32> to vector<8x384xf32>
    %194 = arith.negf %193 : vector<8x384xf32>
    %195 = math.exp %194 : vector<8x384xf32>
    %cst_139 = arith.constant 1.000000e+00 : f32
    %196 = vector.broadcast %cst_139 : f32 to vector<8x384xf32>
    %197 = arith.addf %196, %195 : vector<8x384xf32>
    %198 = arith.divf %196, %197 : vector<8x384xf32>
    %199 = vector.extract_strided_slice %198 {offsets = [0, 0], sizes = [8, 128], strides = [1, 1]} : vector<8x384xf32> to vector<8x128xf32>
    %200 = vector.extract_strided_slice %198 {offsets = [0, 128], sizes = [8, 128], strides = [1, 1]} : vector<8x384xf32> to vector<8x128xf32>
    %201 = vector.extract_strided_slice %198 {offsets = [0, 256], sizes = [8, 128], strides = [1, 1]} : vector<8x384xf32> to vector<8x128xf32>
    %202 = vector.extract_strided_slice %192 {offsets = [0, 384], sizes = [8, 128], strides = [1, 1]} : vector<8x512xf32> to vector<8x128xf32>
    %203 = math.tanh %202 : vector<8x128xf32>
    %204 = arith.mulf %200, %186 : vector<8x128xf32>
    %205 = arith.mulf %199, %203 : vector<8x128xf32>
    %206 = arith.addf %204, %205 : vector<8x128xf32>
    %207 = math.tanh %206 : vector<8x128xf32>
    %208 = arith.mulf %201, %207 : vector<8x128xf32>
    %c8_140 = arith.constant 8 : index
    %c0_141 = arith.constant 0 : index
    %209 = vector.load %arg10[%c8_140, %c0_141] : memref<64x128xf32, #tpu.memory_space<vmem>>, vector<8x128xf32>
    tpu.vector_store %arg10[%c8_140, %c0_141], %208 {strides = array<i32>} : memref<64x128xf32, #tpu.memory_space<vmem>>, vector<8x128xf32>,
    %c16 = arith.constant 16 : index
    %c0_142 = arith.constant 0 : index
    %210 = vector.load %arg9[%c16, %c0_142] : memref<64x512xf32, #tpu.memory_space<vmem>>, vector<8x512xf32>
    %cst_143 = arith.constant dense<0.000000e+00> : vector<8x512xf32>
    %211 = tpu.matmul %208, %167, %cst_143 {dimension_numbers = #tpu.dot_dimension_numbers<[1], [0], [0], [1], [0, 0, 1, 1], [], []>} : vector<8x128xf32>, vector<128x512xf32>, vector<8x512xf32> -> vector<8x512xf32>
    %212 = arith.addf %210, %211 : vector<8x512xf32>
    %213 = vector.extract_strided_slice %212 {offsets = [0, 0], sizes = [8, 384], strides = [1, 1]} : vector<8x512xf32> to vector<8x384xf32>
    %214 = arith.negf %213 : vector<8x384xf32>
    %215 = math.exp %214 : vector<8x384xf32>
    %cst_144 = arith.constant 1.000000e+00 : f32
    %216 = vector.broadcast %cst_144 : f32 to vector<8x384xf32>
    %217 = arith.addf %216, %215 : vector<8x384xf32>
    %218 = arith.divf %216, %217 : vector<8x384xf32>
    %219 = vector.extract_strided_slice %218 {offsets = [0, 0], sizes = [8, 128], strides = [1, 1]} : vector<8x384xf32> to vector<8x128xf32>
    %220 = vector.extract_strided_slice %218 {offsets = [0, 128], sizes = [8, 128], strides = [1, 1]} : vector<8x384xf32> to vector<8x128xf32>
    %221 = vector.extract_strided_slice %218 {offsets = [0, 256], sizes = [8, 128], strides = [1, 1]} : vector<8x384xf32> to vector<8x128xf32>
    %222 = vector.extract_strided_slice %212 {offsets = [0, 384], sizes = [8, 128], strides = [1, 1]} : vector<8x512xf32> to vector<8x128xf32>
    %223 = math.tanh %222 : vector<8x128xf32>
    %224 = arith.mulf %220, %206 : vector<8x128xf32>
    %225 = arith.mulf %219, %223 : vector<8x128xf32>
    %226 = arith.addf %224, %225 : vector<8x128xf32>
    %227 = math.tanh %226 : vector<8x128xf32>
    %228 = arith.mulf %221, %227 : vector<8x128xf32>
    %c16_145 = arith.constant 16 : index
    %c0_146 = arith.constant 0 : index
    %229 = vector.load %arg10[%c16_145, %c0_146] : memref<64x128xf32, #tpu.memory_space<vmem>>, vector<8x128xf32>
    tpu.vector_store %arg10[%c16_145, %c0_146], %228 {strides = array<i32>} : memref<64x128xf32, #tpu.memory_space<vmem>>, vector<8x128xf32>,
    %c24 = arith.constant 24 : index
    %c0_147 = arith.constant 0 : index
    %230 = vector.load %arg9[%c24, %c0_147] : memref<64x512xf32, #tpu.memory_space<vmem>>, vector<8x512xf32>
    %cst_148 = arith.constant dense<0.000000e+00> : vector<8x512xf32>
    %231 = tpu.matmul %228, %167, %cst_148 {dimension_numbers = #tpu.dot_dimension_numbers<[1], [0], [0], [1], [0, 0, 1, 1], [], []>} : vector<8x128xf32>, vector<128x512xf32>, vector<8x512xf32> -> vector<8x512xf32>
    %232 = arith.addf %230, %231 : vector<8x512xf32>
    %233 = vector.extract_strided_slice %232 {offsets = [0, 0], sizes = [8, 384], strides = [1, 1]} : vector<8x512xf32> to vector<8x384xf32>
    %234 = arith.negf %233 : vector<8x384xf32>
    %235 = math.exp %234 : vector<8x384xf32>
    %cst_149 = arith.constant 1.000000e+00 : f32
    %236 = vector.broadcast %cst_149 : f32 to vector<8x384xf32>
    %237 = arith.addf %236, %235 : vector<8x384xf32>
    %238 = arith.divf %236, %237 : vector<8x384xf32>
    %239 = vector.extract_strided_slice %238 {offsets = [0, 0], sizes = [8, 128], strides = [1, 1]} : vector<8x384xf32> to vector<8x128xf32>
    %240 = vector.extract_strided_slice %238 {offsets = [0, 128], sizes = [8, 128], strides = [1, 1]} : vector<8x384xf32> to vector<8x128xf32>
    %241 = vector.extract_strided_slice %238 {offsets = [0, 256], sizes = [8, 128], strides = [1, 1]} : vector<8x384xf32> to vector<8x128xf32>
    %242 = vector.extract_strided_slice %232 {offsets = [0, 384], sizes = [8, 128], strides = [1, 1]} : vector<8x512xf32> to vector<8x128xf32>
    %243 = math.tanh %242 : vector<8x128xf32>
    %244 = arith.mulf %240, %226 : vector<8x128xf32>
    %245 = arith.mulf %239, %243 : vector<8x128xf32>
    %246 = arith.addf %244, %245 : vector<8x128xf32>
    %247 = math.tanh %246 : vector<8x128xf32>
    %248 = arith.mulf %241, %247 : vector<8x128xf32>
    %c24_150 = arith.constant 24 : index
    %c0_151 = arith.constant 0 : index
    %249 = vector.load %arg10[%c24_150, %c0_151] : memref<64x128xf32, #tpu.memory_space<vmem>>, vector<8x128xf32>
    tpu.vector_store %arg10[%c24_150, %c0_151], %248 {strides = array<i32>} : memref<64x128xf32, #tpu.memory_space<vmem>>, vector<8x128xf32>,
    %c32 = arith.constant 32 : index
    %c0_152 = arith.constant 0 : index
    %250 = vector.load %arg9[%c32, %c0_152] : memref<64x512xf32, #tpu.memory_space<vmem>>, vector<8x512xf32>
    %cst_153 = arith.constant dense<0.000000e+00> : vector<8x512xf32>
    %251 = tpu.matmul %248, %167, %cst_153 {dimension_numbers = #tpu.dot_dimension_numbers<[1], [0], [0], [1], [0, 0, 1, 1], [], []>} : vector<8x128xf32>, vector<128x512xf32>, vector<8x512xf32> -> vector<8x512xf32>
    %252 = arith.addf %250, %251 : vector<8x512xf32>
    %253 = vector.extract_strided_slice %252 {offsets = [0, 0], sizes = [8, 384], strides = [1, 1]} : vector<8x512xf32> to vector<8x384xf32>
    %254 = arith.negf %253 : vector<8x384xf32>
    %255 = math.exp %254 : vector<8x384xf32>
    %cst_154 = arith.constant 1.000000e+00 : f32
    %256 = vector.broadcast %cst_154 : f32 to vector<8x384xf32>
    %257 = arith.addf %256, %255 : vector<8x384xf32>
    %258 = arith.divf %256, %257 : vector<8x384xf32>
    %259 = vector.extract_strided_slice %258 {offsets = [0, 0], sizes = [8, 128], strides = [1, 1]} : vector<8x384xf32> to vector<8x128xf32>
    %260 = vector.extract_strided_slice %258 {offsets = [0, 128], sizes = [8, 128], strides = [1, 1]} : vector<8x384xf32> to vector<8x128xf32>
    %261 = vector.extract_strided_slice %258 {offsets = [0, 256], sizes = [8, 128], strides = [1, 1]} : vector<8x384xf32> to vector<8x128xf32>
    %262 = vector.extract_strided_slice %252 {offsets = [0, 384], sizes = [8, 128], strides = [1, 1]} : vector<8x512xf32> to vector<8x128xf32>
    %263 = math.tanh %262 : vector<8x128xf32>
    %264 = arith.mulf %260, %246 : vector<8x128xf32>
    %265 = arith.mulf %259, %263 : vector<8x128xf32>
    %266 = arith.addf %264, %265 : vector<8x128xf32>
    %267 = math.tanh %266 : vector<8x128xf32>
    %268 = arith.mulf %261, %267 : vector<8x128xf32>
    %c32_155 = arith.constant 32 : index
    %c0_156 = arith.constant 0 : index
    %269 = vector.load %arg10[%c32_155, %c0_156] : memref<64x128xf32, #tpu.memory_space<vmem>>, vector<8x128xf32>
    tpu.vector_store %arg10[%c32_155, %c0_156], %268 {strides = array<i32>} : memref<64x128xf32, #tpu.memory_space<vmem>>, vector<8x128xf32>,
    %c40 = arith.constant 40 : index
    %c0_157 = arith.constant 0 : index
    %270 = vector.load %arg9[%c40, %c0_157] : memref<64x512xf32, #tpu.memory_space<vmem>>, vector<8x512xf32>
    %cst_158 = arith.constant dense<0.000000e+00> : vector<8x512xf32>
    %271 = tpu.matmul %268, %167, %cst_158 {dimension_numbers = #tpu.dot_dimension_numbers<[1], [0], [0], [1], [0, 0, 1, 1], [], []>} : vector<8x128xf32>, vector<128x512xf32>, vector<8x512xf32> -> vector<8x512xf32>
    %272 = arith.addf %270, %271 : vector<8x512xf32>
    %273 = vector.extract_strided_slice %272 {offsets = [0, 0], sizes = [8, 384], strides = [1, 1]} : vector<8x512xf32> to vector<8x384xf32>
    %274 = arith.negf %273 : vector<8x384xf32>
    %275 = math.exp %274 : vector<8x384xf32>
    %cst_159 = arith.constant 1.000000e+00 : f32
    %276 = vector.broadcast %cst_159 : f32 to vector<8x384xf32>
    %277 = arith.addf %276, %275 : vector<8x384xf32>
    %278 = arith.divf %276, %277 : vector<8x384xf32>
    %279 = vector.extract_strided_slice %278 {offsets = [0, 0], sizes = [8, 128], strides = [1, 1]} : vector<8x384xf32> to vector<8x128xf32>
    %280 = vector.extract_strided_slice %278 {offsets = [0, 128], sizes = [8, 128], strides = [1, 1]} : vector<8x384xf32> to vector<8x128xf32>
    %281 = vector.extract_strided_slice %278 {offsets = [0, 256], sizes = [8, 128], strides = [1, 1]} : vector<8x384xf32> to vector<8x128xf32>
    %282 = vector.extract_strided_slice %272 {offsets = [0, 384], sizes = [8, 128], strides = [1, 1]} : vector<8x512xf32> to vector<8x128xf32>
    %283 = math.tanh %282 : vector<8x128xf32>
    %284 = arith.mulf %280, %266 : vector<8x128xf32>
    %285 = arith.mulf %279, %283 : vector<8x128xf32>
    %286 = arith.addf %284, %285 : vector<8x128xf32>
    %287 = math.tanh %286 : vector<8x128xf32>
    %288 = arith.mulf %281, %287 : vector<8x128xf32>
    %c40_160 = arith.constant 40 : index
    %c0_161 = arith.constant 0 : index
    %289 = vector.load %arg10[%c40_160, %c0_161] : memref<64x128xf32, #tpu.memory_space<vmem>>, vector<8x128xf32>
    tpu.vector_store %arg10[%c40_160, %c0_161], %288 {strides = array<i32>} : memref<64x128xf32, #tpu.memory_space<vmem>>, vector<8x128xf32>,
    %c48 = arith.constant 48 : index
    %c0_162 = arith.constant 0 : index
    %290 = vector.load %arg9[%c48, %c0_162] : memref<64x512xf32, #tpu.memory_space<vmem>>, vector<8x512xf32>
    %cst_163 = arith.constant dense<0.000000e+00> : vector<8x512xf32>
    %291 = tpu.matmul %288, %167, %cst_163 {dimension_numbers = #tpu.dot_dimension_numbers<[1], [0], [0], [1], [0, 0, 1, 1], [], []>} : vector<8x128xf32>, vector<128x512xf32>, vector<8x512xf32> -> vector<8x512xf32>
    %292 = arith.addf %290, %291 : vector<8x512xf32>
    %293 = vector.extract_strided_slice %292 {offsets = [0, 0], sizes = [8, 384], strides = [1, 1]} : vector<8x512xf32> to vector<8x384xf32>
    %294 = arith.negf %293 : vector<8x384xf32>
    %295 = math.exp %294 : vector<8x384xf32>
    %cst_164 = arith.constant 1.000000e+00 : f32
    %296 = vector.broadcast %cst_164 : f32 to vector<8x384xf32>
    %297 = arith.addf %296, %295 : vector<8x384xf32>
    %298 = arith.divf %296, %297 : vector<8x384xf32>
    %299 = vector.extract_strided_slice %298 {offsets = [0, 0], sizes = [8, 128], strides = [1, 1]} : vector<8x384xf32> to vector<8x128xf32>
    %300 = vector.extract_strided_slice %298 {offsets = [0, 128], sizes = [8, 128], strides = [1, 1]} : vector<8x384xf32> to vector<8x128xf32>
    %301 = vector.extract_strided_slice %298 {offsets = [0, 256], sizes = [8, 128], strides = [1, 1]} : vector<8x384xf32> to vector<8x128xf32>
    %302 = vector.extract_strided_slice %292 {offsets = [0, 384], sizes = [8, 128], strides = [1, 1]} : vector<8x512xf32> to vector<8x128xf32>
    %303 = math.tanh %302 : vector<8x128xf32>
    %304 = arith.mulf %300, %286 : vector<8x128xf32>
    %305 = arith.mulf %299, %303 : vector<8x128xf32>
    %306 = arith.addf %304, %305 : vector<8x128xf32>
    %307 = math.tanh %306 : vector<8x128xf32>
    %308 = arith.mulf %301, %307 : vector<8x128xf32>
    %c48_165 = arith.constant 48 : index
    %c0_166 = arith.constant 0 : index
    %309 = vector.load %arg10[%c48_165, %c0_166] : memref<64x128xf32, #tpu.memory_space<vmem>>, vector<8x128xf32>
    tpu.vector_store %arg10[%c48_165, %c0_166], %308 {strides = array<i32>} : memref<64x128xf32, #tpu.memory_space<vmem>>, vector<8x128xf32>,
    %c56 = arith.constant 56 : index
    %c0_167 = arith.constant 0 : index
    %310 = vector.load %arg9[%c56, %c0_167] : memref<64x512xf32, #tpu.memory_space<vmem>>, vector<8x512xf32>
    %cst_168 = arith.constant dense<0.000000e+00> : vector<8x512xf32>
    %311 = tpu.matmul %308, %167, %cst_168 {dimension_numbers = #tpu.dot_dimension_numbers<[1], [0], [0], [1], [0, 0, 1, 1], [], []>} : vector<8x128xf32>, vector<128x512xf32>, vector<8x512xf32> -> vector<8x512xf32>
    %312 = arith.addf %310, %311 : vector<8x512xf32>
    %313 = vector.extract_strided_slice %312 {offsets = [0, 0], sizes = [8, 384], strides = [1, 1]} : vector<8x512xf32> to vector<8x384xf32>
    %314 = arith.negf %313 : vector<8x384xf32>
    %315 = math.exp %314 : vector<8x384xf32>
    %cst_169 = arith.constant 1.000000e+00 : f32
    %316 = vector.broadcast %cst_169 : f32 to vector<8x384xf32>
    %317 = arith.addf %316, %315 : vector<8x384xf32>
    %318 = arith.divf %316, %317 : vector<8x384xf32>
    %319 = vector.extract_strided_slice %318 {offsets = [0, 0], sizes = [8, 128], strides = [1, 1]} : vector<8x384xf32> to vector<8x128xf32>
    %320 = vector.extract_strided_slice %318 {offsets = [0, 128], sizes = [8, 128], strides = [1, 1]} : vector<8x384xf32> to vector<8x128xf32>
    %321 = vector.extract_strided_slice %318 {offsets = [0, 256], sizes = [8, 128], strides = [1, 1]} : vector<8x384xf32> to vector<8x128xf32>
    %322 = vector.extract_strided_slice %312 {offsets = [0, 384], sizes = [8, 128], strides = [1, 1]} : vector<8x512xf32> to vector<8x128xf32>
    %323 = math.tanh %322 : vector<8x128xf32>
    %324 = arith.mulf %320, %306 : vector<8x128xf32>
    %325 = arith.mulf %319, %323 : vector<8x128xf32>
    %326 = arith.addf %324, %325 : vector<8x128xf32>
    %327 = math.tanh %326 : vector<8x128xf32>
    %328 = arith.mulf %321, %327 : vector<8x128xf32>
    %c56_170 = arith.constant 56 : index
    %c0_171 = arith.constant 0 : index
    %329 = vector.load %arg10[%c56_170, %c0_171] : memref<64x128xf32, #tpu.memory_space<vmem>>, vector<8x128xf32>
    tpu.vector_store %arg10[%c56_170, %c0_171], %328 {strides = array<i32>} : memref<64x128xf32, #tpu.memory_space<vmem>>, vector<8x128xf32>,
    %c0_172 = arith.constant 0 : index
    %c0_173 = arith.constant 0 : index
    %330 = vector.load %arg10[%c0_172, %c0_173] : memref<64x128xf32, #tpu.memory_space<vmem>>, vector<64x128xf32>
    %c0_174 = arith.constant 0 : index
    %c0_175 = arith.constant 0 : index
    %331 = vector.load %arg5[%c0_174, %c0_175] : memref<128x2xf32, #tpu.memory_space<vmem>>, vector<128x2xf32>
    %cst_176 = arith.constant dense<0.000000e+00> : vector<64x2xf32>
    %332 = tpu.matmul %330, %331, %cst_176 {dimension_numbers = #tpu.dot_dimension_numbers<[1], [0], [0], [1], [0, 0, 1, 1], [], []>} : vector<64x128xf32>, vector<128x2xf32>, vector<64x2xf32> -> vector<64x2xf32>
    %c0_177 = arith.constant 0 : index
    %c0_178 = arith.constant 0 : index
    %333 = vector.load %arg6[%c0_177, %c0_178] : memref<1x2xf32, #tpu.memory_space<vmem>>, vector<1x2xf32>
    %334 = vector.broadcast %333 : vector<1x2xf32> to vector<64x2xf32>
    %335 = arith.addf %332, %334 : vector<64x2xf32>
    %cst_179 = arith.constant 0.000000e+00 : f32
    %336 = vector.broadcast %cst_179 : f32 to vector<64x2xf32>
    %337 = arith.maximumf %335, %336 : vector<64x2xf32>
    %338 = math.sqrt %337 : vector<64x2xf32>
    %339 = vector.extract_strided_slice %338 {offsets = [0, 0], sizes = [8, 2], strides = [1, 1]} : vector<64x2xf32> to vector<8x2xf32>
    %340 = vector.extract_strided_slice %338 {offsets = [8, 0], sizes = [8, 2], strides = [1, 1]} : vector<64x2xf32> to vector<8x2xf32>
    %341 = arith.addf %339, %340 : vector<8x2xf32>
    %342 = vector.extract_strided_slice %338 {offsets = [16, 0], sizes = [8, 2], strides = [1, 1]} : vector<64x2xf32> to vector<8x2xf32>
    %343 = arith.addf %341, %342 : vector<8x2xf32>
    %344 = vector.extract_strided_slice %338 {offsets = [24, 0], sizes = [8, 2], strides = [1, 1]} : vector<64x2xf32> to vector<8x2xf32>
    %345 = arith.addf %343, %344 : vector<8x2xf32>
    %346 = vector.extract_strided_slice %338 {offsets = [32, 0], sizes = [8, 2], strides = [1, 1]} : vector<64x2xf32> to vector<8x2xf32>
    %347 = arith.addf %345, %346 : vector<8x2xf32>
    %348 = vector.extract_strided_slice %338 {offsets = [40, 0], sizes = [8, 2], strides = [1, 1]} : vector<64x2xf32> to vector<8x2xf32>
    %349 = arith.addf %347, %348 : vector<8x2xf32>
    %350 = vector.extract_strided_slice %338 {offsets = [48, 0], sizes = [8, 2], strides = [1, 1]} : vector<64x2xf32> to vector<8x2xf32>
    %351 = arith.addf %349, %350 : vector<8x2xf32>
    %352 = vector.extract_strided_slice %338 {offsets = [56, 0], sizes = [8, 2], strides = [1, 1]} : vector<64x2xf32> to vector<8x2xf32>
    %353 = arith.addf %351, %352 : vector<8x2xf32>
    %cst_180 = arith.constant 1.250000e-01 : f32
    %354 = vector.broadcast %cst_180 : f32 to vector<8x2xf32>
    %355 = arith.mulf %353, %354 : vector<8x2xf32>
    %cst_181 = arith.constant dense<0xFF800000> : vector<8xf32>
    %356 = vector.multi_reduction <maximumf>, %355, %cst_181 [1] : vector<8x2xf32> to vector<8xf32>
    %cst_182 = arith.constant 0xFF800000 : f32
    %357 = vector.broadcast %cst_182 : f32 to vector<8xf32>
    %358 = arith.maximumf %357, %356 : vector<8xf32>
    %359 = vector.shape_cast %358 : vector<8xf32> to vector<8x1xf32>
    %360 = vector.broadcast %359 : vector<8x1xf32> to vector<8x2xf32>
    %361 = arith.subf %355, %360 : vector<8x2xf32>
    %362 = math.exp %361 : vector<8x2xf32>
    %cst_183 = arith.constant dense<0.000000e+00> : vector<8xf32>
    %363 = vector.multi_reduction <add>, %362, %cst_183 [1] : vector<8x2xf32> to vector<8xf32>
    %364 = vector.shape_cast %363 : vector<8xf32> to vector<8x1xf32>
    %365 = math.log %364 : vector<8x1xf32>
    %366 = vector.broadcast %365 : vector<8x1xf32> to vector<8x2xf32>
    %367 = arith.subf %361, %366 : vector<8x2xf32>
    %c0_184 = arith.constant 0 : index
    %c0_185 = arith.constant 0 : index
    %368 = vector.load %arg7[%c0_184, %c0_185] : memref<8x2xf32, #tpu.memory_space<vmem>>, vector<8x2xf32>
    tpu.vector_store %arg7[%c0_184, %c0_185], %367 {strides = array<i32>} : memref<8x2xf32, #tpu.memory_space<vmem>>, vector<8x2xf32>,
    return
  }
}

</mosaic_0001>

<bundles_post_ra>
// kernel: structured_self_attention_forward.1
= control target key start
LH: loop header
LB: loop body
LE: loop exit
PB: predicated region body
PF: predicated region fallthrough
CT: control target
= control target key end

     0   :  { %12 = vsyncpa [#allocation8], 0  ;;  %s4287_s0 = inlined_call_operand.vmem [shape: s32[16], index: 0, kind: input, shape index: {}]   ;;  %s4288_s1 = inlined_call_operand.vmem [shape: f32[50,128], index: 1, kind: input, shape index: {}]   ;;  %s4289_s2 = inlined_call_operand.hbm [shape: f32[128,512], index: 2, kind: input, shape index: {}]   ;;  %s4290_s3 = inlined_call_operand.hbm [shape: f32[128,512], index: 3, kind: input, shape index: {}]   ;;  %s4291_s4 = inlined_call_operand.vmem [shape: f32[1,512], index: 4, kind: input, shape index: {}]   ;;  %s4292_s5 = inlined_call_operand.vmem [shape: f32[128,2], index: 5, kind: input, shape index: {}]   ;;  %s4293_s6 = inlined_call_operand.vmem [shape: f32[1,2], index: 6, kind: input, shape index: {}]   ;;  %s4294_s7 = inlined_call_operand.vmem [shape: f32[8,2], index: 7, kind: output, shape index: {}]  }
   0x1   :  { %13 = vsyncpa [#allocation7], 0  ;;  %s20_s26 = sshll.u32 %s4287_s0, 4  ;;  %s21_s26 = int_to_ptr.vmem [resolvable:$true] %s20_s26 }
   0x2   :  { %14 = vsyncpa [#allocation11], 0  ;;  %s28_s29 = sshll.u32 %s4289_s2, 4  ;;  %s3071_s30 = smov [#allocation6]   ;;  %s29_s29 = int_to_ptr.hbm [resolvable:$true] %s28_s29 }
   0x3   :  { %23 = dma.vmem_to_smem %s21_s26, 16, %s3071_s30, [#allocation8]  }
   0x4   :  { %s3072_s8 = smov [#allocation9]   ;;  %s3073_s10 = smov 512  }
   0x5   :  { %s30_s9 = sshll.u32 %s3072_s8, 4  ;;  %s3074_s11 = smov 32   ;;  %s31_s9 = int_to_ptr.vmem [resolvable:$true] %s30_s9 }
   0x6   :  { %36 = dma.hbm_to_vmem [thread:$0]  %s29_s29, 8192, %s31_s9, [#allocation7], %s3073_s10, %s3073_s10, %s3074_s11  }
   0x7   :  { %s41_s14 = sshll.u32 %s4290_s3, 4  ;;  %s3075_s0 = smov [#allocation10]   ;;  %s42_s14 = int_to_ptr.hbm [resolvable:$true] %s41_s14 }
   0x8   :  { %s43_s15 = sshll.u32 %s3075_s0, 4  ;;  %s44_s15 = int_to_ptr.vmem [resolvable:$true] %s43_s15 }
   0x9   :  { %49 = dma.hbm_to_vmem [thread:$0]  %s42_s14, 8192, %s44_s15, [#allocation11], %s3073_s10, %s3073_s10, %s3074_s11  }
   0xa   :  { %3033 = dma.done.wait [#allocation8], 16  }
   0xb   :  { %3034 = vsyncadd [#allocation8], 4294967280 }
   0xc   :  { %3035 = dma.done.wait [#allocation7], 8192  }
   0xd   :  { %3036 = vsyncadd [#allocation7], 4294959104 }
   0xe   :  { %3037 = dma.done.wait [#allocation11], 8192  }
   0xf   :  { %3038 = vsyncadd [#allocation11], 4294959104 }
  0x10   :  { %68 = sfence }
  0x11   :  { %s77_s2 = sld [smem:[#allocation6]]  ;;  %v4295_v0 = vmov 0.0  }
  0x12   :  { %69 = vst [vmem:[#allocation2 + $0x2] sm:$0x3f] %v4295_v0 }
  0x13   :  { %70 = vst [vmem:[#allocation2 + $0xa] sm:$0x3f] %v4295_v0 }
  0x14   :  { %71 = vst [vmem:[#allocation2 + $0x12] sm:$0x3f] %v4295_v0 }
  0x15   :  { %72 = vst [vmem:[#allocation2 + $0x1a] sm:$0x3f] %v4295_v0 }
  0x16   :  { %73 = vst [vmem:[#allocation2 + $0x22] sm:$0x3f] %v4295_v0 }
  0x17   :  { %74 = vst [vmem:[#allocation2 + $0x2a] sm:$0x3f] %v4295_v0  ;;  %s78_s17 = scalar_lea.vmem %s4288_s1, %s77_s2 }
  0x18   :  { %75 = vst [vmem:[#allocation2 + $0x32] sm:$0x3f] %v4295_v0  ;;  %v93_v1 = vld [vmem:[%s78_s17] sm:$0x1] }
  0x19   :  { %76 = vst [vmem:[#allocation2 + $0x3a] sm:$0x3f] %v4295_v0 }
  0x1a   :  { %94 = vst [vmem:[#allocation2] sm:$0x1] %v93_v1 }
  0x1b   :  { %112 = vsyncadd [#allocation5], 16  ;;  %s2667_s18 = sld [smem:[#allocation6 + $0x8]] }
  0x21   :  { %s114_s21 = scalar_lea.vmem %s4288_s1, %s2667_s18 }
  0x22   :  { %v131_v2 = vld [vmem:[%s114_s21] sm:$0x1] }
  0x23   :  { %132 = vst [vmem:[#allocation2 + $0x1] sm:$0x1] %v131_v2 }
  0x24   :  { %150 = vsyncadd [#allocation5 + $0x1], 16  ;;  %s2668_s22 = sld [smem:[#allocation6 + $0x1]] }
  0x2a   :  { %s152_s25 = scalar_lea.vmem %s4288_s1, %s2668_s22 }
  0x2b   :  { %v169_v3 = vld [vmem:[%s152_s25] sm:$0x1] }
  0x2c   :  { %170 = vst [vmem:[#allocation2 + $0x8] sm:$0x1] %v169_v3 }
  0x2d   :  { %188 = vsyncadd [#allocation5 + $0x2], 16  ;;  %s2669_s26 = sld [smem:[#allocation6 + $0x9]] }
  0x33   :  { %s190_s29 = scalar_lea.vmem %s4288_s1, %s2669_s26 }
  0x34   :  { %v207_v4 = vld [vmem:[%s190_s29] sm:$0x1] }
  0x35   :  { %208 = vst [vmem:[#allocation2 + $0x9] sm:$0x1] %v207_v4 }
  0x36   :  { %226 = vsyncadd [#allocation5 + $0x3], 16  ;;  %s2670_s30 = sld [smem:[#allocation6 + $0x2]] }
  0x3c   :  { %s228_s10 = scalar_lea.vmem %s4288_s1, %s2670_s30 }
  0x3d   :  { %v245_v5 = vld [vmem:[%s228_s10] sm:$0x1] }
  0x3e   :  { %246 = vst [vmem:[#allocation2 + $0x10] sm:$0x1] %v245_v5 }
  0x3f   :  { %264 = vsyncadd [#allocation5 + $0x4], 16  ;;  %s2671_s11 = sld [smem:[#allocation6 + $0xa]] }
  0x45   :  { %s266_s14 = scalar_lea.vmem %s4288_s1, %s2671_s11 }
  0x46   :  { %v283_v6 = vld [vmem:[%s266_s14] sm:$0x1] }
  0x47   :  { %284 = vst [vmem:[#allocation2 + $0x11] sm:$0x1] %v283_v6 }
  0x48   :  { %302 = vsyncadd [#allocation5 + $0x5], 16  ;;  %s2672_s0 = sld [smem:[#allocation6 + $0x3]] }
  0x4e   :  { %s304_s3 = scalar_lea.vmem %s4288_s1, %s2672_s0 }
  0x4f   :  { %v321_v7 = vld [vmem:[%s304_s3] sm:$0x1] }
  0x50   :  { %322 = vst [vmem:[#allocation2 + $0x18] sm:$0x1] %v321_v7 }
  0x51   :  { %340 = vsyncadd [#allocation5 + $0x6], 16  ;;  %s2673_s16 = sld [smem:[#allocation6 + $0xb]] }
  0x57   :  { %s342_s19 = scalar_lea.vmem %s4288_s1, %s2673_s16 }
  0x58   :  { %v359_v8 = vld [vmem:[%s342_s19] sm:$0x1] }
  0x59   :  { %360 = vst [vmem:[#allocation2 + $0x19] sm:$0x1] %v359_v8 }
  0x5a   :  { %378 = vsyncadd [#allocation5 + $0x7], 16  ;;  %s2674_s20 = sld [smem:[#allocation6 + $0x4]] }
  0x60   :  { %s380_s23 = scalar_lea.vmem %s4288_s1, %s2674_s20 }
  0x61   :  { %v397_v9 = vld [vmem:[%s380_s23] sm:$0x1] }
  0x62   :  { %398 = vst [vmem:[#allocation2 + $0x20] sm:$0x1] %v397_v9 }
  0x63   :  { %416 = vsyncadd [#allocation5 + $0x8], 16  ;;  %s2675_s24 = sld [smem:[#allocation6 + $0xc]] }
  0x69   :  { %s418_s27 = scalar_lea.vmem %s4288_s1, %s2675_s24 }
  0x6a   :  { %v435_v10 = vld [vmem:[%s418_s27] sm:$0x1] }
  0x6b   :  { %436 = vst [vmem:[#allocation2 + $0x21] sm:$0x1] %v435_v10 }
  0x6c   :  { %454 = vsyncadd [#allocation5 + $0x9], 16  ;;  %s2676_s28 = sld [smem:[#allocation6 + $0x5]] }
  0x72   :  { %s456_s8 = scalar_lea.vmem %s4288_s1, %s2676_s28 }
  0x73   :  { %v473_v11 = vld [vmem:[%s456_s8] sm:$0x1] }
  0x74   :  { %474 = vst [vmem:[#allocation2 + $0x28] sm:$0x1] %v473_v11 }
  0x75   :  { %492 = vsyncadd [#allocation5 + $0xa], 16  ;;  %s2677_s9 = sld [smem:[#allocation6 + $0xd]] }
  0x7b   :  { %s494_s12 = scalar_lea.vmem %s4288_s1, %s2677_s9 }
  0x7c   :  { %v511_v12 = vld [vmem:[%s494_s12] sm:$0x1] }
  0x7d   :  { %512 = vst [vmem:[#allocation2 + $0x29] sm:$0x1] %v511_v12 }
  0x7e   :  { %530 = vsyncadd [#allocation5 + $0xb], 16  ;;  %s2678_s13 = sld [smem:[#allocation6 + $0x6]] }
  0x84   :  { %s532_s15 = scalar_lea.vmem %s4288_s1, %s2678_s13 }
  0x85   :  { %v549_v13 = vld [vmem:[%s532_s15] sm:$0x1] }
  0x86   :  { %550 = vst [vmem:[#allocation2 + $0x30] sm:$0x1] %v549_v13 }
  0x87   :  { %568 = vsyncadd [#allocation5 + $0xc], 16  ;;  %s2679_s2 = sld [smem:[#allocation6 + $0xe]] }
  0x8d   :  { %s570_s17 = scalar_lea.vmem %s4288_s1, %s2679_s2 }
  0x8e   :  { %v587_v14 = vld [vmem:[%s570_s17] sm:$0x1] }
  0x8f   :  { %588 = vst [vmem:[#allocation2 + $0x31] sm:$0x1] %v587_v14 }
  0x90   :  { %606 = vsyncadd [#allocation5 + $0xd], 16  ;;  %s2680_s18 = sld [smem:[#allocation6 + $0x7]] }
  0x96   :  { %s608_s21 = scalar_lea.vmem %s4288_s1, %s2680_s18 }
  0x97   :  { %v625_v15 = vld [vmem:[%s608_s21] sm:$0x1] }
  0x98   :  { %626 = vst [vmem:[#allocation2 + $0x38] sm:$0x1] %v625_v15 }
  0x99   :  { %644 = vsyncadd [#allocation5 + $0xe], 16  ;;  %s2681_s22 = sld [smem:[#allocation6 + $0xf]] }
  0x9f   :  { %s646_s25 = scalar_lea.vmem %s4288_s1, %s2681_s22 }
  0xa0   :  { %v663_v16 = vld [vmem:[%s646_s25] sm:$0x1] }
  0xa1   :  { %664 = vst [vmem:[#allocation2 + $0x39] sm:$0x1] %v663_v16 }
  0xa2   :  { %682 = vsyncadd [#allocation5 + $0xf], 16 }
  0xa3   :  { %3039 = dma.done.wait [#allocation5], 16 }
  0xa4   :  { %3040 = vsyncadd [#allocation5], 4294967280 }
  0xa5   :  { %3041 = dma.done.wait [#allocation5 + $0x1], 16 }
  0xa6   :  { %3042 = vsyncadd [#allocation5 + $0x1], 4294967280 }
  0xa7   :  { %3043 = dma.done.wait [#allocation5 + $0x2], 16 }
  0xa8   :  { %3044 = vsyncadd [#allocation5 + $0x2], 4294967280 }
  0xa9   :  { %3045 = dma.done.wait [#allocation5 + $0x3], 16 }
  0xaa   :  { %3046 = vsyncadd [#allocation5 + $0x3], 4294967280 }
  0xab   :  { %3047 = dma.done.wait [#allocation5 + $0x4], 16 }
  0xac   :  { %3048 = vsyncadd [#allocation5 + $0x4], 4294967280 }
  0xad   :  { %3049 = dma.done.wait [#allocation5 + $0x5], 16 }
  0xae   :  { %3050 = vsyncadd [#allocation5 + $0x5], 4294967280 }
  0xaf   :  { %3051 = dma.done.wait [#allocation5 + $0x6], 16 }
  0xb0   :  { %3052 = vsyncadd [#allocation5 + $0x6], 4294967280 }
  0xb1   :  { %3053 = dma.done.wait [#allocation5 + $0x7], 16 }
  0xb2   :  { %3054 = vsyncadd [#allocation5 + $0x7], 4294967280 }
  0xb3   :  { %3055 = dma.done.wait [#allocation5 + $0x8], 16 }
  0xb4   :  { %3056 = vsyncadd [#allocation5 + $0x8], 4294967280 }
  0xb5   :  { %3057 = dma.done.wait [#allocation5 + $0x9], 16 }
  0xb6   :  { %3058 = vsyncadd [#allocation5 + $0x9], 4294967280 }
  0xb7   :  { %3059 = dma.done.wait [#allocation5 + $0xa], 16 }
  0xb8   :  { %3060 = vsyncadd [#allocation5 + $0xa], 4294967280 }
  0xb9   :  { %3061 = dma.done.wait [#allocation5 + $0xb], 16 }
  0xba   :  { %3062 = vsyncadd [#allocation5 + $0xb], 4294967280 }
  0xbb   :  { %3063 = dma.done.wait [#allocation5 + $0xc], 16 }
  0xbc   :  { %3064 = vsyncadd [#allocation5 + $0xc], 4294967280 }
  0xbd   :  { %3065 = dma.done.wait [#allocation5 + $0xd], 16 }
  0xbe   :  { %3066 = vsyncadd [#allocation5 + $0xd], 4294967280 }
  0xbf   :  { %3067 = dma.done.wait [#allocation5 + $0xe], 16 }
  0xc0   :  { %3068 = vsyncadd [#allocation5 + $0xe], 4294967280 }
  0xc1   :  { %3069 = dma.done.wait [#allocation5 + $0xf], 16 }
  0xc2   :  { %3070 = vsyncadd [#allocation5 + $0xf], 4294967280  ;;  %v784_v17 = vld [vmem:[#allocation9 + $0x1e0] sm:$0xff]  ;;  %v787_v18 = vld [vmem:[#allocation9 + $0x1f8] sm:$0xff] }
  0xc3   :  { %v780_v19 = vld [vmem:[#allocation9 + $0x1c0] sm:$0xff]  ;;  %798 = vmatpush.msra.mxu1 %v784_v17  ;;  %2722 = vmatpush.msra.mxu2 %v784_v17  ;;  %v783_v20 = vld [vmem:[#allocation9 + $0x1d8] sm:$0xff]  ;;  %v785_v3 = vld [vmem:[#allocation9 + $0x1e8] sm:$0xff] }
  0xc4   :  { %v3182_v21 = vld [vmem:[#allocation10 + $0x1e0] sm:$0xff]  ;;  %921 = vmatpush.msra.mxu3 %v787_v18  ;;  %v779_v24 = vld [vmem:[#allocation9 + $0x1b8] sm:$0xff]  ;;  %v786_v4 = vld [vmem:[#allocation9 + $0x1f0] sm:$0xff] }
  0xc5   :  { %1062 = vmatpush.msra.mxu0 %v3182_v21  ;;  %v776_v22 = vld [vmem:[#allocation9 + $0x1a0] sm:$0xff]  ;;  %799 = vmatpush.msra.mxu1 %v780_v19  ;;  %v775_v27 = vld [vmem:[#allocation9 + $0x198] sm:$0xff]  ;;  %v781_v6 = vld [vmem:[#allocation9 + $0x1c8] sm:$0xff] }
  0xc6   :  { %v3185_v23 = vld [vmem:[#allocation10 + $0x1c0] sm:$0xff]  ;;  %2723 = vmatpush.msra.mxu2 %v780_v19  ;;  %922 = vmatpush.msra.mxu3 %v783_v20  ;;  %v771_v30 = vld [vmem:[#allocation9 + $0x178] sm:$0xff]  ;;  %v782_v7 = vld [vmem:[#allocation9 + $0x1d0] sm:$0xff] }
  0xc7   :  { %v3187_v25 = vld [vmem:[#allocation10 + $0x1a0] sm:$0xff]  ;;  %1063 = vmatpush.msra.mxu0 %v3185_v23  ;;  %800 = vmatpush.msra.mxu1 %v776_v22  ;;  %v767_v33 = vld [vmem:[#allocation9 + $0x158] sm:$0xff]  ;;  %v777_v8 = vld [vmem:[#allocation9 + $0x1a8] sm:$0xff] }
  0xc8   :  { %v772_v26 = vld [vmem:[#allocation9 + $0x180] sm:$0xff]  ;;  %2724 = vmatpush.msra.mxu2 %v776_v22  ;;  %923 = vmatpush.msra.mxu3 %v779_v24  ;;  %v763_v36 = vld [vmem:[#allocation9 + $0x138] sm:$0xff]  ;;  %v778_v10 = vld [vmem:[#allocation9 + $0x1b0] sm:$0xff] }
  0xc9   :  { %v3190_v28 = vld [vmem:[#allocation10 + $0x180] sm:$0xff]  ;;  %1064 = vmatpush.msra.mxu0 %v3187_v25  ;;  %801 = vmatpush.msra.mxu1 %v772_v26  ;;  %v759_v39 = vld [vmem:[#allocation9 + $0x118] sm:$0xff]  ;;  %v773_v11 = vld [vmem:[#allocation9 + $0x188] sm:$0xff] }
  0xca   :  { %v768_v29 = vld [vmem:[#allocation9 + $0x160] sm:$0xff]  ;;  %2725 = vmatpush.msra.mxu2 %v772_v26  ;;  %924 = vmatpush.msra.mxu3 %v775_v27  ;;  %v755_v42 = vld [vmem:[#allocation9 + $0xf8] sm:$0xff]  ;;  %v774_v13 = vld [vmem:[#allocation9 + $0x190] sm:$0xff] }
  0xcb   :  { %v3193_v31 = vld [vmem:[#allocation10 + $0x160] sm:$0xff]  ;;  %1065 = vmatpush.msra.mxu0 %v3190_v28  ;;  %802 = vmatpush.msra.mxu1 %v768_v29  ;;  %v751_v45 = vld [vmem:[#allocation9 + $0xd8] sm:$0xff]  ;;  %v3242_v14 = vld [vmem:[#allocation2 + $0x8] sm:$0xff] }
  0xcc   :  { %v764_v32 = vld [vmem:[#allocation9 + $0x140] sm:$0xff]  ;;  %2726 = vmatpush.msra.mxu2 %v768_v29  ;;  %925 = vmatpush.msra.mxu3 %v771_v30  ;;  %v747_v48 = vld [vmem:[#allocation9 + $0xb8] sm:$0xff]  ;;  %v3245_v15 = vld [vmem:[#allocation2 + $0x28] sm:$0xff] }
  0xcd   :  { %v3196_v34 = vld [vmem:[#allocation10 + $0x140] sm:$0xff]  ;;  %1066 = vmatpush.msra.mxu0 %v3193_v31  ;;  %803 = vmatpush.msra.mxu1 %v764_v32  ;;  %v743_v51 = vld [vmem:[#allocation9 + $0x98] sm:$0xff]  ;;  %v769_v16 = vld [vmem:[#allocation9 + $0x168] sm:$0xff] }
  0xce   :  { %v760_v35 = vld [vmem:[#allocation9 + $0x120] sm:$0xff]  ;;  %2727 = vmatpush.msra.mxu2 %v764_v32  ;;  %926 = vmatpush.msra.mxu3 %v767_v33  ;;  %v739_v54 = vld [vmem:[#allocation9 + $0x78] sm:$0xff]  ;;  %v770_v17 = vld [vmem:[#allocation9 + $0x170] sm:$0xff] }
  0xcf   :  { %v3199_v37 = vld [vmem:[#allocation10 + $0x120] sm:$0xff]  ;;  %1067 = vmatpush.msra.mxu0 %v3196_v34  ;;  %804 = vmatpush.msra.mxu1 %v760_v35  ;;  %v735_v57 = vld [vmem:[#allocation9 + $0x58] sm:$0xff]  ;;  %v765_v18 = vld [vmem:[#allocation9 + $0x148] sm:$0xff] }
  0xd0   :  { %v756_v38 = vld [vmem:[#allocation9 + $0x100] sm:$0xff]  ;;  %2728 = vmatpush.msra.mxu2 %v760_v35  ;;  %927 = vmatpush.msra.mxu3 %v763_v36  ;;  %v731_v60 = vld [vmem:[#allocation9 + $0x38] sm:$0xff]  ;;  %v766_v20 = vld [vmem:[#allocation9 + $0x150] sm:$0xff] }
  0xd1   :  { %v3202_v40 = vld [vmem:[#allocation10 + $0x100] sm:$0xff]  ;;  %1068 = vmatpush.msra.mxu0 %v3199_v37  ;;  %805 = vmatpush.msra.mxu1 %v756_v38  ;;  %v727_v63 = vld [vmem:[#allocation9 + $0x18] sm:$0xff]  ;;  %v761_v22 = vld [vmem:[#allocation9 + $0x128] sm:$0xff] }
  0xd2   :  { %v752_v41 = vld [vmem:[#allocation9 + $0xe0] sm:$0xff]  ;;  %2729 = vmatpush.msra.mxu2 %v756_v38  ;;  %928 = vmatpush.msra.mxu3 %v759_v39  ;;  %v3236_v9 = vld [vmem:[#allocation10 + $0x1f8] sm:$0xff]  ;;  %v762_v26 = vld [vmem:[#allocation9 + $0x130] sm:$0xff] }
  0xd3   :  { %v3205_v43 = vld [vmem:[#allocation10 + $0xe0] sm:$0xff]  ;;  %1069 = vmatpush.msra.mxu0 %v3202_v40  ;;  %806 = vmatpush.msra.mxu1 %v752_v41  ;;  %v3240_v12 = vld [vmem:[#allocation10 + $0x1d8] sm:$0xff]  ;;  %v757_v27 = vld [vmem:[#allocation9 + $0x108] sm:$0xff] }
  0xd4   :  { %v748_v44 = vld [vmem:[#allocation9 + $0xc0] sm:$0xff]  ;;  %2730 = vmatpush.msra.mxu2 %v752_v41  ;;  %929 = vmatpush.msra.mxu3 %v755_v42  ;;  %v3250_v19 = vld [vmem:[#allocation10 + $0x1b8] sm:$0xff]  ;;  %v758_v30 = vld [vmem:[#allocation9 + $0x110] sm:$0xff] }
  0xd5   :  { %v3208_v46 = vld [vmem:[#allocation10 + $0xc0] sm:$0xff]  ;;  %1070 = vmatpush.msra.mxu0 %v3205_v43  ;;  %807 = vmatpush.msra.mxu1 %v748_v44  ;;  %v3254_v24 = vld [vmem:[#allocation10 + $0x198] sm:$0xff]  ;;  %v3260_v32 = vld [vmem:[#allocation2 + $0x10] sm:$0xff] }
  0xd6   :  { %4374 = vst [vmem:[#allocation47_spill] sm:$0xff] %v3208_v46  ;;  %v744_v47 = vld [vmem:[#allocation9 + $0xa0] sm:$0xff]  ;;  %2731 = vmatpush.msra.mxu2 %v748_v44  ;;  %930 = vmatpush.msra.mxu3 %v751_v45  ;;  %v3257_v29 = vld [vmem:[#allocation10 + $0x178] sm:$0xff]  ;;  %v3263_v33 = vld [vmem:[#allocation2 + $0x30] sm:$0xff] }
  0xd7   :  { %v3211_v49 = vld [vmem:[#allocation10 + $0xa0] sm:$0xff]  ;;  %1071 = vmatpush.msra.mxu0 %v3208_v46  ;;  %808 = vmatpush.msra.mxu1 %v744_v47  ;;  %v753_v35 = vld [vmem:[#allocation9 + $0xe8] sm:$0xff]  ;;  %v754_v36 = vld [vmem:[#allocation9 + $0xf0] sm:$0xff] }
  0xd8   :  { %4375 = vst [vmem:[#allocation48_spill] sm:$0xff] %v3211_v49  ;;  %v740_v50 = vld [vmem:[#allocation9 + $0x80] sm:$0xff]  ;;  %2732 = vmatpush.msra.mxu2 %v744_v47  ;;  %931 = vmatpush.msra.mxu3 %v747_v48  ;;  %v749_v38 = vld [vmem:[#allocation9 + $0xc8] sm:$0xff]  ;;  %v3268_v39 = vld [vmem:[#allocation10 + $0x158] sm:$0xff] }
  0xd9   :  { %v3214_v52 = vld [vmem:[#allocation10 + $0x80] sm:$0xff]  ;;  %1072 = vmatpush.msra.mxu0 %v3211_v49  ;;  %809 = vmatpush.msra.mxu1 %v740_v50  ;;  %v750_v41 = vld [vmem:[#allocation9 + $0xd0] sm:$0xff]  ;;  %v745_v42 = vld [vmem:[#allocation9 + $0xa8] sm:$0xff] }
  0xda   :  { %4376 = vst [vmem:[#allocation49_spill] sm:$0xff] %v3214_v52  ;;  %v736_v53 = vld [vmem:[#allocation9 + $0x60] sm:$0xff]  ;;  %2733 = vmatpush.msra.mxu2 %v740_v50  ;;  %932 = vmatpush.msra.mxu3 %v743_v51  ;;  %v3272_v44 = vld [vmem:[#allocation10 + $0x138] sm:$0xff]  ;;  %v746_v45 = vld [vmem:[#allocation9 + $0xb0] sm:$0xff] }
  0xdb   :  { %v3217_v55 = vld [vmem:[#allocation10 + $0x60] sm:$0xff]  ;;  %1073 = vmatpush.msra.mxu0 %v3214_v52  ;;  %810 = vmatpush.msra.mxu1 %v736_v53  ;;  %v741_v47 = vld [vmem:[#allocation9 + $0x88] sm:$0xff]  ;;  %v3275_v48 = vld [vmem:[#allocation10 + $0x118] sm:$0xff] }
  0xdc   :  { %4377 = vst [vmem:[#allocation50_spill] sm:$0xff] %v3217_v55  ;;  %v732_v56 = vld [vmem:[#allocation9 + $0x40] sm:$0xff]  ;;  %2734 = vmatpush.msra.mxu2 %v736_v53  ;;  %933 = vmatpush.msra.mxu3 %v739_v54  ;;  %v742_v50 = vld [vmem:[#allocation9 + $0x90] sm:$0xff]  ;;  %v3278_v51 = vld [vmem:[#allocation2 + $0x18] sm:$0xff] }
  0xdd   :  { %v3220_v58 = vld [vmem:[#allocation10 + $0x40] sm:$0xff]  ;;  %1074 = vmatpush.msra.mxu0 %v3217_v55  ;;  %811 = vmatpush.msra.mxu1 %v732_v56  ;;  %v3281_v53 = vld [vmem:[#allocation2 + $0x38] sm:$0xff]  ;;  %v737_v54 = vld [vmem:[#allocation9 + $0x68] sm:$0xff] }
  0xde   :  { %4378 = vst [vmem:[#allocation51_spill] sm:$0xff] %v3220_v58  ;;  %v728_v59 = vld [vmem:[#allocation9 + $0x20] sm:$0xff]  ;;  %2735 = vmatpush.msra.mxu2 %v732_v56  ;;  %934 = vmatpush.msra.mxu3 %v735_v57  ;;  %v738_v56 = vld [vmem:[#allocation9 + $0x70] sm:$0xff]  ;;  %v733_v57 = vld [vmem:[#allocation9 + $0x48] sm:$0xff] }
  0xdf   :  { %v3223_v61 = vld [vmem:[#allocation10 + $0x20] sm:$0xff]  ;;  %1075 = vmatpush.msra.mxu0 %v3220_v58  ;;  %812 = vmatpush.msra.mxu1 %v728_v59 }
  0xe0   :  { %v724_v62 = vld [vmem:[#allocation9] sm:$0xff]  ;;  %2736 = vmatpush.msra.mxu2 %v728_v59  ;;  %935 = vmatpush.msra.mxu3 %v731_v60  ;;  %v3286_v59 = vld [vmem:[#allocation10 + $0xf8] sm:$0xff]  ;;  %v734_v60 = vld [vmem:[#allocation9 + $0x50] sm:$0xff] }
  0xe1   :  { %v3226_v1 = vld [vmem:[#allocation2] sm:$0xff]  ;;  %1076 = vmatpush.msra.mxu0 %v3223_v61  ;;  %813 = vmatpush.msra.mxu1 %v724_v62 }
  0xe2   :  { %v3229_v2 = vld [vmem:[#allocation2 + $0x20] sm:$0xff]  ;;  %2737 = vmatpush.msra.mxu2 %v724_v62  ;;  %936 = vmatpush.msra.mxu3 %v727_v63  ;;  %v729_v62 = vld [vmem:[#allocation9 + $0x28] sm:$0xff]  ;;  %v3290_v63 = vld [vmem:[#allocation10 + $0xd8] sm:$0xff] }
  0xe3   :  { %814 = vmatmul.f32.vlgmr.msra.gmra.mxu1 %v3226_v1  ;;  %v3232_v5 = vld [vmem:[#allocation10] sm:$0xff]  ;;  %826 = vmatmul.f32.vlgmr.msra.gmra.mxu2 %v3229_v2 }
  0xe4   :  { %839 = vmatpush.msrb.mxu1 %v785_v3  ;;  %937 = vmatmul.f32.vlgmr.msra.gmra.mxu3 %v3226_v1  ;;  %v730_v3 = vld [vmem:[#allocation9 + $0x30] sm:$0xff] }
  0xe5   :  { %880 = vmatpush.msrb.mxu2 %v786_v4  ;;  %1077 = vmatpush.msra.mxu0 %v3232_v5  ;;  %v725_v4 = vld [vmem:[#allocation9 + $0x8] sm:$0xff] }
  0xe6   :  { %840 = vmatpush.msrb.mxu1 %v781_v6  ;;  %1078 = vmatmul.f32.vlgmr.msra.gmra.mxu0 %v4295_v0  ;;  %v3293_v6 = vld [vmem:[#allocation10 + $0xb8] sm:$0xff]  ;;  %v3410_v0 = vld [vmem:[#allocation10 + $0x48] sm:$0xff] }
  0xe7   :  { %881 = vmatpush.msrb.mxu2 %v782_v7  ;;  %1122 = vmatpush.msrb.mxu3 %v3236_v9  ;;  %v726_v7 = vld [vmem:[#allocation9 + $0x10] sm:$0xff]  ;;  %4383 = vst [vmem:[#allocation56_spill] sm:$0xff] %v3410_v0 }
  0xe8   :  { %841 = vmatpush.msrb.mxu1 %v777_v8  ;;  %1214 = vmatpush.msrb.mxu0 %v3182_v21  ;;  %v3297_v8 = vld [vmem:[#allocation10 + $0x1e8] sm:$0xff] }
  0xe9   :  { %882 = vmatpush.msrb.mxu2 %v778_v10  ;;  %1123 = vmatpush.msrb.mxu3 %v3240_v12  ;;  %v3300_v10 = vld [vmem:[#allocation10 + $0x1f0] sm:$0xff] }
  0xea   :  { %842 = vmatpush.msrb.mxu1 %v773_v11  ;;  %1215 = vmatpush.msrb.mxu0 %v3185_v23  ;;  %v3304_v11 = vld [vmem:[#allocation10 + $0x1c8] sm:$0xff] }
  0xeb   :  { %883 = vmatpush.msrb.mxu2 %v774_v13  ;;  %817 = vmatmul.f32.gmra.mxu1 %v3242_v14  ;;  %v3306_v13 = vld [vmem:[#allocation10 + $0x98] sm:$0xff] }
  0xec   :  { %829 = vmatmul.f32.gmra.mxu2 %v3245_v15  ;;  %843 = vmatpush.msrb.mxu1 %v769_v16  ;;  %v3310_v16 = vld [vmem:[#allocation10 + $0x1d0] sm:$0xff] }
  0xed   :  { %940 = vmatmul.f32.gmra.mxu3 %v3242_v14  ;;  %884 = vmatpush.msrb.mxu2 %v770_v17  ;;  %v3314_v17 = vld [vmem:[#allocation10 + $0x1a8] sm:$0xff] }
  0xee   :  { %844 = vmatpush.msrb.mxu1 %v765_v18  ;;  %1124 = vmatpush.msrb.mxu3 %v3250_v19  ;;  %v3316_v18 = vld [vmem:[#allocation10 + $0x78] sm:$0xff] }
  0xef   :  { %885 = vmatpush.msrb.mxu2 %v766_v20  ;;  %1216 = vmatpush.msrb.mxu0 %v3187_v25  ;;  %v3319_v20 = vld [vmem:[#allocation10 + $0x1b0] sm:$0xff] }
  0xf0   :  { %845 = vmatpush.msrb.mxu1 %v761_v22  ;;  %1125 = vmatpush.msrb.mxu3 %v3254_v24  ;;  %v3325_v22 = vld [vmem:[#allocation10 + $0x58] sm:$0xff] }
  0xf1   :  { %886 = vmatpush.msrb.mxu2 %v762_v26  ;;  %1217 = vmatpush.msrb.mxu0 %v3190_v28  ;;  %4379 = vst [vmem:[#allocation52_spill] sm:$0xff] %v3325_v22  ;;  %v3329_v26 = vld [vmem:[#allocation10 + $0x190] sm:$0xff] }
  0xf2   :  { %846 = vmatpush.msrb.mxu1 %v757_v27  ;;  %1126 = vmatpush.msrb.mxu3 %v3257_v29  ;;  %v3333_v27 = vld [vmem:[#allocation10 + $0x168] sm:$0xff] }
  0xf3   :  { %887 = vmatpush.msrb.mxu2 %v758_v30  ;;  %820 = vmatmul.f32.gmra.mxu1 %v3260_v32  ;;  %v3337_v30 = vld [vmem:[#allocation10 + $0x170] sm:$0xff] }
  0xf4   :  { %832 = vmatmul.f32.gmra.mxu2 %v3263_v33  ;;  %847 = vmatpush.msrb.mxu1 %v753_v35  ;;  %v3342_v35 = vld [vmem:[#allocation10 + $0x148] sm:$0xff] }
  0xf5   :  { %943 = vmatmul.f32.gmra.mxu3 %v3260_v32  ;;  %888 = vmatpush.msrb.mxu2 %v754_v36  ;;  %v3344_v36 = vld [vmem:[#allocation10 + $0x38] sm:$0xff] }
  0xf6   :  { %848 = vmatpush.msrb.mxu1 %v749_v38  ;;  %1127 = vmatpush.msrb.mxu3 %v3268_v39  ;;  %4380 = vst [vmem:[#allocation53_spill] sm:$0xff] %v3344_v36  ;;  %v3348_v38 = vld [vmem:[#allocation10 + $0x150] sm:$0xff] }
  0xf7   :  { %889 = vmatpush.msrb.mxu2 %v750_v41  ;;  %1218 = vmatpush.msrb.mxu0 %v3193_v31  ;;  %v3352_v41 = vld [vmem:[#allocation10 + $0x128] sm:$0xff] }
  0xf8   :  { %849 = vmatpush.msrb.mxu1 %v745_v42  ;;  %1128 = vmatpush.msrb.mxu3 %v3272_v44  ;;  %v3354_v42 = vld [vmem:[#allocation10 + $0x18] sm:$0xff] }
  0xf9   :  { %890 = vmatpush.msrb.mxu2 %v746_v45  ;;  %1219 = vmatpush.msrb.mxu0 %v3196_v34  ;;  %4381 = vst [vmem:[#allocation54_spill] sm:$0xff] %v3354_v42  ;;  %v3357_v45 = vld [vmem:[#allocation10 + $0x130] sm:$0xff] }
  0xfa   :  { %850 = vmatpush.msrb.mxu1 %v741_v47  ;;  %1129 = vmatpush.msrb.mxu3 %v3275_v48  ;;  %v3366_v47 = vld [vmem:[#allocation10 + $0x110] sm:$0xff] }
  0xfb   :  { %891 = vmatpush.msrb.mxu2 %v742_v50  ;;  %823 = vmatmul.f32.gmra.mxu1 %v3278_v51  ;;  %v3369_v50 = vld [vmem:[#allocation10 + $0xe8] sm:$0xff] }
  0xfc   :  { %835 = vmatmul.f32.gmra.mxu2 %v3281_v53  ;;  %851 = vmatpush.msrb.mxu1 %v737_v54  ;;  %v3373_v54 = vld [vmem:[#allocation10 + $0xf0] sm:$0xff] }
  0xfd   :  { %946 = vmatmul.f32.gmra.mxu3 %v3278_v51  ;;  %892 = vmatpush.msrb.mxu2 %v738_v56  ;;  %v3378_v56 = vld [vmem:[#allocation10 + $0xc8] sm:$0xff] }
  0xfe   :  { %852 = vmatpush.msrb.mxu1 %v733_v57  ;;  %1130 = vmatpush.msrb.mxu3 %v3286_v59  ;;  %v3382_v57 = vld [vmem:[#allocation10 + $0xd0] sm:$0xff] }
  0xff   :  { %893 = vmatpush.msrb.mxu2 %v734_v60  ;;  %1220 = vmatpush.msrb.mxu0 %v3199_v37  ;;  %v3386_v60 = vld [vmem:[#allocation10 + $0xa8] sm:$0xff] }
 0x100   :  { %853 = vmatpush.msrb.mxu1 %v729_v62  ;;  %1131 = vmatpush.msrb.mxu3 %v3290_v63  ;;  %v3389_v62 = vld [vmem:[#allocation10 + $0xb0] sm:$0xff] }
 0x101   :  { %894 = vmatpush.msrb.mxu2 %v730_v3  ;;  %1221 = vmatpush.msrb.mxu0 %v3202_v40  ;;  %v3393_v3 = vld [vmem:[#allocation10 + $0x88] sm:$0xff] }
 0x102   :  { %854 = vmatpush.msrb.mxu1 %v725_v4  ;;  %1132 = vmatpush.msrb.mxu3 %v3293_v6  ;;  %v3401_v4 = vld [vmem:[#allocation10 + $0x68] sm:$0xff] }
 0x103   :  { %895 = vmatpush.msrb.mxu2 %v726_v7  ;;  %855 = vmatmul.f32.vlgmr.msrb.gmra.mxu1 %v3226_v1  ;;  %v3405_v7 = vld [vmem:[#allocation10 + $0x70] sm:$0xff] }
 0x104   :  { %896 = vmatmul.f32.vlgmr.msrb.gmra.mxu2 %v3226_v1  ;;  %1082 = vmatpush.msra.mxu1 %v3297_v8  ;;  %v3323_v1 = vld [vmem:[#allocation10 + $0x188] sm:$0xff]  ;;  %4382 = vst [vmem:[#allocation55_spill] sm:$0xff] %v3405_v7 }
 0x105   :  { %949 = vmatmul.f32.gmra.mxu3 %v3229_v2  ;;  %1102 = vmatpush.msra.mxu2 %v3300_v10 }
 0x106   :  { %1083 = vmatpush.msra.mxu1 %v3304_v11  ;;  %1133 = vmatpush.msrb.mxu3 %v3306_v13 }
 0x107   :  { %1103 = vmatpush.msra.mxu2 %v3310_v16  ;;  %1222 = vmatpush.msrb.mxu0 %v3205_v43 }
 0x108   :  { %1084 = vmatpush.msra.mxu1 %v3314_v17  ;;  %1134 = vmatpush.msrb.mxu3 %v3316_v18 }
 0x109   :  { %1104 = vmatpush.msra.mxu2 %v3319_v20  ;;  %1223 = vmatpush.msrb.mxu0 %v3208_v46  ;;  %v3425_v46 = vld [vmem:[#allocation10 + $0x8] sm:$0xff] }
 0x10a   :  { %1085 = vmatpush.msra.mxu1 %v3323_v1  ;;  %1135 = vmatpush.msrb.mxu3 %v3325_v22  ;;  %4387 = vst [vmem:[#allocation60_spill] sm:$0xff] %v3425_v46 }
 0x10b   :  { %858 = vmatmul.f32.gmra.mxu1 %v3242_v14  ;;  %1105 = vmatpush.msra.mxu2 %v3329_v26 }
 0x10c   :  { %899 = vmatmul.f32.gmra.mxu2 %v3242_v14  ;;  %1086 = vmatpush.msra.mxu1 %v3333_v27  ;;  %v3361_v14 = vld [vmem:[#allocation10 + $0x108] sm:$0xff] }
 0x10d   :  { %952 = vmatmul.f32.gmra.mxu3 %v3245_v15  ;;  %1106 = vmatpush.msra.mxu2 %v3337_v30 }
 0x10e   :  { %1087 = vmatpush.msra.mxu1 %v3342_v35  ;;  %1136 = vmatpush.msrb.mxu3 %v3344_v36 }
 0x10f   :  { %1107 = vmatpush.msra.mxu2 %v3348_v38  ;;  %1224 = vmatpush.msrb.mxu0 %v3211_v49  ;;  %v3421_v49 = vld [vmem:[#allocation10 + $0x30] sm:$0xff] }
 0x110   :  { %1088 = vmatpush.msra.mxu1 %v3352_v41  ;;  %1137 = vmatpush.msrb.mxu3 %v3354_v42  ;;  %4386 = vst [vmem:[#allocation59_spill] sm:$0xff] %v3421_v49 }
 0x111   :  { %1108 = vmatpush.msra.mxu2 %v3357_v45  ;;  %1225 = vmatpush.msrb.mxu0 %v3214_v52  ;;  %v3414_v52 = vld [vmem:[#allocation10 + $0x50] sm:$0xff] }
 0x112   :  { %1274 = vmatpush.msra.mxu3 %v3236_v9  ;;  %1089 = vmatpush.msra.mxu1 %v3361_v14  ;;  %4384 = vst [vmem:[#allocation57_spill] sm:$0xff] %v3414_v52 }
 0x113   :  { %861 = vmatmul.f32.gmra.mxu1 %v3260_v32  ;;  %1109 = vmatpush.msra.mxu2 %v3366_v47 }
 0x114   :  { %902 = vmatmul.f32.gmra.mxu2 %v3260_v32  ;;  %1090 = vmatpush.msra.mxu1 %v3369_v50  ;;  %v3397_v32 = vld [vmem:[#allocation10 + $0x90] sm:$0xff] }
 0x115   :  { %955 = vmatmul.f32.gmra.mxu3 %v3263_v33  ;;  %1110 = vmatpush.msra.mxu2 %v3373_v54 }
 0x116   :  { %1091 = vmatpush.msra.mxu1 %v3378_v56  ;;  %1275 = vmatpush.msra.mxu3 %v3240_v12 }
 0x117   :  { %1111 = vmatpush.msra.mxu2 %v3382_v57  ;;  %1226 = vmatpush.msrb.mxu0 %v3217_v55  ;;  %v3418_v55 = vld [vmem:[#allocation10 + $0x28] sm:$0xff] }
 0x118   :  { %1092 = vmatpush.msra.mxu1 %v3386_v60  ;;  %1276 = vmatpush.msra.mxu3 %v3250_v19  ;;  %4385 = vst [vmem:[#allocation58_spill] sm:$0xff] %v3418_v55 }
 0x119   :  { %1112 = vmatpush.msra.mxu2 %v3389_v62  ;;  %1227 = vmatpush.msrb.mxu0 %v3220_v58  ;;  %v4389_v58 = vmov 0.0  }
 0x11a   :  { %1093 = vmatpush.msra.mxu1 %v3393_v3  ;;  %1277 = vmatpush.msra.mxu3 %v3254_v24 }
 0x11b   :  { %864 = vmatmul.f32.gmra.mxu1 %v3278_v51  ;;  %1113 = vmatpush.msra.mxu2 %v3397_v32 }
 0x11c   :  { %905 = vmatmul.f32.gmra.mxu2 %v3278_v51  ;;  %1094 = vmatpush.msra.mxu1 %v3401_v4  ;;  %v3429_v51 = vld [vmem:[#allocation10 + $0x10] sm:$0xff] }
 0x11d   :  { %958 = vmatmul.f32.gmra.mxu3 %v3281_v53  ;;  %1114 = vmatpush.msra.mxu2 %v3405_v7  ;;  %4388 = vst [vmem:[#allocation61_spill] sm:$0xff] %v3429_v51 }
 0x11e   :  { %1095 = vmatpush.msra.mxu1 %v3410_v0  ;;  %1278 = vmatpush.msra.mxu3 %v3257_v29 }
 0x11f   :  { %1115 = vmatpush.msra.mxu2 %v3414_v52  ;;  %1228 = vmatpush.msrb.mxu0 %v3223_v61 }
 0x120   :  { %1096 = vmatpush.msra.mxu1 %v3418_v55  ;;  %1279 = vmatpush.msra.mxu3 %v3268_v39 }
 0x121   :  { %1116 = vmatpush.msra.mxu2 %v3421_v49  ;;  %1229 = vmatpush.msrb.mxu0 %v3232_v5 }
 0x122   :  { %1097 = vmatpush.msra.mxu1 %v3425_v46  ;;  %1280 = vmatpush.msra.mxu3 %v3272_v44 }
 0x123   :  { %867 = vmatmul.f32.gmra.mxu1 %v3229_v2  ;;  %1117 = vmatpush.msra.mxu2 %v3429_v51 }
 0x124   :  { %908 = vmatmul.f32.gmra.mxu2 %v3229_v2  ;;  %1234 = vmatpush.msrb.mxu1 %v3297_v8 }
 0x125   :  { %1138 = vmatmul.f32.vlgmr.msrb.gmra.mxu3 %v4389_v58  ;;  %1254 = vmatpush.msrb.mxu2 %v3300_v10 }
 0x126   :  { %1235 = vmatpush.msrb.mxu1 %v3304_v11  ;;  %1281 = vmatpush.msra.mxu3 %v3275_v48 }
 0x127   :  { %1255 = vmatpush.msrb.mxu2 %v3310_v16  ;;  %1366 = vmatpush.msra.mxu0 %v3182_v21  ;;  %v4390_v21 = vld [vmem:[#allocation47_spill] sm:$0xff] }
 0x128   :  { %1236 = vmatpush.msrb.mxu1 %v3314_v17  ;;  %1282 = vmatpush.msra.mxu3 %v3286_v59 }
 0x129   :  { %1256 = vmatpush.msrb.mxu2 %v3319_v20  ;;  %1367 = vmatpush.msra.mxu0 %v3185_v23  ;;  %v4391_v23 = vld [vmem:[#allocation48_spill] sm:$0xff] }
 0x12a   :  { %1237 = vmatpush.msrb.mxu1 %v3323_v1  ;;  %1283 = vmatpush.msra.mxu3 %v3290_v63 }
 0x12b   :  { %870 = vmatmul.f32.gmra.mxu1 %v3245_v15  ;;  %1257 = vmatpush.msrb.mxu2 %v3329_v26 }
 0x12c   :  { %911 = vmatmul.f32.gmra.mxu2 %v3245_v15  ;;  %1238 = vmatpush.msrb.mxu1 %v3333_v27 }
 0x12d   :  { %1258 = vmatpush.msrb.mxu2 %v3337_v30  ;;  %1284 = vmatpush.msra.mxu3 %v3293_v6 }
 0x12e   :  { %1239 = vmatpush.msrb.mxu1 %v3342_v35  ;;  %1368 = vmatpush.msra.mxu0 %v3187_v25  ;;  %v4392_v25 = vld [vmem:[#allocation49_spill] sm:$0xff] }
 0x12f   :  { %1259 = vmatpush.msrb.mxu2 %v3348_v38  ;;  %1285 = vmatpush.msra.mxu3 %v3306_v13 }
 0x130   :  { %1240 = vmatpush.msrb.mxu1 %v3352_v41  ;;  %1369 = vmatpush.msra.mxu0 %v3190_v28  ;;  %v4393_v28 = vld [vmem:[#allocation50_spill] sm:$0xff] }
 0x131   :  { %1260 = vmatpush.msrb.mxu2 %v3357_v45  ;;  %1286 = vmatpush.msra.mxu3 %v3316_v18 }
 0x132   :  { %1241 = vmatpush.msrb.mxu1 %v3361_v14  ;;  %1370 = vmatpush.msra.mxu0 %v3193_v31  ;;  %v4394_v31 = vld [vmem:[#allocation51_spill] sm:$0xff] }
 0x133   :  { %873 = vmatmul.f32.gmra.mxu1 %v3263_v33  ;;  %1261 = vmatpush.msrb.mxu2 %v3366_v47 }
 0x134   :  { %914 = vmatmul.f32.gmra.mxu2 %v3263_v33  ;;  %1242 = vmatpush.msrb.mxu1 %v3369_v50 }
 0x135   :  { %1262 = vmatpush.msrb.mxu2 %v3373_v54  ;;  %1287 = vmatpush.msra.mxu3 %v3325_v22 }
 0x136   :  { %1243 = vmatpush.msrb.mxu1 %v3378_v56  ;;  %1371 = vmatpush.msra.mxu0 %v3196_v34 }
 0x137   :  { %1263 = vmatpush.msrb.mxu2 %v3382_v57  ;;  %1288 = vmatpush.msra.mxu3 %v3344_v36 }
 0x138   :  { %1244 = vmatpush.msrb.mxu1 %v3386_v60  ;;  %1372 = vmatpush.msra.mxu0 %v3199_v37  ;;  %v788_v37 = vld [vmem:[%s4291_s4] sm:$0xf] }
 0x139   :  { %1264 = vmatpush.msrb.mxu2 %v3389_v62  ;;  %1289 = vmatpush.msra.mxu3 %v3354_v42  ;;  %v3563_v15 = vperm.slane %v788_v37, 3 }
 0x13a   :  { %1245 = vmatpush.msrb.mxu1 %v3393_v3  ;;  %1373 = vmatpush.msra.mxu0 %v3202_v40  ;;  %v790_v40 = vperm.slane %v788_v37, 0 }
 0x13b   :  { %1426 = vmatpush.msrb.mxu3 %v3236_v9  ;;  %876 = vmatmul.f32.gmra.mxu1 %v3281_v53 }
 0x13c   :  { %1265 = vmatpush.msrb.mxu2 %v3397_v32  ;;  %1246 = vmatpush.msrb.mxu1 %v3401_v4 }
 0x13d   :  { %917 = vmatmul.f32.gmra.mxu2 %v3281_v53  ;;  %1427 = vmatpush.msrb.mxu3 %v3240_v12 }
 0x13e   :  { %1266 = vmatpush.msrb.mxu2 %v3405_v7  ;;  %1247 = vmatpush.msrb.mxu1 %v3410_v0 }
 0x13f   :  { %1428 = vmatpush.msrb.mxu3 %v3250_v19  ;;  %1374 = vmatpush.msra.mxu0 %v3205_v43 }
 0x140   :  { %1267 = vmatpush.msrb.mxu2 %v3414_v52  ;;  %1248 = vmatpush.msrb.mxu1 %v3418_v55 }
 0x141   :  { %1429 = vmatpush.msrb.mxu3 %v3254_v24  ;;  %1375 = vmatpush.msra.mxu0 %v4390_v21 }
 0x142   :  { %1268 = vmatpush.msrb.mxu2 %v3421_v49  ;;  %1249 = vmatpush.msrb.mxu1 %v3425_v46 }
 0x143   :  { %1098 = vmatmul.f32.vlgmr.msra.gmra.mxu1 %v4389_v58  ;;  %1430 = vmatpush.msrb.mxu3 %v3257_v29 }
 0x144   :  { %1269 = vmatpush.msrb.mxu2 %v3429_v51  ;;  %1386 = vmatpush.msra.mxu1 %v3297_v8 }
 0x145   :  { %1118 = vmatmul.f32.vlgmr.msra.gmra.mxu2 %v4389_v58  ;;  %1431 = vmatpush.msrb.mxu3 %v3268_v39 }
 0x146   :  { %1406 = vmatpush.msra.mxu2 %v3300_v10  ;;  %1387 = vmatpush.msra.mxu1 %v3304_v11 }
 0x147   :  { %1376 = vmatpush.msra.mxu0 %v4391_v23  ;;  %1432 = vmatpush.msrb.mxu3 %v3272_v44 }
 0x148   :  { %1407 = vmatpush.msra.mxu2 %v3310_v16  ;;  %1388 = vmatpush.msra.mxu1 %v3314_v17 }
 0x149   :  { %1377 = vmatpush.msra.mxu0 %v4392_v25  ;;  %1433 = vmatpush.msrb.mxu3 %v3275_v48 }
 0x14a   :  { %1408 = vmatpush.msra.mxu2 %v3319_v20  ;;  %1389 = vmatpush.msra.mxu1 %v3323_v1 }
 0x14b   :  { %1378 = vmatpush.msra.mxu0 %v4393_v28  ;;  %1434 = vmatpush.msrb.mxu3 %v3286_v59 }
 0x14c   :  { %1409 = vmatpush.msra.mxu2 %v3329_v26  ;;  %1390 = vmatpush.msra.mxu1 %v3333_v27 }
 0x14d   :  { %1379 = vmatpush.msra.mxu0 %v4394_v31  ;;  %1435 = vmatpush.msrb.mxu3 %v3290_v63 }
 0x14e   :  { %1410 = vmatpush.msra.mxu2 %v3337_v30  ;;  %1391 = vmatpush.msra.mxu1 %v3342_v35 }
 0x14f   :  { %1380 = vmatpush.msra.mxu0 %v3223_v61  ;;  %1436 = vmatpush.msrb.mxu3 %v3293_v6 }
 0x150   :  { %1411 = vmatpush.msra.mxu2 %v3348_v38  ;;  %1392 = vmatpush.msra.mxu1 %v3352_v41 }
 0x151   :  { %1381 = vmatpush.msra.mxu0 %v3232_v5  ;;  %1437 = vmatpush.msrb.mxu3 %v3306_v13 }
 0x152   :  { %1412 = vmatpush.msra.mxu2 %v3357_v45  ;;  %1393 = vmatpush.msra.mxu1 %v3361_v14 }
 0x153   :  { %1438 = vmatpush.msrb.mxu3 %v3316_v18 }
 0x154   :  { %1413 = vmatpush.msra.mxu2 %v3366_v47  ;;  %1394 = vmatpush.msra.mxu1 %v3369_v50 }
 0x155   :  { %1439 = vmatpush.msrb.mxu3 %v3325_v22 }
 0x156   :  { %1414 = vmatpush.msra.mxu2 %v3373_v54  ;;  %1395 = vmatpush.msra.mxu1 %v3378_v56 }
 0x157   :  { %1440 = vmatpush.msrb.mxu3 %v3344_v36 }
 0x158   :  { %1415 = vmatpush.msra.mxu2 %v3382_v57  ;;  %1396 = vmatpush.msra.mxu1 %v3386_v60 }
 0x159   :  { %1441 = vmatpush.msrb.mxu3 %v3354_v42 }
 0x15a   :  { %1416 = vmatpush.msra.mxu2 %v3389_v62  ;;  %1397 = vmatpush.msra.mxu1 %v3393_v3 }
 0x15c   :  { %1417 = vmatpush.msra.mxu2 %v3397_v32  ;;  %1398 = vmatpush.msra.mxu1 %v3401_v4 }
 0x15e   :  { %1418 = vmatpush.msra.mxu2 %v3405_v7  ;;  %1399 = vmatpush.msra.mxu1 %v3410_v0 }
 0x160   :  { %1419 = vmatpush.msra.mxu2 %v3414_v52  ;;  %v815_v34 = vpop.f32.mrf.mxu1  ;;  %1400 = vmatpush.msra.mxu1 %v3418_v55 }
 0x162   :  { %1420 = vmatpush.msra.mxu2 %v3421_v49  ;;  %1401 = vmatpush.msra.mxu1 %v3425_v46 }
 0x164   :  { %1421 = vmatpush.msra.mxu2 %v3429_v51 }
 0x166   :  { %v827_v43 = vpop.f32.mrf.mxu2 }
 0x167   :  { %v3557_v58 = vadd.f32 %v827_v43, %v790_v40  ;;  %v3559_v61 = vpop.f32.mrf.mxu3 }
 0x168   :  { %v818_v2 = vpop.f32.mrf.mxu1 }
 0x169   :  { %4395 = vst [vmem:[#allocation47_spill] sm:$0xff] %v3557_v58  ;;  %v3561_v5 = vadd.f32 %v818_v2, %v790_v40 }
 0x16b   :  { %4396 = vst [vmem:[#allocation48_spill] sm:$0xff] %v3561_v5 }
 0x16f   :  { %v830_v33 = vpop.f32.mrf.mxu2 }
 0x170   :  { %v3565_v53 = vadd.f32 %v830_v33, %v790_v40  ;;  %v941_v21 = vpop.f32.mrf.mxu3  ;;  %v821_v23 = vpop.f32.mrf.mxu1 }
 0x171   :  { %v3568_v25 = vadd.f32 %v941_v21, %v3563_v15  ;;  %v3570_v28 = vadd.f32 %v821_v23, %v790_v40  ;;  %v791_v23 = vperm.slane %v788_v37, 1 }
 0x172   :  { %4397 = vst [vmem:[#allocation49_spill] sm:$0xff] %v3565_v53 }
 0x173   :  { %4398 = vst [vmem:[#allocation50_spill] sm:$0xff] %v3568_v25 }
 0x174   :  { %4399 = vst [vmem:[#allocation51_spill] sm:$0xff] %v3570_v28 }
 0x177   :  { %v833_v31 = vpop.f32.mrf.mxu2 }
 0x178   :  { %v3572_v43 = vadd.f32 %v833_v31, %v790_v40  ;;  %v944_v58 = vpop.f32.mrf.mxu3  ;;  %v824_v42 = vpop.f32.mrf.mxu1 }
 0x179   :  { %v3575_v2 = vadd.f32 %v944_v58, %v3563_v15  ;;  %v3577_v5 = vadd.f32 %v824_v42, %v790_v40  ;;  %v792_v58 = vperm.slane %v788_v37, 2 }
 0x17a   :  { %4400 = vst [vmem:[#allocation62_spill] sm:$0xff] %v3572_v43 }
 0x17b   :  { %4401 = vst [vmem:[#allocation63_spill] sm:$0xff] %v3575_v2 }
 0x17c   :  { %4402 = vst [vmem:[#allocation64_spill] sm:$0xff] %v3577_v5 }
 0x17f   :  { %v836_v51 = vpop.f32.mrf.mxu2 }
 0x180   :  { %v3579_v33 = vadd.f32 %v836_v51, %v790_v40  ;;  %v947_v53 = vpop.f32.mrf.mxu3  ;;  %v856_v46 = vpop.f32.mrf.mxu1 }
 0x181   :  { %v3582_v21 = vadd.f32 %v947_v53, %v3563_v15 }
 0x182   :  { %4403 = vst [vmem:[#allocation65_spill] sm:$0xff] %v3579_v33 }
 0x183   :  { %4404 = vst [vmem:[#allocation66_spill] sm:$0xff] %v3582_v21 }
 0x187   :  { %v897_v28 = vpop.f32.mrf.mxu2 }
 0x188   :  { %v950_v25 = vpop.f32.mrf.mxu3  ;;  %v859_v31 = vpop.f32.mrf.mxu1 }
 0x189   :  { %v3585_v43 = vadd.f32 %v950_v25, %v3563_v15  ;;  %v3587_v36 = vadd.f32 %v859_v31, %v791_v23 }
 0x18b   :  { %4405 = vst [vmem:[#allocation67_spill] sm:$0xff] %v3585_v43 }
 0x18c   :  { %4406 = vst [vmem:[#allocation68_spill] sm:$0xff] %v3587_v36 }
 0x18f   :  { %v900_v42 = vpop.f32.mrf.mxu2 }
 0x190   :  { %v3589_v5 = vadd.f32 %v900_v42, %v792_v58  ;;  %v953_v51 = vpop.f32.mrf.mxu3  ;;  %v862_v33 = vpop.f32.mrf.mxu1 }
 0x191   :  { %v3592_v2 = vadd.f32 %v953_v51, %v3563_v15  ;;  %v3594_v53 = vadd.f32 %v862_v33, %v791_v23 }
 0x192   :  { %4407 = vst [vmem:[#allocation69_spill] sm:$0xff] %v3589_v5 }
 0x193   :  { %4408 = vst [vmem:[#allocation70_spill] sm:$0xff] %v3592_v2 }
 0x194   :  { %4409 = vst [vmem:[#allocation71_spill] sm:$0xff] %v3594_v53  ;;  %v816_v53 = vadd.f32 %v815_v34, %v790_v40 }
 0x197   :  { %v903_v21 = vpop.f32.mrf.mxu2 }
 0x198   :  { %v3596_v49 = vadd.f32 %v903_v21, %v792_v58  ;;  %v956_v55 = vpop.f32.mrf.mxu3  ;;  %v865_v22 = vpop.f32.mrf.mxu1 }
 0x199   :  { %v3599_v25 = vadd.f32 %v956_v55, %v3563_v15  ;;  %v3601_v31 = vadd.f32 %v865_v22, %v791_v23  ;;  %v1079_v55 = vpop.f32.mrf.mxu0 }
 0x19a   :  { %4410 = vst [vmem:[#allocation72_spill] sm:$0xff] %v3596_v49  ;;  %v1142_v22 = vadd.f32 %v1079_v55, %v816_v53 }
 0x19b   :  { %4411 = vst [vmem:[#allocation73_spill] sm:$0xff] %v3599_v25 }
 0x19c   :  { %4412 = vst [vmem:[#allocation74_spill] sm:$0xff] %v3601_v31 }
 0x19f   :  { %v906_v37 = vpop.f32.mrf.mxu2 }
 0x1a0   :  { %v3603_v42 = vadd.f32 %v906_v37, %v792_v58  ;;  %v959_v43 = vpop.f32.mrf.mxu3  ;;  %v868_v5 = vpop.f32.mrf.mxu1 }
 0x1a1   :  { %v3606_v51 = vadd.f32 %v959_v43, %v3563_v15  ;;  %v3608_v33 = vadd.f32 %v868_v5, %v791_v23 }
 0x1a2   :  { %4413 = vst [vmem:[#allocation75_spill] sm:$0xff] %v3603_v42  ;;  %v2682_v42 = vmul.f32 -1.442695, %v1142_v22  ;;  %v898_v22 = vadd.f32 %v897_v28, %v792_v58 }
 0x1a3   :  { %4414 = vst [vmem:[#allocation76_spill] sm:$0xff] %v3606_v51 }
 0x1a4   :  { %4415 = vst [vmem:[#allocation77_spill] sm:$0xff] %v3608_v33  ;;  %2745 = vpow2.f32 %v2682_v42 }
 0x1a7   :  { %v909_v2 = vpop.f32.mrf.mxu2 }
 0x1a8   :  { %v3610_v21 = vadd.f32 %v909_v2, %v792_v58  ;;  %v871_v49 = vpop.f32.mrf.mxu1 }
 0x1a9   :  { %v3612_v36 = vadd.f32 %v871_v49, %v791_v23  ;;  %v857_v49 = vadd.f32 %v856_v46, %v791_v23  ;;  %v1139_v46 = vpop.f32.mrf.mxu3 }
 0x1aa   :  { %4416 = vst [vmem:[#allocation78_spill] sm:$0xff] %v3610_v21  ;;  %v2746_v21 = vpop.eup %2745 }
 0x1ab   :  { %4417 = vst [vmem:[#allocation79_spill] sm:$0xff] %v3612_v36  ;;  %v1155_v34 = vadd.f32 1.0, %v2746_v21 }
 0x1ad   :  { %2747 = vrcp.f32 %v1155_v34  ;;  %vm1163_vm1 = vweird.f32 %v1155_v34 }
 0x1af   :  { %v912_v25 = vpop.f32.mrf.mxu2 }
 0x1b0   :  { %v3614_v31 = vadd.f32 %v912_v25, %v792_v58  ;;  %v874_v37 = vpop.f32.mrf.mxu1 }
 0x1b1   :  { %v3616_v52 = vadd.f32 %v874_v37, %v791_v23 }
 0x1b2   :  { %4418 = vst [vmem:[#allocation80_spill] sm:$0xff] %v3614_v31 }
 0x1b3   :  { %4419 = vst [vmem:[#allocation81_spill] sm:$0xff] %v3616_v52  ;;  %v2748_v42 = vpop.eup %2747 }
 0x1b4   :  { %v1159_v31 = vmul.f32 %v2748_v42, %v1155_v34  ;;  %vm1164_vm0 = vweird.f32 %v2748_v42 }
 0x1b5   :  { %vm1165_vm3 = vmor %vm1163_vm1, %vm1164_vm0 }
 0x1b6   :  { %v1160_v21 = vsub.f32 1.0, %v1159_v31 }
 0x1b7   :  { %v915_v43 = vpop.f32.mrf.mxu2 }
 0x1b8   :  { %v3618_v5 = vadd.f32 %v915_v43, %v792_v58  ;;  %v877_v51 = vpop.f32.mrf.mxu1 }
 0x1b9   :  { %v3620_v2 = vadd.f32 %v877_v51, %v791_v23  ;;  %v939_v23 = vadd.f32 %v3559_v61, %v3563_v15 }
 0x1ba   :  { %4420 = vst [vmem:[#allocation82_spill] sm:$0xff] %v3618_v5 }
 0x1bb   :  { %4421 = vst [vmem:[#allocation83_spill] sm:$0xff] %v3620_v2 }
 0x1c0   :  { %v918_v40 = vpop.f32.mrf.mxu2  ;;  %v1099_v53 = vpop.f32.mrf.mxu1 }
 0x1c1   :  { %v3622_v36 = vadd.f32 %v918_v40, %v792_v58  ;;  %v1143_v25 = vadd.f32 %v1099_v53, %v857_v49  ;;  %v1145_v49 = vadd.f32 %v1139_v46, %v939_v23  ;;  %v1161_v53 = vmul.f32 %v2748_v42, %v1160_v21 }
 0x1c3   :  { %4422 = vst [vmem:[#allocation84_spill] sm:$0xff] %v3622_v36  ;;  %v2683_v55 = vmul.f32 -1.442695, %v1143_v25  ;;  %v1162_v58 = vadd.f32 %v2748_v42, %v1161_v53 }
 0x1c5   :  { %2749 = vpow2.f32 %v2683_v55  ;;  %v1166_v15 = vsel %vm1165_vm3, %v2748_v42, %v1162_v58 }
 0x1c8   :  { %v1119_v37 = vpop.f32.mrf.mxu2 }
 0x1c9   :  { %v1144_v52 = vadd.f32 %v1119_v37, %v898_v22  ;;  %v1167_v37 = vand.u32 2147483647, %v1155_v34 }
 0x1cb   :  { %v2684_v43 = vmul.f32 -1.442695, %v1144_v52  ;;  %v2750_v5 = vpop.eup %2749  ;;  %vm1168_vm6 = vcmp.eq.f32.partialorder %v1167_v37, 8.507059e+37 }
 0x1cc   :  { %v1156_v51 = vadd.f32 1.0, %v2750_v5  ;;  %v1169_v5 = vand.u32 2147483648, %v1155_v34 }
 0x1cd   :  { %2751 = vpow2.f32 %v2684_v43 }
 0x1ce   :  { %2753 = vrcp.f32 %v1156_v51  ;;  %v1184_v22 = vand.u32 2147483648, %v1156_v51  ;;  %v1182_v43 = vand.u32 2147483647, %v1156_v51  ;;  %vm1178_vm4 = vweird.f32 %v1156_v51 }
 0x1cf   :  { %v1170_v23 = vor.u32 1.1754944e-38, %v1169_v5 }
 0x1d0   :  { %vm1183_vm7 = vcmp.eq.f32.partialorder %v1182_v43, 8.507059e+37  ;;  %v4429_v43 = vld [vmem:[#allocation57_spill] sm:$0xff] }
 0x1d3   :  { %v2752_v40 = vpop.eup %2751 }
 0x1d4   :  { %v1157_v25 = vadd.f32 1.0, %v2752_v40  ;;  %v2754_v55 = vpop.eup %2753  ;;  %v1185_v40 = vor.u32 1.1754944e-38, %v1184_v22 }
 0x1d5   :  { %v1174_v28 = vmul.f32 %v2754_v55, %v1156_v51  ;;  %vm1179_vm2 = vweird.f32 %v2754_v55 }
 0x1d6   :  { %2755 = vrcp.f32 %v1157_v25  ;;  %vm1180_vm5 = vmor %vm1178_vm4, %vm1179_vm2  ;;  %v1199_v58 = vand.u32 2147483648, %v1157_v25  ;;  %vm1193_vm9 = vweird.f32 %v1157_v25  ;;  %v1197_v51 = vand.u32 2147483647, %v1157_v25 }
 0x1d7   :  { %2757 = vtanh.f32 %v1145_v49  ;;  %v1175_v52 = vsub.f32 1.0, %v1174_v28  ;;  %v1171_v28 = vsel %vm1168_vm6, %v1170_v23, %v1166_v15  ;;  %v4432_v15 = vld [vmem:[#allocation58_spill] sm:$0xff]  ;;  %v4436_v23 = vld [vmem:[#allocation60_spill] sm:$0xff] }
 0x1d8   :  { %v1200_v22 = vor.u32 1.1754944e-38, %v1199_v58  ;;  %vm1198_vm11 = vcmp.eq.f32.partialorder %v1197_v51, 8.507059e+37 }
 0x1d9   :  { %v1176_v31 = vmul.f32 %v2754_v55, %v1175_v52 }
 0x1db   :  { %v1177_v46 = vadd.f32 %v2754_v55, %v1176_v31 }
 0x1dc   :  { %v2756_v61 = vpop.eup %2755 }
 0x1dd   :  { %v2758_v21 = vpop.eup %2757  ;;  %v1189_v49 = vmul.f32 %v2756_v61, %v1157_v25  ;;  %v1181_v53 = vsel %vm1180_vm5, %v2754_v55, %v1177_v46  ;;  %vm1194_vm8 = vweird.f32 %v2756_v61  ;;  %v4428_v25 = vld [vmem:[#allocation56_spill] sm:$0xff]  ;;  %v4433_v46 = vld [vmem:[#allocation59_spill] sm:$0xff] }
 0x1de   :  { %v1186_v36 = vsel %vm1183_vm7, %v1185_v40, %v1181_v53  ;;  %v1205_v34 = vmul.f32 %v2758_v21, %v1171_v28  ;;  %vm1195_vm10 = vmor %vm1193_vm9, %vm1194_vm8  ;;  %v4434_v21 = vld [vmem:[#allocation53_spill] sm:$0xff] }
 0x1df   :  { %v1190_v2 = vsub.f32 1.0, %v1189_v49  ;;  %v1204_v52 = vmul.f32 0.0, %v1186_v36  ;;  %v3635_v36 = vld [vmem:[#allocation10 + $0x1e0] sm:$0xff]  ;;  %v4437_v40 = vld [vmem:[#allocation61_spill] sm:$0xff]  ;;  %v4438_v49 = vld [vmem:[#allocation54_spill] sm:$0xff] }
 0x1e1   :  { %v1191_v33 = vmul.f32 %v2756_v61, %v1190_v2  ;;  %v3626_v0 = vadd.f32 %v1205_v34, %v1204_v52  ;;  %v3647_v2 = vld [vmem:[#allocation10 + $0x1a0] sm:$0xff]  ;;  %v4439_v34 = vld [vmem:[#allocation48_spill] sm:$0xff] }
 0x1e3   :  { %v1192_v42 = vadd.f32 %v2756_v61, %v1191_v33  ;;  %2759 = vtanh.f32 %v3626_v0  ;;  %v3641_v33 = vld [vmem:[#allocation10 + $0x1c0] sm:$0xff] }
 0x1e5   :  { %v1196_v5 = vsel %vm1195_vm10, %v2756_v61, %v1192_v42  ;;  %v4430_v61 = vld [vmem:[#allocation52_spill] sm:$0xff] }
 0x1e6   :  { %v1201_v37 = vsel %vm1198_vm11, %v1200_v22, %v1196_v5  ;;  %v4440_v42 = vld [vmem:[#allocation68_spill] sm:$0xff] }
 0x1e9   :  { %v2760_v55 = vpop.eup %2759 }
 0x1ea   :  { %v3629_v31 = vmul.f32 %v2760_v55, %v1201_v37  ;;  %v4441_v55 = vld [vmem:[#allocation69_spill] sm:$0xff] }
 0x1ec   :  { %4423 = vst [vmem:[#allocation85_spill] sm:$0xff] %v3629_v31  ;;  %1230 = vmatmul.f32.vlgmr.msrb.gmra.mxu0 %v3629_v31  ;;  %1250 = vmatmul.f32.vlgmr.msrb.gmra.mxu1 %v3629_v31 }
 0x1ed   :  { %1270 = vmatmul.f32.vlgmr.msrb.gmra.mxu2 %v3629_v31  ;;  %1290 = vmatmul.f32.vlgmr.msra.gmra.mxu3 %v3629_v31 }
 0x1ee   :  { %1518 = vmatpush.msrb.mxu0 %v3635_v36  ;;  %1538 = vmatpush.msrb.mxu1 %v3297_v8 }
 0x1ef   :  { %1558 = vmatpush.msrb.mxu2 %v3300_v10  ;;  %1578 = vmatpush.msra.mxu3 %v3236_v9  ;;  %v3653_v9 = vld [vmem:[#allocation10 + $0x180] sm:$0xff] }
 0x1f0   :  { %1519 = vmatpush.msrb.mxu0 %v3641_v33  ;;  %1539 = vmatpush.msrb.mxu1 %v3304_v11 }
 0x1f1   :  { %1559 = vmatpush.msrb.mxu2 %v3310_v16  ;;  %1579 = vmatpush.msra.mxu3 %v3240_v12  ;;  %v3659_v12 = vld [vmem:[#allocation10 + $0x160] sm:$0xff] }
 0x1f2   :  { %1520 = vmatpush.msrb.mxu0 %v3647_v2  ;;  %1540 = vmatpush.msrb.mxu1 %v3314_v17 }
 0x1f3   :  { %1560 = vmatpush.msrb.mxu2 %v3319_v20  ;;  %1580 = vmatpush.msra.mxu3 %v3250_v19  ;;  %v3665_v19 = vld [vmem:[#allocation10 + $0x140] sm:$0xff] }
 0x1f4   :  { %1521 = vmatpush.msrb.mxu0 %v3653_v9  ;;  %1541 = vmatpush.msrb.mxu1 %v3323_v1 }
 0x1f5   :  { %1561 = vmatpush.msrb.mxu2 %v3329_v26  ;;  %1581 = vmatpush.msra.mxu3 %v3254_v24  ;;  %v3671_v24 = vld [vmem:[#allocation10 + $0x120] sm:$0xff] }
 0x1f6   :  { %1522 = vmatpush.msrb.mxu0 %v3659_v12  ;;  %1542 = vmatpush.msrb.mxu1 %v3333_v27 }
 0x1f7   :  { %1562 = vmatpush.msrb.mxu2 %v3337_v30  ;;  %1582 = vmatpush.msra.mxu3 %v3257_v29  ;;  %v3677_v29 = vld [vmem:[#allocation10 + $0x100] sm:$0xff] }
 0x1f8   :  { %1523 = vmatpush.msrb.mxu0 %v3665_v19  ;;  %1543 = vmatpush.msrb.mxu1 %v3342_v35 }
 0x1f9   :  { %1563 = vmatpush.msrb.mxu2 %v3348_v38  ;;  %1583 = vmatpush.msra.mxu3 %v3268_v39  ;;  %v3683_v39 = vld [vmem:[#allocation10 + $0xe0] sm:$0xff] }
 0x1fa   :  { %1524 = vmatpush.msrb.mxu0 %v3671_v24  ;;  %1544 = vmatpush.msrb.mxu1 %v3352_v41 }
 0x1fb   :  { %1564 = vmatpush.msrb.mxu2 %v3357_v45  ;;  %1584 = vmatpush.msra.mxu3 %v3272_v44  ;;  %v3689_v44 = vld [vmem:[#allocation10 + $0xc0] sm:$0xff] }
 0x1fc   :  { %1525 = vmatpush.msrb.mxu0 %v3677_v29  ;;  %1545 = vmatpush.msrb.mxu1 %v3361_v14 }
 0x1fd   :  { %1565 = vmatpush.msrb.mxu2 %v3366_v47  ;;  %1585 = vmatpush.msra.mxu3 %v3275_v48  ;;  %v3695_v48 = vld [vmem:[#allocation10 + $0xa0] sm:$0xff] }
 0x1fe   :  { %1526 = vmatpush.msrb.mxu0 %v3683_v39  ;;  %1546 = vmatpush.msrb.mxu1 %v3369_v50  ;;  %4424 = vst [vmem:[#allocation86_spill] sm:$0xff] %v3695_v48 }
 0x1ff   :  { %1566 = vmatpush.msrb.mxu2 %v3373_v54  ;;  %1586 = vmatpush.msra.mxu3 %v3286_v59  ;;  %v3701_v59 = vld [vmem:[#allocation10 + $0x80] sm:$0xff] }
 0x200   :  { %1527 = vmatpush.msrb.mxu0 %v3689_v44  ;;  %1547 = vmatpush.msrb.mxu1 %v3378_v56  ;;  %4425 = vst [vmem:[#allocation87_spill] sm:$0xff] %v3701_v59 }
 0x201   :  { %1567 = vmatpush.msrb.mxu2 %v3382_v57  ;;  %1587 = vmatpush.msra.mxu3 %v3290_v63  ;;  %v3707_v63 = vld [vmem:[#allocation10 + $0x60] sm:$0xff] }
 0x202   :  { %1528 = vmatpush.msrb.mxu0 %v3695_v48  ;;  %1548 = vmatpush.msrb.mxu1 %v3386_v60  ;;  %4426 = vst [vmem:[#allocation88_spill] sm:$0xff] %v3707_v63 }
 0x203   :  { %1568 = vmatpush.msrb.mxu2 %v3389_v62  ;;  %1588 = vmatpush.msra.mxu3 %v3293_v6  ;;  %v3713_v6 = vld [vmem:[#allocation10 + $0x40] sm:$0xff] }
 0x204   :  { %1529 = vmatpush.msrb.mxu0 %v3701_v59  ;;  %1549 = vmatpush.msrb.mxu1 %v3393_v3  ;;  %4427 = vst [vmem:[#allocation89_spill] sm:$0xff] %v3713_v6 }
 0x205   :  { %1569 = vmatpush.msrb.mxu2 %v3397_v32  ;;  %1589 = vmatpush.msra.mxu3 %v3306_v13  ;;  %v3719_v13 = vld [vmem:[#allocation10 + $0x20] sm:$0xff] }
 0x206   :  { %1530 = vmatpush.msrb.mxu0 %v3707_v63  ;;  %1550 = vmatpush.msrb.mxu1 %v3401_v4  ;;  %4431 = vst [vmem:[#allocation52_spill] sm:$0xff] %v3719_v13 }
 0x207   :  { %1570 = vmatpush.msrb.mxu2 %v3405_v7  ;;  %1590 = vmatpush.msra.mxu3 %v3316_v18  ;;  %v3725_v18 = vld [vmem:[#allocation10] sm:$0xff] }
 0x208   :  { %1531 = vmatpush.msrb.mxu0 %v3713_v6  ;;  %1551 = vmatpush.msrb.mxu1 %v4428_v25  ;;  %4435 = vst [vmem:[#allocation53_spill] sm:$0xff] %v3725_v18 }
 0x209   :  { %1571 = vmatpush.msrb.mxu2 %v4429_v43  ;;  %1591 = vmatpush.msra.mxu3 %v4430_v61 }
 0x20a   :  { %1532 = vmatpush.msrb.mxu0 %v3719_v13  ;;  %1552 = vmatpush.msrb.mxu1 %v4432_v15 }
 0x20b   :  { %1572 = vmatpush.msrb.mxu2 %v4433_v46  ;;  %1592 = vmatpush.msra.mxu3 %v4434_v21 }
 0x20c   :  { %1533 = vmatpush.msrb.mxu0 %v3725_v18  ;;  %1553 = vmatpush.msrb.mxu1 %v4436_v23 }
 0x20d   :  { %1573 = vmatpush.msrb.mxu2 %v4437_v40  ;;  %1593 = vmatpush.msra.mxu3 %v4438_v49 }
 0x269   :  { %v1231_v53 = vpop.f32.mrf.mxu0  ;;  %v1251_v28 = vpop.f32.mrf.mxu1 }
 0x26a   :  { %v1294_v52 = vadd.f32 %v1231_v53, %v4439_v34  ;;  %v1295_v58 = vadd.f32 %v1251_v28, %v4440_v42  ;;  %v4442_v28 = vld [vmem:[#allocation50_spill] sm:$0xff] }
 0x26c   :  { %v2685_v51 = vmul.f32 -1.442695, %v1294_v52  ;;  %v2686_v5 = vmul.f32 -1.442695, %v1295_v58 }
 0x26e   :  { %2761 = vpow2.f32 %v2685_v51 }
 0x26f   :  { %2763 = vpow2.f32 %v2686_v5 }
 0x270   :  { %v1271_v22 = vpop.f32.mrf.mxu2  ;;  %v1291_v49 = vpop.f32.mrf.mxu3 }
 0x271   :  { %v1296_v37 = vadd.f32 %v1271_v22, %v4441_v55  ;;  %v1297_v52 = vadd.f32 %v1291_v49, %v4442_v28 }
 0x273   :  { %v2687_v61 = vmul.f32 -1.442695, %v1296_v37 }
 0x274   :  { %v2762_v21 = vpop.eup %2761 }
 0x275   :  { %v2764_v31 = vpop.eup %2763  ;;  %v1307_v23 = vadd.f32 1.0, %v2762_v21  ;;  %2765 = vpow2.f32 %v2687_v61 }
 0x276   :  { %v1308_v40 = vadd.f32 1.0, %v2764_v31 }
 0x277   :  { %2767 = vrcp.f32 %v1307_v23  ;;  %v1321_v55 = vand.u32 2147483648, %v1307_v23  ;;  %v1319_v31 = vand.u32 2147483647, %v1307_v23  ;;  %vm1315_vm14 = vweird.f32 %v1307_v23 }
 0x278   :  { %2769 = vrcp.f32 %v1308_v40  ;;  %v1336_v37 = vand.u32 2147483648, %v1308_v40  ;;  %v1334_v46 = vand.u32 2147483647, %v1308_v40  ;;  %vm1330_vm15 = vweird.f32 %v1308_v40 }
 0x279   :  { %v1322_v28 = vor.u32 1.1754944e-38, %v1321_v55  ;;  %vm1320_vm2 = vcmp.eq.f32.partialorder %v1319_v31, 8.507059e+37 }
 0x27a   :  { %vm1335_vm3 = vcmp.eq.f32.partialorder %v1334_v46, 8.507059e+37 }
 0x27b   :  { %v2766_v18 = vpop.eup %2765 }
 0x27c   :  { %v1309_v53 = vadd.f32 1.0, %v2766_v18 }
 0x27d   :  { %v2768_v34 = vpop.eup %2767 }
 0x27e   :  { %v2770_v42 = vpop.eup %2769  ;;  %v1311_v58 = vmul.f32 %v2768_v34, %v1307_v23  ;;  %2771 = vrcp.f32 %v1309_v53  ;;  %vm1316_vm12 = vweird.f32 %v2768_v34  ;;  %v1351_v55 = vand.u32 2147483648, %v1309_v53 }
 0x27f   :  { %v1326_v51 = vmul.f32 %v2770_v42, %v1308_v40  ;;  %2773 = vtanh.f32 %v1297_v52  ;;  %vm1331_vm13 = vweird.f32 %v2770_v42  ;;  %vm1317_vm0 = vmor %vm1315_vm14, %vm1316_vm12  ;;  %vm1345_vm5 = vweird.f32 %v1309_v53 }
 0x280   :  { %v1312_v5 = vsub.f32 1.0, %v1311_v58  ;;  %vm1332_vm1 = vmor %vm1330_vm15, %vm1331_vm13  ;;  %v1337_v58 = vor.u32 1.1754944e-38, %v1336_v37  ;;  %v1352_v31 = vor.u32 1.1754944e-38, %v1351_v55 }
 0x281   :  { %v1327_v22 = vsub.f32 1.0, %v1326_v51 }
 0x282   :  { %v1313_v21 = vmul.f32 %v2768_v34, %v1312_v5 }
 0x283   :  { %v1328_v61 = vmul.f32 %v2770_v42, %v1327_v22 }
 0x284   :  { %v2772_v15 = vpop.eup %2771  ;;  %v1314_v18 = vadd.f32 %v2768_v34, %v1313_v21 }
 0x285   :  { %v1341_v49 = vmul.f32 %v2772_v15, %v1309_v53  ;;  %v1329_v13 = vadd.f32 %v2770_v42, %v1328_v61  ;;  %v2774_v52 = vpop.eup %2773  ;;  %vm1346_vm4 = vweird.f32 %v2772_v15 }
 0x286   :  { %v1318_v51 = vsel %vm1317_vm0, %v2768_v34, %v1314_v18  ;;  %v1349_v34 = vand.u32 2147483647, %v1309_v53  ;;  %vm1347_vm6 = vmor %vm1345_vm5, %vm1346_vm4  ;;  %v4462_v53 = vld [vmem:[#allocation71_spill] sm:$0xff] }
 0x287   :  { %v1342_v43 = vsub.f32 1.0, %v1341_v49  ;;  %v1323_v5 = vsel %vm1320_vm2, %v1322_v28, %v1318_v51  ;;  %v1333_v25 = vsel %vm1332_vm1, %v2770_v42, %v1329_v13  ;;  %v4463_v28 = vld [vmem:[#allocation72_spill] sm:$0xff] }
 0x288   :  { %v1338_v22 = vsel %vm1335_vm3, %v1337_v58, %v1333_v25  ;;  %v1357_v6 = vmul.f32 %v2774_v52, %v1323_v5  ;;  %vm1350_vm7 = vcmp.eq.f32.partialorder %v1349_v34, 8.507059e+37 }
 0x289   :  { %v1343_v7 = vmul.f32 %v2772_v15, %v1342_v43  ;;  %v1356_v21 = vmul.f32 %v1338_v22, %v3626_v0  ;;  %v3748_v0 = vld [vmem:[#allocation10 + $0x1f8] sm:$0xff]  ;;  %v4461_v43 = vld [vmem:[#allocation51_spill] sm:$0xff] }
 0x28b   :  { %v3736_v23 = vadd.f32 %v1357_v6, %v1356_v21  ;;  %v1344_v40 = vadd.f32 %v2772_v15, %v1343_v7  ;;  %v3754_v7 = vld [vmem:[#allocation10 + $0x1d8] sm:$0xff] }
 0x28d   :  { %2775 = vtanh.f32 %v3736_v23  ;;  %v1348_v37 = vsel %vm1347_vm6, %v2772_v15, %v1344_v40 }
 0x28e   :  { %v1353_v46 = vsel %vm1350_vm7, %v1352_v31, %v1348_v37  ;;  %v4464_v31 = vld [vmem:[#allocation63_spill] sm:$0xff] }
 0x293   :  { %v2776_v13 = vpop.eup %2775 }
 0x294   :  { %v3739_v25 = vmul.f32 %v2776_v13, %v1353_v46 }
 0x296   :  { %4443 = vst [vmem:[#allocation54_spill] sm:$0xff] %v3739_v25  ;;  %1382 = vmatmul.f32.vlgmr.msra.gmra.mxu0 %v3739_v25  ;;  %1402 = vmatmul.f32.vlgmr.msra.gmra.mxu1 %v3739_v25 }
 0x297   :  { %1422 = vmatmul.f32.vlgmr.msra.gmra.mxu2 %v3739_v25  ;;  %1442 = vmatmul.f32.vlgmr.msrb.gmra.mxu3 %v3739_v25  ;;  %v3976_v25 = vld [vmem:[#allocation10 + $0x8] sm:$0xff] }
 0x298   :  { %1670 = vmatpush.msra.mxu0 %v3635_v36  ;;  %1690 = vmatpush.msra.mxu1 %v3297_v8  ;;  %v3760_v8 = vld [vmem:[#allocation10 + $0x1b8] sm:$0xff]  ;;  %4477 = vst [vmem:[#allocation94_spill] sm:$0xff] %v3976_v25 }
 0x299   :  { %1710 = vmatpush.msra.mxu2 %v3300_v10  ;;  %1730 = vmatpush.msrb.mxu3 %v3748_v0  ;;  %v3766_v10 = vld [vmem:[#allocation10 + $0x198] sm:$0xff] }
 0x29a   :  { %1671 = vmatpush.msra.mxu0 %v3641_v33  ;;  %1691 = vmatpush.msra.mxu1 %v3304_v11  ;;  %v3772_v11 = vld [vmem:[#allocation10 + $0x178] sm:$0xff] }
 0x29b   :  { %1711 = vmatpush.msra.mxu2 %v3310_v16  ;;  %1731 = vmatpush.msrb.mxu3 %v3754_v7  ;;  %v3778_v16 = vld [vmem:[#allocation10 + $0x158] sm:$0xff] }
 0x29c   :  { %1672 = vmatpush.msra.mxu0 %v3647_v2  ;;  %1692 = vmatpush.msra.mxu1 %v3314_v17  ;;  %v3784_v17 = vld [vmem:[#allocation10 + $0x138] sm:$0xff] }
 0x29d   :  { %1712 = vmatpush.msra.mxu2 %v3319_v20  ;;  %1732 = vmatpush.msrb.mxu3 %v3760_v8  ;;  %v3790_v20 = vld [vmem:[#allocation10 + $0x118] sm:$0xff] }
 0x29e   :  { %1673 = vmatpush.msra.mxu0 %v3653_v9  ;;  %1693 = vmatpush.msra.mxu1 %v3323_v1  ;;  %v3796_v1 = vld [vmem:[#allocation10 + $0xf8] sm:$0xff] }
 0x29f   :  { %1713 = vmatpush.msra.mxu2 %v3329_v26  ;;  %1733 = vmatpush.msrb.mxu3 %v3766_v10  ;;  %v3802_v26 = vld [vmem:[#allocation10 + $0xd8] sm:$0xff] }
 0x2a0   :  { %1674 = vmatpush.msra.mxu0 %v3659_v12  ;;  %1694 = vmatpush.msra.mxu1 %v3333_v27  ;;  %4444 = vst [vmem:[#allocation48_spill] sm:$0xff] %v3802_v26  ;;  %v3808_v27 = vld [vmem:[#allocation10 + $0xb8] sm:$0xff] }
 0x2a1   :  { %1714 = vmatpush.msra.mxu2 %v3337_v30  ;;  %1734 = vmatpush.msrb.mxu3 %v3772_v11  ;;  %4445 = vst [vmem:[#allocation68_spill] sm:$0xff] %v3808_v27  ;;  %v3814_v30 = vld [vmem:[#allocation10 + $0x98] sm:$0xff] }
 0x2a2   :  { %1675 = vmatpush.msra.mxu0 %v3665_v19  ;;  %1695 = vmatpush.msra.mxu1 %v3342_v35  ;;  %4446 = vst [vmem:[#allocation69_spill] sm:$0xff] %v3814_v30  ;;  %v4447_v35 = vld [vmem:[#allocation55_spill] sm:$0xff] }
 0x2a3   :  { %1715 = vmatpush.msra.mxu2 %v3348_v38  ;;  %1735 = vmatpush.msrb.mxu3 %v3778_v16  ;;  %v3820_v38 = vld [vmem:[#allocation10 + $0x78] sm:$0xff] }
 0x2a4   :  { %1676 = vmatpush.msra.mxu0 %v3671_v24  ;;  %1696 = vmatpush.msra.mxu1 %v3352_v41  ;;  %4448 = vst [vmem:[#allocation50_spill] sm:$0xff] %v3820_v38  ;;  %v4449_v41 = vld [vmem:[#allocation89_spill] sm:$0xff] }
 0x2a5   :  { %1716 = vmatpush.msra.mxu2 %v3357_v45  ;;  %1736 = vmatpush.msrb.mxu3 %v3784_v17  ;;  %v4450_v45 = vld [vmem:[#allocation56_spill] sm:$0xff] }
 0x2a6   :  { %1677 = vmatpush.msra.mxu0 %v3677_v29  ;;  %1697 = vmatpush.msra.mxu1 %v3361_v14  ;;  %v4451_v14 = vld [vmem:[#allocation57_spill] sm:$0xff] }
 0x2a7   :  { %1717 = vmatpush.msra.mxu2 %v3366_v47  ;;  %1737 = vmatpush.msrb.mxu3 %v3790_v20  ;;  %v3826_v47 = vld [vmem:[#allocation10 + $0x58] sm:$0xff] }
 0x2a8   :  { %1678 = vmatpush.msra.mxu0 %v3683_v39  ;;  %1698 = vmatpush.msra.mxu1 %v3369_v50  ;;  %4452 = vst [vmem:[#allocation55_spill] sm:$0xff] %v3826_v47  ;;  %v4453_v50 = vld [vmem:[#allocation52_spill] sm:$0xff] }
 0x2a9   :  { %1718 = vmatpush.msra.mxu2 %v3373_v54  ;;  %1738 = vmatpush.msrb.mxu3 %v3796_v1  ;;  %v4454_v54 = vld [vmem:[#allocation58_spill] sm:$0xff] }
 0x2aa   :  { %1679 = vmatpush.msra.mxu0 %v3689_v44  ;;  %1699 = vmatpush.msra.mxu1 %v3378_v56  ;;  %v4455_v56 = vld [vmem:[#allocation59_spill] sm:$0xff] }
 0x2ab   :  { %1719 = vmatpush.msra.mxu2 %v3382_v57  ;;  %1739 = vmatpush.msrb.mxu3 %v3802_v26  ;;  %v3832_v57 = vld [vmem:[#allocation10 + $0x38] sm:$0xff] }
 0x2ac   :  { %1680 = vmatpush.msra.mxu0 %v3695_v48  ;;  %1700 = vmatpush.msra.mxu1 %v3386_v60  ;;  %4456 = vst [vmem:[#allocation56_spill] sm:$0xff] %v3832_v57  ;;  %v4457_v60 = vld [vmem:[#allocation53_spill] sm:$0xff] }
 0x2ad   :  { %1720 = vmatpush.msra.mxu2 %v3389_v62  ;;  %1740 = vmatpush.msrb.mxu3 %v3808_v27  ;;  %v4458_v62 = vld [vmem:[#allocation60_spill] sm:$0xff] }
 0x2ae   :  { %1681 = vmatpush.msra.mxu0 %v3701_v59  ;;  %1701 = vmatpush.msra.mxu1 %v3393_v3  ;;  %v4459_v3 = vld [vmem:[#allocation61_spill] sm:$0xff] }
 0x2af   :  { %1721 = vmatpush.msra.mxu2 %v3397_v32  ;;  %1741 = vmatpush.msrb.mxu3 %v3814_v30  ;;  %v3838_v32 = vld [vmem:[#allocation10 + $0x18] sm:$0xff] }
 0x2b0   :  { %1682 = vmatpush.msra.mxu0 %v3707_v63  ;;  %1702 = vmatpush.msra.mxu1 %v3401_v4  ;;  %4460 = vst [vmem:[#allocation57_spill] sm:$0xff] %v3838_v32 }
 0x2b1   :  { %1722 = vmatpush.msra.mxu2 %v4447_v35  ;;  %1742 = vmatpush.msrb.mxu3 %v3820_v38 }
 0x2b2   :  { %1683 = vmatpush.msra.mxu0 %v4449_v41  ;;  %1703 = vmatpush.msra.mxu1 %v4450_v45 }
 0x2b3   :  { %1723 = vmatpush.msra.mxu2 %v4451_v14  ;;  %1743 = vmatpush.msrb.mxu3 %v3826_v47 }
 0x2b4   :  { %1684 = vmatpush.msra.mxu0 %v4453_v50  ;;  %1704 = vmatpush.msra.mxu1 %v4454_v54 }
 0x2b5   :  { %1724 = vmatpush.msra.mxu2 %v4455_v56  ;;  %1744 = vmatpush.msrb.mxu3 %v3832_v57 }
 0x2b6   :  { %1685 = vmatpush.msra.mxu0 %v4457_v60  ;;  %1705 = vmatpush.msra.mxu1 %v4458_v62 }
 0x2b7   :  { %1725 = vmatpush.msra.mxu2 %v4459_v3  ;;  %1745 = vmatpush.msrb.mxu3 %v3838_v32 }
 0x313   :  { %v1383_v4 = vpop.f32.mrf.mxu0  ;;  %v1403_v6 = vpop.f32.mrf.mxu1 }
 0x314   :  { %v1446_v15 = vadd.f32 %v1383_v4, %v4461_v43  ;;  %v1447_v42 = vadd.f32 %v1403_v6, %v4462_v53 }
 0x316   :  { %v2688_v61 = vmul.f32 -1.442695, %v1446_v15  ;;  %v2689_v18 = vmul.f32 -1.442695, %v1447_v42 }
 0x318   :  { %2777 = vpow2.f32 %v2688_v61 }
 0x319   :  { %2779 = vpow2.f32 %v2689_v18 }
 0x31a   :  { %v1423_v49 = vpop.f32.mrf.mxu2  ;;  %v1443_v40 = vpop.f32.mrf.mxu3 }
 0x31b   :  { %v1448_v58 = vadd.f32 %v1423_v49, %v4463_v28  ;;  %v1449_v13 = vadd.f32 %v1443_v40, %v4464_v31 }
 0x31d   :  { %v2690_v51 = vmul.f32 -1.442695, %v1448_v58 }
 0x31e   :  { %v2778_v52 = vpop.eup %2777 }
 0x31f   :  { %v2780_v5 = vpop.eup %2779  ;;  %v1459_v22 = vadd.f32 1.0, %v2778_v52  ;;  %2781 = vpow2.f32 %v2690_v51 }
 0x320   :  { %v1460_v21 = vadd.f32 1.0, %v2780_v5 }
 0x321   :  { %2783 = vrcp.f32 %v1459_v22  ;;  %v1473_v56 = vand.u32 2147483648, %v1459_v22  ;;  %v1471_v4 = vand.u32 2147483647, %v1459_v22  ;;  %vm1467_vm10 = vweird.f32 %v1459_v22 }
 0x322   :  { %2785 = vrcp.f32 %v1460_v21  ;;  %v1488_v62 = vand.u32 2147483648, %v1460_v21  ;;  %v1486_v43 = vand.u32 2147483647, %v1460_v21  ;;  %vm1482_vm11 = vweird.f32 %v1460_v21 }
 0x323   :  { %v1474_v61 = vor.u32 1.1754944e-38, %v1473_v56  ;;  %vm1472_vm14 = vcmp.eq.f32.partialorder %v1471_v4, 8.507059e+37  ;;  %v3872_v4 = vld [vmem:[#allocation10 + $0x1a8] sm:$0xff] }
 0x324   :  { %v1489_v49 = vor.u32 1.1754944e-38, %v1488_v62  ;;  %vm1487_vm15 = vcmp.eq.f32.partialorder %v1486_v43, 8.507059e+37  ;;  %v3864_v62 = vld [vmem:[#allocation10 + $0x1c8] sm:$0xff] }
 0x325   :  { %v2782_v55 = vpop.eup %2781  ;;  %v3880_v43 = vld [vmem:[#allocation10 + $0x188] sm:$0xff] }
 0x326   :  { %v1461_v34 = vadd.f32 1.0, %v2782_v55 }
 0x327   :  { %v2784_v37 = vpop.eup %2783 }
 0x328   :  { %v2786_v46 = vpop.eup %2785  ;;  %v1463_v35 = vmul.f32 %v2784_v37, %v1459_v22  ;;  %2787 = vrcp.f32 %v1461_v34  ;;  %vm1468_vm8 = vweird.f32 %v2784_v37  ;;  %vm1497_vm1 = vweird.f32 %v1461_v34 }
 0x329   :  { %v1478_v45 = vmul.f32 %v2786_v46, %v1460_v21  ;;  %2789 = vtanh.f32 %v1449_v13  ;;  %vm1483_vm9 = vweird.f32 %v2786_v46  ;;  %vm1469_vm12 = vmor %vm1467_vm10, %vm1468_vm8 }
 0x32a   :  { %v1464_v14 = vsub.f32 1.0, %v1463_v35  ;;  %vm1484_vm13 = vmor %vm1482_vm11, %vm1483_vm9  ;;  %v1503_v35 = vand.u32 2147483648, %v1461_v34 }
 0x32b   :  { %v1479_v54 = vsub.f32 1.0, %v1478_v45 }
 0x32c   :  { %v1465_v3 = vmul.f32 %v2784_v37, %v1464_v14  ;;  %v1504_v14 = vor.u32 1.1754944e-38, %v1503_v35  ;;  %v3947_v35 = vld [vmem:[#allocation10 + $0x90] sm:$0xff] }
 0x32d   :  { %v1480_v6 = vmul.f32 %v2786_v46, %v1479_v54  ;;  %4470 = vst [vmem:[#allocation71_spill] sm:$0xff] %v3947_v35 }
 0x32e   :  { %v2788_v15 = vpop.eup %2787  ;;  %v1466_v53 = vadd.f32 %v2784_v37, %v1465_v3  ;;  %v3867_v3 = vld [vmem:[#allocation10 + $0x1d0] sm:$0xff] }
 0x32f   :  { %v1493_v42 = vmul.f32 %v2788_v15, %v1461_v34  ;;  %v1481_v18 = vadd.f32 %v2786_v46, %v1480_v6  ;;  %v2790_v58 = vpop.eup %2789  ;;  %vm1498_vm0 = vweird.f32 %v2788_v15  ;;  %v3875_v6 = vld [vmem:[#allocation10 + $0x1b0] sm:$0xff] }
 0x330   :  { %v1470_v28 = vsel %vm1469_vm12, %v2784_v37, %v1466_v53  ;;  %v1501_v37 = vand.u32 2147483647, %v1461_v34  ;;  %vm1499_vm2 = vmor %vm1497_vm1, %vm1498_vm0  ;;  %v3859_v34 = vld [vmem:[#allocation10 + $0x1f0] sm:$0xff]  ;;  %v3888_v53 = vld [vmem:[#allocation10 + $0x168] sm:$0xff] }
 0x331   :  { %v1494_v51 = vsub.f32 1.0, %v1493_v42  ;;  %v1475_v52 = vsel %vm1472_vm14, %v1474_v61, %v1470_v28  ;;  %v1485_v5 = vsel %vm1484_vm13, %v2786_v46, %v1481_v18  ;;  %v3891_v42 = vld [vmem:[#allocation10 + $0x170] sm:$0xff]  ;;  %v3896_v61 = vld [vmem:[#allocation10 + $0x148] sm:$0xff] }
 0x332   :  { %v1490_v40 = vsel %vm1487_vm15, %v1489_v49, %v1485_v5  ;;  %v1509_v55 = vmul.f32 %v2790_v58, %v1475_v52  ;;  %vm1502_vm3 = vcmp.eq.f32.partialorder %v1501_v37, 8.507059e+37  ;;  %v3899_v18 = vld [vmem:[#allocation10 + $0x150] sm:$0xff]  ;;  %v3904_v49 = vld [vmem:[#allocation10 + $0x128] sm:$0xff] }
 0x333   :  { %v1495_v31 = vmul.f32 %v2788_v15, %v1494_v51  ;;  %v1508_v13 = vmul.f32 %v1490_v40, %v3736_v23  ;;  %v3856_v23 = vld [vmem:[#allocation10 + $0x1e8] sm:$0xff]  ;;  %v3907_v28 = vld [vmem:[#allocation10 + $0x130] sm:$0xff] }
 0x334   :  { %v3912_v58 = vld [vmem:[#allocation10 + $0x108] sm:$0xff]  ;;  %v3915_v51 = vld [vmem:[#allocation10 + $0x110] sm:$0xff] }
 0x335   :  { %v3846_v22 = vadd.f32 %v1509_v55, %v1508_v13  ;;  %v1496_v21 = vadd.f32 %v2788_v15, %v1495_v31  ;;  %v3920_v52 = vld [vmem:[#allocation10 + $0xe8] sm:$0xff]  ;;  %v3923_v5 = vld [vmem:[#allocation10 + $0xf0] sm:$0xff] }
 0x336   :  { %v3928_v40 = vld [vmem:[#allocation10 + $0xc8] sm:$0xff]  ;;  %v3931_v55 = vld [vmem:[#allocation10 + $0xd0] sm:$0xff] }
 0x337   :  { %2791 = vtanh.f32 %v3846_v22  ;;  %v1500_v45 = vsel %vm1499_vm2, %v2788_v15, %v1496_v21  ;;  %v3883_v15 = vld [vmem:[#allocation10 + $0x190] sm:$0xff]  ;;  %4466 = vst [vmem:[#allocation59_spill] sm:$0xff] %v3931_v55  ;;  %v3936_v31 = vld [vmem:[#allocation10 + $0xa8] sm:$0xff] }
 0x338   :  { %v1505_v54 = vsel %vm1502_vm3, %v1504_v14, %v1500_v45  ;;  %4467 = vst [vmem:[#allocation60_spill] sm:$0xff] %v3936_v31  ;;  %v3939_v13 = vld [vmem:[#allocation10 + $0xb0] sm:$0xff]  ;;  %v3944_v21 = vld [vmem:[#allocation10 + $0x88] sm:$0xff] }
 0x339   :  { %4468 = vst [vmem:[#allocation61_spill] sm:$0xff] %v3939_v13  ;;  %v3952_v37 = vld [vmem:[#allocation10 + $0x68] sm:$0xff]  ;;  %v3955_v45 = vld [vmem:[#allocation10 + $0x70] sm:$0xff] }
 0x33a   :  { %4469 = vst [vmem:[#allocation51_spill] sm:$0xff] %v3944_v21  ;;  %v3960_v14 = vld [vmem:[#allocation10 + $0x48] sm:$0xff] }
 0x33b   :  { %4471 = vst [vmem:[#allocation72_spill] sm:$0xff] %v3952_v37 }
 0x33c   :  { %4472 = vst [vmem:[#allocation63_spill] sm:$0xff] %v3955_v45 }
 0x33d   :  { %v2792_v46 = vpop.eup %2791  ;;  %4473 = vst [vmem:[#allocation90_spill] sm:$0xff] %v3960_v14 }
 0x33e   :  { %v3849_v56 = vmul.f32 %v2792_v46, %v1505_v54  ;;  %v3963_v46 = vld [vmem:[#allocation10 + $0x50] sm:$0xff]  ;;  %v3968_v54 = vld [vmem:[#allocation10 + $0x28] sm:$0xff] }
 0x33f   :  { %4474 = vst [vmem:[#allocation91_spill] sm:$0xff] %v3963_v46 }
 0x340   :  { %4465 = vst [vmem:[#allocation58_spill] sm:$0xff] %v3849_v56  ;;  %1534 = vmatmul.f32.vlgmr.msrb.gmra.mxu0 %v3849_v56  ;;  %1554 = vmatmul.f32.vlgmr.msrb.gmra.mxu1 %v3849_v56 }
 0x341   :  { %1574 = vmatmul.f32.vlgmr.msrb.gmra.mxu2 %v3849_v56  ;;  %1594 = vmatmul.f32.vlgmr.msra.gmra.mxu3 %v3849_v56  ;;  %4475 = vst [vmem:[#allocation92_spill] sm:$0xff] %v3968_v54  ;;  %v3971_v56 = vld [vmem:[#allocation10 + $0x30] sm:$0xff] }
 0x342   :  { %1822 = vmatpush.msrb.mxu0 %v3635_v36  ;;  %1842 = vmatpush.msrb.mxu1 %v3856_v23  ;;  %4476 = vst [vmem:[#allocation93_spill] sm:$0xff] %v3971_v56 }
 0x343   :  { %1862 = vmatpush.msrb.mxu2 %v3859_v34  ;;  %1882 = vmatpush.msra.mxu3 %v3748_v0 }
 0x344   :  { %1823 = vmatpush.msrb.mxu0 %v3641_v33  ;;  %1843 = vmatpush.msrb.mxu1 %v3864_v62 }
 0x345   :  { %1863 = vmatpush.msrb.mxu2 %v3867_v3  ;;  %1883 = vmatpush.msra.mxu3 %v3754_v7 }
 0x346   :  { %1824 = vmatpush.msrb.mxu0 %v3647_v2  ;;  %1844 = vmatpush.msrb.mxu1 %v3872_v4 }
 0x347   :  { %1864 = vmatpush.msrb.mxu2 %v3875_v6  ;;  %1884 = vmatpush.msra.mxu3 %v3760_v8 }
 0x348   :  { %1825 = vmatpush.msrb.mxu0 %v3653_v9  ;;  %1845 = vmatpush.msrb.mxu1 %v3880_v43 }
 0x349   :  { %1865 = vmatpush.msrb.mxu2 %v3883_v15  ;;  %1885 = vmatpush.msra.mxu3 %v3766_v10 }
 0x34a   :  { %1826 = vmatpush.msrb.mxu0 %v3659_v12  ;;  %1846 = vmatpush.msrb.mxu1 %v3888_v53 }
 0x34b   :  { %1866 = vmatpush.msrb.mxu2 %v3891_v42  ;;  %1886 = vmatpush.msra.mxu3 %v3772_v11 }
 0x34c   :  { %1827 = vmatpush.msrb.mxu0 %v3665_v19  ;;  %1847 = vmatpush.msrb.mxu1 %v3896_v61 }
 0x34d   :  { %1867 = vmatpush.msrb.mxu2 %v3899_v18  ;;  %1887 = vmatpush.msra.mxu3 %v3778_v16 }
 0x34e   :  { %1828 = vmatpush.msrb.mxu0 %v3671_v24  ;;  %1848 = vmatpush.msrb.mxu1 %v3904_v49 }
 0x34f   :  { %1868 = vmatpush.msrb.mxu2 %v3907_v28  ;;  %1888 = vmatpush.msra.mxu3 %v3784_v17 }
 0x350   :  { %1829 = vmatpush.msrb.mxu0 %v3677_v29  ;;  %1849 = vmatpush.msrb.mxu1 %v3912_v58 }
 0x351   :  { %1869 = vmatpush.msrb.mxu2 %v3915_v51  ;;  %1889 = vmatpush.msra.mxu3 %v3790_v20 }
 0x352   :  { %1830 = vmatpush.msrb.mxu0 %v3683_v39  ;;  %1850 = vmatpush.msrb.mxu1 %v3920_v52 }
 0x353   :  { %1870 = vmatpush.msrb.mxu2 %v3923_v5  ;;  %1890 = vmatpush.msra.mxu3 %v3796_v1 }
 0x354   :  { %1831 = vmatpush.msrb.mxu0 %v3689_v44  ;;  %1851 = vmatpush.msrb.mxu1 %v3928_v40 }
 0x355   :  { %1871 = vmatpush.msrb.mxu2 %v3931_v55  ;;  %1891 = vmatpush.msra.mxu3 %v3802_v26 }
 0x356   :  { %1832 = vmatpush.msrb.mxu0 %v3695_v48  ;;  %1852 = vmatpush.msrb.mxu1 %v3936_v31 }
 0x357   :  { %1872 = vmatpush.msrb.mxu2 %v3939_v13  ;;  %1892 = vmatpush.msra.mxu3 %v3808_v27 }
 0x358   :  { %1833 = vmatpush.msrb.mxu0 %v3701_v59  ;;  %1853 = vmatpush.msrb.mxu1 %v3944_v21 }
 0x359   :  { %1873 = vmatpush.msrb.mxu2 %v3947_v35  ;;  %1893 = vmatpush.msra.mxu3 %v3814_v30 }
 0x35a   :  { %1834 = vmatpush.msrb.mxu0 %v3707_v63  ;;  %1854 = vmatpush.msrb.mxu1 %v3952_v37 }
 0x35b   :  { %1874 = vmatpush.msrb.mxu2 %v3955_v45  ;;  %1894 = vmatpush.msra.mxu3 %v3820_v38  ;;  %v4481_v45 = vld [vmem:[#allocation75_spill] sm:$0xff] }
 0x35c   :  { %1835 = vmatpush.msrb.mxu0 %v4449_v41  ;;  %1855 = vmatpush.msrb.mxu1 %v3960_v14  ;;  %v4480_v41 = vld [vmem:[#allocation74_spill] sm:$0xff] }
 0x35d   :  { %1875 = vmatpush.msrb.mxu2 %v3963_v46  ;;  %1895 = vmatpush.msra.mxu3 %v3826_v47  ;;  %v3979_v46 = vld [vmem:[#allocation10 + $0x10] sm:$0xff]  ;;  %v4479_v47 = vld [vmem:[#allocation64_spill] sm:$0xff] }
 0x35e   :  { %1836 = vmatpush.msrb.mxu0 %v4453_v50  ;;  %1856 = vmatpush.msrb.mxu1 %v3968_v54  ;;  %4478 = vst [vmem:[#allocation95_spill] sm:$0xff] %v3979_v46 }
 0x35f   :  { %1876 = vmatpush.msrb.mxu2 %v3971_v56  ;;  %1896 = vmatpush.msra.mxu3 %v3832_v57 }
 0x360   :  { %1837 = vmatpush.msrb.mxu0 %v4457_v60  ;;  %1857 = vmatpush.msrb.mxu1 %v3976_v25 }
 0x361   :  { %1877 = vmatpush.msrb.mxu2 %v3979_v46  ;;  %1897 = vmatpush.msra.mxu3 %v3838_v32 }
 0x3bd   :  { %v1535_v50 = vpop.f32.mrf.mxu0  ;;  %v1555_v54 = vpop.f32.mrf.mxu1 }
 0x3be   :  { %v1598_v14 = vadd.f32 %v1535_v50, %v4479_v47  ;;  %v1599_v56 = vadd.f32 %v1555_v54, %v4480_v41  ;;  %v4482_v41 = vld [vmem:[#allocation66_spill] sm:$0xff] }
 0x3c0   :  { %v2691_v38 = vmul.f32 -1.442695, %v1598_v14  ;;  %v2692_v57 = vmul.f32 -1.442695, %v1599_v56 }
 0x3c2   :  { %2793 = vpow2.f32 %v2691_v38 }
 0x3c3   :  { %2795 = vpow2.f32 %v2692_v57 }
 0x3c4   :  { %v1575_v60 = vpop.f32.mrf.mxu2  ;;  %v1595_v32 = vpop.f32.mrf.mxu3 }
 0x3c5   :  { %v1600_v37 = vadd.f32 %v1575_v60, %v4481_v45  ;;  %v1601_v14 = vadd.f32 %v1595_v32, %v4482_v41 }
 0x3c7   :  { %v2693_v25 = vmul.f32 -1.442695, %v1600_v37 }
 0x3c8   :  { %v2794_v63 = vpop.eup %2793 }
 0x3c9   :  { %v2796_v30 = vpop.eup %2795  ;;  %v1611_v35 = vadd.f32 1.0, %v2794_v63  ;;  %2797 = vpow2.f32 %v2693_v25 }
 0x3ca   :  { %v1612_v46 = vadd.f32 1.0, %v2796_v30 }
 0x3cb   :  { %2799 = vrcp.f32 %v1611_v35  ;;  %v1625_v37 = vand.u32 2147483648, %v1611_v35  ;;  %v1623_v25 = vand.u32 2147483647, %v1611_v35  ;;  %vm1619_vm6 = vweird.f32 %v1611_v35 }
 0x3cc   :  { %2801 = vrcp.f32 %v1612_v46  ;;  %v1640_v45 = vand.u32 2147483648, %v1612_v46  ;;  %v1638_v59 = vand.u32 2147483647, %v1612_v46  ;;  %vm1634_vm7 = vweird.f32 %v1612_v46 }
 0x3cd   :  { %v1626_v41 = vor.u32 1.1754944e-38, %v1625_v37  ;;  %vm1624_vm10 = vcmp.eq.f32.partialorder %v1623_v25, 8.507059e+37 }
 0x3ce   :  { %vm1639_vm11 = vcmp.eq.f32.partialorder %v1638_v59, 8.507059e+37 }
 0x3cf   :  { %v2798_v21 = vpop.eup %2797 }
 0x3d0   :  { %v1613_v47 = vadd.f32 1.0, %v2798_v21 }
 0x3d1   :  { %v2800_v50 = vpop.eup %2799 }
 0x3d2   :  { %v2802_v56 = vpop.eup %2801  ;;  %v1615_v38 = vmul.f32 %v2800_v50, %v1611_v35  ;;  %2803 = vrcp.f32 %v1613_v47  ;;  %vm1620_vm4 = vweird.f32 %v2800_v50  ;;  %v1655_v37 = vand.u32 2147483648, %v1613_v47 }
 0x3d3   :  { %v1630_v57 = vmul.f32 %v2802_v56, %v1612_v46  ;;  %2805 = vtanh.f32 %v1601_v14  ;;  %vm1635_vm5 = vweird.f32 %v2802_v56  ;;  %vm1621_vm8 = vmor %vm1619_vm6, %vm1620_vm4  ;;  %vm1649_vm13 = vweird.f32 %v1613_v47 }
 0x3d4   :  { %v1616_v54 = vsub.f32 1.0, %v1615_v38  ;;  %vm1636_vm9 = vmor %vm1634_vm7, %vm1635_vm5  ;;  %v1641_v38 = vor.u32 1.1754944e-38, %v1640_v45  ;;  %v1656_v25 = vor.u32 1.1754944e-38, %v1655_v37  ;;  %v4510_v37 = vld [vmem:[#allocation47_spill] sm:$0xff] }
 0x3d5   :  { %v1631_v60 = vsub.f32 1.0, %v1630_v57 }
 0x3d6   :  { %v1617_v63 = vmul.f32 %v2800_v50, %v1616_v54 }
 0x3d7   :  { %v1632_v30 = vmul.f32 %v2802_v56, %v1631_v60 }
 0x3d8   :  { %v2804_v27 = vpop.eup %2803  ;;  %v1618_v21 = vadd.f32 %v2800_v50, %v1617_v63 }
 0x3d9   :  { %v1645_v32 = vmul.f32 %v2804_v27, %v1613_v47  ;;  %v1633_v13 = vadd.f32 %v2802_v56, %v1632_v30  ;;  %v2806_v14 = vpop.eup %2805  ;;  %vm1650_vm12 = vweird.f32 %v2804_v27  ;;  %v4501_v30 = vld [vmem:[#allocation55_spill] sm:$0xff] }
 0x3da   :  { %v1622_v57 = vsel %vm1621_vm8, %v2800_v50, %v1618_v21  ;;  %v1653_v50 = vand.u32 2147483647, %v1613_v47  ;;  %vm1651_vm14 = vmor %vm1649_vm13, %vm1650_vm12  ;;  %v4499_v47 = vld [vmem:[#allocation90_spill] sm:$0xff]  ;;  %v4502_v21 = vld [vmem:[#allocation52_spill] sm:$0xff] }
 0x3db   :  { %v1646_v31 = vsub.f32 1.0, %v1645_v32  ;;  %v1627_v54 = vsel %vm1624_vm10, %v1626_v41, %v1622_v57  ;;  %v1637_v48 = vsel %vm1636_vm9, %v2802_v56, %v1633_v13  ;;  %v4500_v56 = vld [vmem:[#allocation91_spill] sm:$0xff]  ;;  %v4503_v32 = vld [vmem:[#allocation92_spill] sm:$0xff]  ;;  %v4504_v41 = vld [vmem:[#allocation93_spill] sm:$0xff] }
 0x3dc   :  { %v1642_v60 = vsel %vm1639_vm11, %v1641_v38, %v1637_v48  ;;  %v1661_v26 = vmul.f32 %v2806_v14, %v1627_v54  ;;  %vm1654_vm15 = vcmp.eq.f32.partialorder %v1653_v50, 8.507059e+37  ;;  %v4505_v38 = vld [vmem:[#allocation56_spill] sm:$0xff]  ;;  %v4506_v57 = vld [vmem:[#allocation53_spill] sm:$0xff]  ;;  %v4507_v14 = vld [vmem:[#allocation94_spill] sm:$0xff] }
 0x3dd   :  { %v1647_v55 = vmul.f32 %v2804_v27, %v1646_v31  ;;  %v1660_v63 = vmul.f32 %v1642_v60, %v3846_v22  ;;  %v4496_v22 = vld [vmem:[#allocation63_spill] sm:$0xff]  ;;  %v4498_v31 = vld [vmem:[#allocation89_spill] sm:$0xff] }
 0x3de   :  { %v4508_v54 = vld [vmem:[#allocation95_spill] sm:$0xff]  ;;  %v4509_v60 = vld [vmem:[#allocation57_spill] sm:$0xff] }
 0x3df   :  { %v3988_v35 = vadd.f32 %v1661_v26, %v1660_v63  ;;  %v1648_v46 = vadd.f32 %v2804_v27, %v1647_v55  ;;  %v4494_v26 = vld [vmem:[#allocation88_spill] sm:$0xff]  ;;  %v4497_v55 = vld [vmem:[#allocation50_spill] sm:$0xff] }
 0x3e1   :  { %2807 = vtanh.f32 %v3988_v35  ;;  %v1652_v45 = vsel %vm1651_vm14, %v2804_v27, %v1648_v46  ;;  %v4495_v27 = vld [vmem:[#allocation72_spill] sm:$0xff] }
 0x3e2   :  { %v1657_v59 = vsel %vm1654_vm15, %v1656_v25, %v1652_v45  ;;  %v4511_v45 = vld [vmem:[#allocation77_spill] sm:$0xff] }
 0x3e7   :  { %v2808_v13 = vpop.eup %2807 }
 0x3e8   :  { %v3991_v48 = vmul.f32 %v2808_v13, %v1657_v59 }
 0x3ea   :  { %4483 = vst [vmem:[#allocation64_spill] sm:$0xff] %v3991_v48  ;;  %1686 = vmatmul.f32.vlgmr.msra.gmra.mxu0 %v3991_v48  ;;  %1706 = vmatmul.f32.vlgmr.msra.gmra.mxu1 %v3991_v48 }
 0x3eb   :  { %1726 = vmatmul.f32.vlgmr.msra.gmra.mxu2 %v3991_v48  ;;  %1746 = vmatmul.f32.vlgmr.msrb.gmra.mxu3 %v3991_v48 }
 0x3ec   :  { %1974 = vmatpush.msra.mxu0 %v3635_v36  ;;  %1994 = vmatpush.msra.mxu1 %v3856_v23  ;;  %v4484_v36 = vld [vmem:[#allocation59_spill] sm:$0xff] }
 0x3ed   :  { %2014 = vmatpush.msra.mxu2 %v3859_v34  ;;  %2034 = vmatpush.msrb.mxu3 %v3748_v0 }
 0x3ee   :  { %1975 = vmatpush.msra.mxu0 %v3641_v33  ;;  %1995 = vmatpush.msra.mxu1 %v3864_v62  ;;  %v4485_v33 = vld [vmem:[#allocation48_spill] sm:$0xff] }
 0x3ef   :  { %2015 = vmatpush.msra.mxu2 %v3867_v3  ;;  %2035 = vmatpush.msrb.mxu3 %v3754_v7 }
 0x3f0   :  { %1976 = vmatpush.msra.mxu0 %v3647_v2  ;;  %1996 = vmatpush.msra.mxu1 %v3872_v4  ;;  %v4486_v2 = vld [vmem:[#allocation86_spill] sm:$0xff] }
 0x3f1   :  { %2016 = vmatpush.msra.mxu2 %v3875_v6  ;;  %2036 = vmatpush.msrb.mxu3 %v3760_v8 }
 0x3f2   :  { %1977 = vmatpush.msra.mxu0 %v3653_v9  ;;  %1997 = vmatpush.msra.mxu1 %v3880_v43  ;;  %v4487_v9 = vld [vmem:[#allocation60_spill] sm:$0xff] }
 0x3f3   :  { %2017 = vmatpush.msra.mxu2 %v3883_v15  ;;  %2037 = vmatpush.msrb.mxu3 %v3766_v10 }
 0x3f4   :  { %1978 = vmatpush.msra.mxu0 %v3659_v12  ;;  %1998 = vmatpush.msra.mxu1 %v3888_v53  ;;  %v4488_v12 = vld [vmem:[#allocation61_spill] sm:$0xff] }
 0x3f5   :  { %2018 = vmatpush.msra.mxu2 %v3891_v42  ;;  %2038 = vmatpush.msrb.mxu3 %v3772_v11 }
 0x3f6   :  { %1979 = vmatpush.msra.mxu0 %v3665_v19  ;;  %1999 = vmatpush.msra.mxu1 %v3896_v61  ;;  %v4489_v19 = vld [vmem:[#allocation68_spill] sm:$0xff] }
 0x3f7   :  { %2019 = vmatpush.msra.mxu2 %v3899_v18  ;;  %2039 = vmatpush.msrb.mxu3 %v3778_v16 }
 0x3f8   :  { %1980 = vmatpush.msra.mxu0 %v3671_v24  ;;  %2000 = vmatpush.msra.mxu1 %v3904_v49  ;;  %v4490_v24 = vld [vmem:[#allocation87_spill] sm:$0xff] }
 0x3f9   :  { %2020 = vmatpush.msra.mxu2 %v3907_v28  ;;  %2040 = vmatpush.msrb.mxu3 %v3784_v17 }
 0x3fa   :  { %1981 = vmatpush.msra.mxu0 %v3677_v29  ;;  %2001 = vmatpush.msra.mxu1 %v3912_v58  ;;  %v4491_v29 = vld [vmem:[#allocation51_spill] sm:$0xff] }
 0x3fb   :  { %2021 = vmatpush.msra.mxu2 %v3915_v51  ;;  %2041 = vmatpush.msrb.mxu3 %v3790_v20 }
 0x3fc   :  { %1982 = vmatpush.msra.mxu0 %v3683_v39  ;;  %2002 = vmatpush.msra.mxu1 %v3920_v52  ;;  %v4492_v39 = vld [vmem:[#allocation71_spill] sm:$0xff] }
 0x3fd   :  { %2022 = vmatpush.msra.mxu2 %v3923_v5  ;;  %2042 = vmatpush.msrb.mxu3 %v3796_v1 }
 0x3fe   :  { %1983 = vmatpush.msra.mxu0 %v3689_v44  ;;  %2003 = vmatpush.msra.mxu1 %v3928_v40  ;;  %v4493_v44 = vld [vmem:[#allocation69_spill] sm:$0xff] }
 0x3ff   :  { %2023 = vmatpush.msra.mxu2 %v4484_v36  ;;  %2043 = vmatpush.msrb.mxu3 %v4485_v33 }
 0x400   :  { %1984 = vmatpush.msra.mxu0 %v4486_v2  ;;  %2004 = vmatpush.msra.mxu1 %v4487_v9 }
 0x401   :  { %2024 = vmatpush.msra.mxu2 %v4488_v12  ;;  %2044 = vmatpush.msrb.mxu3 %v4489_v19 }
 0x402   :  { %1985 = vmatpush.msra.mxu0 %v4490_v24  ;;  %2005 = vmatpush.msra.mxu1 %v4491_v29  ;;  %v4512_v24 = vld [vmem:[#allocation78_spill] sm:$0xff] }
 0x403   :  { %2025 = vmatpush.msra.mxu2 %v4492_v39  ;;  %2045 = vmatpush.msrb.mxu3 %v4493_v44 }
 0x404   :  { %1986 = vmatpush.msra.mxu0 %v4494_v26  ;;  %2006 = vmatpush.msra.mxu1 %v4495_v27 }
 0x405   :  { %2026 = vmatpush.msra.mxu2 %v4496_v22  ;;  %2046 = vmatpush.msrb.mxu3 %v4497_v55 }
 0x406   :  { %1987 = vmatpush.msra.mxu0 %v4498_v31  ;;  %2007 = vmatpush.msra.mxu1 %v4499_v47 }
 0x407   :  { %2027 = vmatpush.msra.mxu2 %v4500_v56  ;;  %2047 = vmatpush.msrb.mxu3 %v4501_v30 }
 0x408   :  { %1988 = vmatpush.msra.mxu0 %v4502_v21  ;;  %2008 = vmatpush.msra.mxu1 %v4503_v32 }
 0x409   :  { %2028 = vmatpush.msra.mxu2 %v4504_v41  ;;  %2048 = vmatpush.msrb.mxu3 %v4505_v38 }
 0x40a   :  { %1989 = vmatpush.msra.mxu0 %v4506_v57  ;;  %2009 = vmatpush.msra.mxu1 %v4507_v14 }
 0x40b   :  { %2029 = vmatpush.msra.mxu2 %v4508_v54  ;;  %2049 = vmatpush.msrb.mxu3 %v4509_v60 }
 0x467   :  { %v1687_v63 = vpop.f32.mrf.mxu0  ;;  %v1707_v46 = vpop.f32.mrf.mxu1 }
 0x468   :  { %v1750_v50 = vadd.f32 %v1687_v63, %v4510_v37  ;;  %v1751_v25 = vadd.f32 %v1707_v46, %v4511_v45  ;;  %v4513_v46 = vld [vmem:[#allocation67_spill] sm:$0xff] }
 0x46a   :  { %v2694_v13 = vmul.f32 -1.442695, %v1750_v50  ;;  %v2695_v59 = vmul.f32 -1.442695, %v1751_v25 }
 0x46c   :  { %2809 = vpow2.f32 %v2694_v13 }
 0x46d   :  { %2811 = vpow2.f32 %v2695_v59 }
 0x46e   :  { %v1727_v2 = vpop.f32.mrf.mxu2  ;;  %v1747_v60 = vpop.f32.mrf.mxu3 }
 0x46f   :  { %v1752_v26 = vadd.f32 %v1727_v2, %v4512_v24  ;;  %v1753_v50 = vadd.f32 %v1747_v60, %v4513_v46 }
 0x471   :  { %v2696_v31 = vmul.f32 -1.442695, %v1752_v26 }
 0x472   :  { %v2810_v21 = vpop.eup %2809 }
 0x473   :  { %v2812_v57 = vpop.eup %2811  ;;  %v1763_v48 = vadd.f32 1.0, %v2810_v21  ;;  %2813 = vpow2.f32 %v2696_v31 }
 0x474   :  { %v1764_v54 = vadd.f32 1.0, %v2812_v57 }
 0x475   :  { %2815 = vrcp.f32 %v1763_v48  ;;  %v1777_v24 = vand.u32 2147483648, %v1763_v48  ;;  %v1775_v31 = vand.u32 2147483647, %v1763_v48  ;;  %vm1771_vm2 = vweird.f32 %v1763_v48 }
 0x476   :  { %2817 = vrcp.f32 %v1764_v54  ;;  %v1792_v26 = vand.u32 2147483648, %v1764_v54  ;;  %v1790_v38 = vand.u32 2147483647, %v1764_v54  ;;  %vm1786_vm3 = vweird.f32 %v1764_v54 }
 0x477   :  { %v1778_v46 = vor.u32 1.1754944e-38, %v1777_v24  ;;  %vm1776_vm6 = vcmp.eq.f32.partialorder %v1775_v31, 8.507059e+37 }
 0x478   :  { %vm1791_vm7 = vcmp.eq.f32.partialorder %v1790_v38, 8.507059e+37 }
 0x479   :  { %v2814_v14 = vpop.eup %2813 }
 0x47a   :  { %v1765_v63 = vadd.f32 1.0, %v2814_v14 }
 0x47b   :  { %v2816_v37 = vpop.eup %2815 }
 0x47c   :  { %v2818_v45 = vpop.eup %2817  ;;  %v1767_v25 = vmul.f32 %v2816_v37, %v1763_v48  ;;  %2819 = vrcp.f32 %v1765_v63  ;;  %vm1772_vm0 = vweird.f32 %v2816_v37  ;;  %v1807_v24 = vand.u32 2147483648, %v1765_v63 }
 0x47d   :  { %v1782_v13 = vmul.f32 %v2818_v45, %v1764_v54  ;;  %2821 = vtanh.f32 %v1753_v50  ;;  %vm1787_vm1 = vweird.f32 %v2818_v45  ;;  %vm1773_vm4 = vmor %vm1771_vm2, %vm1772_vm0  ;;  %vm1801_vm9 = vweird.f32 %v1765_v63 }
 0x47e   :  { %v1768_v59 = vsub.f32 1.0, %v1767_v25  ;;  %vm1788_vm5 = vmor %vm1786_vm3, %vm1787_vm1  ;;  %v1793_v25 = vor.u32 1.1754944e-38, %v1792_v26  ;;  %v1808_v31 = vor.u32 1.1754944e-38, %v1807_v24 }
 0x47f   :  { %v1783_v2 = vsub.f32 1.0, %v1782_v13 }
 0x480   :  { %v1769_v21 = vmul.f32 %v2816_v37, %v1768_v59 }
 0x481   :  { %v1784_v57 = vmul.f32 %v2818_v45, %v1783_v2 }
 0x482   :  { %v2820_v41 = vpop.eup %2819  ;;  %v1770_v14 = vadd.f32 %v2816_v37, %v1769_v21 }
 0x483   :  { %v1797_v60 = vmul.f32 %v2820_v41, %v1765_v63  ;;  %v1785_v32 = vadd.f32 %v2818_v45, %v1784_v57  ;;  %v2822_v50 = vpop.eup %2821  ;;  %vm1802_vm8 = vweird.f32 %v2820_v41 }
 0x484   :  { %v1774_v13 = vsel %vm1773_vm4, %v2816_v37, %v1770_v14  ;;  %v1805_v37 = vand.u32 2147483647, %v1765_v63  ;;  %vm1803_vm10 = vmor %vm1801_vm9, %vm1802_vm8  ;;  %v4527_v14 = vld [vmem:[#allocation70_spill] sm:$0xff] }
 0x485   :  { %v1798_v30 = vsub.f32 1.0, %v1797_v60  ;;  %v1779_v59 = vsel %vm1776_vm6, %v1778_v46, %v1774_v13  ;;  %v1789_v56 = vsel %vm1788_vm5, %v2818_v45, %v1785_v32 }
 0x486   :  { %v1794_v2 = vsel %vm1791_vm7, %v1793_v25, %v1789_v56  ;;  %v1813_v47 = vmul.f32 %v2822_v50, %v1779_v59  ;;  %vm1806_vm11 = vcmp.eq.f32.partialorder %v1805_v37, 8.507059e+37 }
 0x487   :  { %v1799_v55 = vmul.f32 %v2820_v41, %v1798_v30  ;;  %v1812_v21 = vmul.f32 %v1794_v2, %v3988_v35  ;;  %v2957_v35 = vld [vmem:[#allocation10 + $0x1e0] sm:$0xff] }
 0x489   :  { %v4066_v48 = vadd.f32 %v1813_v47, %v1812_v21  ;;  %v1800_v54 = vadd.f32 %v2820_v41, %v1799_v55  ;;  %v2958_v55 = vld [vmem:[#allocation10 + $0x1c0] sm:$0xff] }
 0x48a   :  { %v2959_v47 = vld [vmem:[#allocation10 + $0x1a0] sm:$0xff] }
 0x48b   :  { %2823 = vtanh.f32 %v4066_v48  ;;  %v1804_v26 = vsel %vm1803_vm10, %v2820_v41, %v1800_v54 }
 0x48c   :  { %v1809_v38 = vsel %vm1806_vm11, %v1808_v31, %v1804_v26 }
 0x491   :  { %v2824_v32 = vpop.eup %2823 }
 0x492   :  { %v4069_v56 = vmul.f32 %v2824_v32, %v1809_v38 }
 0x494   :  { %1838 = vmatmul.f32.vlgmr.msrb.gmra.mxu0 %v4069_v56  ;;  %1858 = vmatmul.f32.vlgmr.msrb.gmra.mxu1 %v4069_v56 }
 0x495   :  { %1878 = vmatmul.f32.vlgmr.msrb.gmra.mxu2 %v4069_v56  ;;  %1898 = vmatmul.f32.vlgmr.msra.gmra.mxu3 %v4069_v56 }
 0x496   :  { %2126 = vmatpush.msrb.mxu0 %v2957_v35  ;;  %2146 = vmatpush.msrb.mxu1 %v3856_v23  ;;  %v2960_v23 = vld [vmem:[#allocation10 + $0x180] sm:$0xff] }
 0x497   :  { %2166 = vmatpush.msrb.mxu2 %v3859_v34  ;;  %2186 = vmatpush.msra.mxu3 %v3748_v0  ;;  %v2961_v0 = vld [vmem:[#allocation10 + $0x160] sm:$0xff]  ;;  %v4514_v34 = vld [vmem:[#allocation50_spill] sm:$0xff] }
 0x498   :  { %2127 = vmatpush.msrb.mxu0 %v2958_v55  ;;  %2147 = vmatpush.msrb.mxu1 %v3864_v62  ;;  %v2970_v62 = vld [vmem:[#allocation10 + $0x40] sm:$0xff] }
 0x499   :  { %2167 = vmatpush.msrb.mxu2 %v3867_v3  ;;  %2187 = vmatpush.msra.mxu3 %v3754_v7  ;;  %v2962_v7 = vld [vmem:[#allocation10 + $0x140] sm:$0xff]  ;;  %v4515_v3 = vld [vmem:[#allocation90_spill] sm:$0xff] }
 0x49a   :  { %2128 = vmatpush.msrb.mxu0 %v2959_v47  ;;  %2148 = vmatpush.msrb.mxu1 %v3872_v4  ;;  %v4516_v4 = vld [vmem:[#allocation91_spill] sm:$0xff] }
 0x49b   :  { %2168 = vmatpush.msrb.mxu2 %v3875_v6  ;;  %2188 = vmatpush.msra.mxu3 %v3760_v8  ;;  %v2963_v8 = vld [vmem:[#allocation10 + $0x120] sm:$0xff] }
 0x49c   :  { %2129 = vmatpush.msrb.mxu0 %v2960_v23  ;;  %2149 = vmatpush.msrb.mxu1 %v3880_v43  ;;  %v4517_v6 = vld [vmem:[#allocation55_spill] sm:$0xff] }
 0x49d   :  { %2169 = vmatpush.msrb.mxu2 %v3883_v15  ;;  %2189 = vmatpush.msra.mxu3 %v3766_v10  ;;  %v2964_v10 = vld [vmem:[#allocation10 + $0x100] sm:$0xff]  ;;  %v4518_v15 = vld [vmem:[#allocation92_spill] sm:$0xff] }
 0x49e   :  { %2130 = vmatpush.msrb.mxu0 %v2961_v0  ;;  %2150 = vmatpush.msrb.mxu1 %v3888_v53  ;;  %v2971_v43 = vld [vmem:[#allocation10 + $0x20] sm:$0xff]  ;;  %v4519_v53 = vld [vmem:[#allocation93_spill] sm:$0xff] }
 0x49f   :  { %2170 = vmatpush.msrb.mxu2 %v3891_v42  ;;  %2190 = vmatpush.msra.mxu3 %v3772_v11  ;;  %v2965_v11 = vld [vmem:[#allocation10 + $0xe0] sm:$0xff]  ;;  %v4520_v42 = vld [vmem:[#allocation56_spill] sm:$0xff] }
 0x4a0   :  { %2131 = vmatpush.msrb.mxu0 %v2962_v7  ;;  %2151 = vmatpush.msrb.mxu1 %v3896_v61  ;;  %v2972_v61 = vld [vmem:[#allocation10] sm:$0xff] }
 0x4a1   :  { %2171 = vmatpush.msrb.mxu2 %v3899_v18  ;;  %2191 = vmatpush.msra.mxu3 %v3778_v16  ;;  %v2966_v16 = vld [vmem:[#allocation10 + $0xc0] sm:$0xff]  ;;  %v4521_v18 = vld [vmem:[#allocation94_spill] sm:$0xff] }
 0x4a2   :  { %2132 = vmatpush.msrb.mxu0 %v2963_v8  ;;  %2152 = vmatpush.msrb.mxu1 %v3904_v49  ;;  %v4522_v49 = vld [vmem:[#allocation95_spill] sm:$0xff] }
 0x4a3   :  { %2172 = vmatpush.msrb.mxu2 %v3907_v28  ;;  %2192 = vmatpush.msra.mxu3 %v3784_v17  ;;  %v2967_v17 = vld [vmem:[#allocation10 + $0xa0] sm:$0xff]  ;;  %v4523_v28 = vld [vmem:[#allocation57_spill] sm:$0xff] }
 0x4a4   :  { %2133 = vmatpush.msrb.mxu0 %v2964_v10  ;;  %2153 = vmatpush.msrb.mxu1 %v3912_v58 }
 0x4a5   :  { %2173 = vmatpush.msrb.mxu2 %v3915_v51  ;;  %2193 = vmatpush.msra.mxu3 %v3790_v20  ;;  %v2968_v20 = vld [vmem:[#allocation10 + $0x80] sm:$0xff] }
 0x4a6   :  { %2134 = vmatpush.msrb.mxu0 %v2965_v11  ;;  %2154 = vmatpush.msrb.mxu1 %v3920_v52  ;;  %v4524_v52 = vld [vmem:[#allocation49_spill] sm:$0xff] }
 0x4a7   :  { %2174 = vmatpush.msrb.mxu2 %v3923_v5  ;;  %2194 = vmatpush.msra.mxu3 %v3796_v1  ;;  %v2969_v1 = vld [vmem:[#allocation10 + $0x60] sm:$0xff] }
 0x4a8   :  { %2135 = vmatpush.msrb.mxu0 %v2966_v16  ;;  %2155 = vmatpush.msrb.mxu1 %v3928_v40  ;;  %v4525_v40 = vld [vmem:[#allocation79_spill] sm:$0xff] }
 0x4a9   :  { %2175 = vmatpush.msrb.mxu2 %v4484_v36  ;;  %2195 = vmatpush.msra.mxu3 %v4485_v33 }
 0x4aa   :  { %2136 = vmatpush.msrb.mxu0 %v2967_v17  ;;  %2156 = vmatpush.msrb.mxu1 %v4487_v9 }
 0x4ab   :  { %2176 = vmatpush.msrb.mxu2 %v4488_v12  ;;  %2196 = vmatpush.msra.mxu3 %v4489_v19  ;;  %v4526_v19 = vld [vmem:[#allocation80_spill] sm:$0xff] }
 0x4ac   :  { %2137 = vmatpush.msrb.mxu0 %v2968_v20  ;;  %2157 = vmatpush.msrb.mxu1 %v4491_v29 }
 0x4ad   :  { %2177 = vmatpush.msrb.mxu2 %v4492_v39  ;;  %2197 = vmatpush.msra.mxu3 %v4493_v44 }
 0x4ae   :  { %2138 = vmatpush.msrb.mxu0 %v2969_v1  ;;  %2158 = vmatpush.msrb.mxu1 %v4495_v27 }
 0x4af   :  { %2178 = vmatpush.msrb.mxu2 %v4496_v22  ;;  %2198 = vmatpush.msra.mxu3 %v4514_v34 }
 0x4b0   :  { %2139 = vmatpush.msrb.mxu0 %v2970_v62  ;;  %2159 = vmatpush.msrb.mxu1 %v4515_v3 }
 0x4b1   :  { %2179 = vmatpush.msrb.mxu2 %v4516_v4  ;;  %2199 = vmatpush.msra.mxu3 %v4517_v6 }
 0x4b2   :  { %2140 = vmatpush.msrb.mxu0 %v2971_v43  ;;  %2160 = vmatpush.msrb.mxu1 %v4518_v15 }
 0x4b3   :  { %2180 = vmatpush.msrb.mxu2 %v4519_v53  ;;  %2200 = vmatpush.msra.mxu3 %v4520_v42  ;;  %v2296_v42 = vld [vmem:[%s4292_s5 + $0x70] sm:$0xff] }
 0x4b4   :  { %2141 = vmatpush.msrb.mxu0 %v2972_v61  ;;  %2161 = vmatpush.msrb.mxu1 %v4521_v18  ;;  %v2295_v61 = vld [vmem:[%s4292_s5 + $0x68] sm:$0xff]  ;;  %v2294_v18 = vld [vmem:[%s4292_s5 + $0x60] sm:$0xff] }
 0x4b5   :  { %2181 = vmatpush.msrb.mxu2 %v4522_v49  ;;  %2201 = vmatpush.msra.mxu3 %v4523_v28  ;;  %v2293_v49 = vld [vmem:[%s4292_s5 + $0x58] sm:$0xff] }
 0x511   :  { %v1839_v58 = vpop.f32.mrf.mxu0  ;;  %v1859_v51 = vpop.f32.mrf.mxu1 }
 0x512   :  { %v1902_v5 = vadd.f32 %v1839_v58, %v4524_v52  ;;  %v1903_v36 = vadd.f32 %v1859_v51, %v4525_v40  ;;  %v2292_v51 = vld [vmem:[%s4292_s5 + $0x50] sm:$0xff]  ;;  %v4528_v52 = vld [vmem:[#allocation62_spill] sm:$0xff] }
 0x513   :  { %v4529_v40 = vld [vmem:[#allocation81_spill] sm:$0xff] }
 0x514   :  { %v2697_v33 = vmul.f32 -1.442695, %v1902_v5  ;;  %v2698_v9 = vmul.f32 -1.442695, %v1903_v36 }
 0x516   :  { %2825 = vpow2.f32 %v2697_v33  ;;  %v2291_v33 = vld [vmem:[%s4292_s5 + $0x48] sm:$0xff] }
 0x517   :  { %2827 = vpow2.f32 %v2698_v9 }
 0x518   :  { %v1879_v12 = vpop.f32.mrf.mxu2  ;;  %v1899_v41 = vpop.f32.mrf.mxu3 }
 0x519   :  { %v1904_v29 = vadd.f32 %v1879_v12, %v4526_v19  ;;  %v1905_v60 = vadd.f32 %v1899_v41, %v4527_v14  ;;  %v2290_v19 = vld [vmem:[%s4292_s5 + $0x40] sm:$0xff] }
 0x51b   :  { %v2699_v39 = vmul.f32 -1.442695, %v1904_v29  ;;  %v2289_v29 = vld [vmem:[%s4292_s5 + $0x38] sm:$0xff] }
 0x51c   :  { %v2826_v44 = vpop.eup %2825 }
 0x51d   :  { %v2828_v27 = vpop.eup %2827  ;;  %v1915_v22 = vadd.f32 1.0, %v2826_v44  ;;  %2829 = vpow2.f32 %v2699_v39  ;;  %v2288_v39 = vld [vmem:[%s4292_s5 + $0x30] sm:$0xff] }
 0x51e   :  { %v1916_v30 = vadd.f32 1.0, %v2828_v27  ;;  %v4530_v27 = vld [vmem:[#allocation82_spill] sm:$0xff] }
 0x51f   :  { %2831 = vrcp.f32 %v1915_v22  ;;  %v1929_v2 = vand.u32 2147483648, %v1915_v22  ;;  %v1927_v24 = vand.u32 2147483647, %v1915_v22  ;;  %vm1923_vm14 = vweird.f32 %v1915_v22 }
 0x520   :  { %2833 = vrcp.f32 %v1916_v30  ;;  %v1944_v21 = vand.u32 2147483648, %v1916_v30  ;;  %v1942_v26 = vand.u32 2147483647, %v1916_v30  ;;  %vm1938_vm15 = vweird.f32 %v1916_v30 }
 0x521   :  { %v1930_v35 = vor.u32 1.1754944e-38, %v1929_v2  ;;  %vm1928_vm2 = vcmp.eq.f32.partialorder %v1927_v24, 8.507059e+37  ;;  %v2282_v2 = vld [vmem:[%s4292_s5] sm:$0xff]  ;;  %v4531_v24 = vld [vmem:[#allocation73_spill] sm:$0xff] }
 0x522   :  { %v1945_v47 = vor.u32 1.1754944e-38, %v1944_v21  ;;  %vm1943_vm3 = vcmp.eq.f32.partialorder %v1942_v26, 8.507059e+37 }
 0x523   :  { %v2830_v63 = vpop.eup %2829 }
 0x524   :  { %v1917_v45 = vadd.f32 1.0, %v2830_v63  ;;  %v2286_v63 = vld [vmem:[%s4292_s5 + $0x20] sm:$0xff] }
 0x525   :  { %v2832_v57 = vpop.eup %2831 }
 0x526   :  { %v2834_v46 = vpop.eup %2833  ;;  %v1919_v25 = vmul.f32 %v2832_v57, %v1915_v22  ;;  %2835 = vrcp.f32 %v1917_v45  ;;  %vm1924_vm12 = vweird.f32 %v2832_v57  ;;  %v1959_v62 = vand.u32 2147483648, %v1917_v45 }
 0x527   :  { %v1934_v13 = vmul.f32 %v2834_v46, %v1916_v30  ;;  %2837 = vtanh.f32 %v1905_v60  ;;  %vm1939_vm13 = vweird.f32 %v2834_v46  ;;  %vm1925_vm0 = vmor %vm1923_vm14, %vm1924_vm12  ;;  %vm1953_vm5 = vweird.f32 %v1917_v45  ;;  %v2287_v30 = vld [vmem:[%s4292_s5 + $0x28] sm:$0xff] }
 0x528   :  { %v1920_v50 = vsub.f32 1.0, %v1919_v25  ;;  %vm1940_vm1 = vmor %vm1938_vm15, %vm1939_vm13  ;;  %v1957_v3 = vand.u32 2147483647, %v1917_v45  ;;  %v1960_v6 = vor.u32 1.1754944e-38, %v1959_v62  ;;  %v2284_v25 = vld [vmem:[%s4292_s5 + $0x10] sm:$0xff] }
 0x529   :  { %v1935_v59 = vsub.f32 1.0, %v1934_v13  ;;  %v2283_v13 = vld [vmem:[%s4292_s5 + $0x8] sm:$0xff] }
 0x52a   :  { %v1921_v54 = vmul.f32 %v2832_v57, %v1920_v50  ;;  %vm1958_vm7 = vcmp.eq.f32.partialorder %v1957_v3, 8.507059e+37 }
 0x52b   :  { %v1936_v37 = vmul.f32 %v2834_v46, %v1935_v59 }
 0x52c   :  { %v2836_v31 = vpop.eup %2835  ;;  %v1922_v32 = vadd.f32 %v2832_v57, %v1921_v54 }
 0x52d   :  { %v1949_v38 = vmul.f32 %v2836_v31, %v1917_v45  ;;  %v1937_v55 = vadd.f32 %v2834_v46, %v1936_v37  ;;  %v2838_v0 = vpop.eup %2837  ;;  %vm1954_vm4 = vweird.f32 %v2836_v31 }
 0x52e   :  { %v1926_v23 = vsel %vm1925_vm0, %v2832_v57, %v1922_v32  ;;  %vm1955_vm6 = vmor %vm1953_vm5, %vm1954_vm4 }
 0x52f   :  { %v1950_v7 = vsub.f32 1.0, %v1949_v38  ;;  %v1931_v8 = vsel %vm1928_vm2, %v1930_v35, %v1926_v23  ;;  %v1941_v10 = vsel %vm1940_vm1, %v2834_v46, %v1937_v55  ;;  %v2285_v46 = vld [vmem:[%s4292_s5 + $0x18] sm:$0xff] }
 0x530   :  { %v1946_v11 = vsel %vm1943_vm3, %v1945_v47, %v1941_v10  ;;  %v1965_v16 = vmul.f32 %v2838_v0, %v1931_v8 }
 0x531   :  { %v1951_v17 = vmul.f32 %v2836_v31, %v1950_v7  ;;  %v1964_v20 = vmul.f32 %v1946_v11, %v4066_v48  ;;  %v2297_v48 = vld [vmem:[%s4292_s5 + $0x78] sm:$0xff] }
 0x533   :  { %v4128_v1 = vadd.f32 %v1965_v16, %v1964_v20  ;;  %v1952_v34 = vadd.f32 %v2836_v31, %v1951_v17 }
 0x535   :  { %2839 = vtanh.f32 %v4128_v1  ;;  %v1956_v4 = vsel %vm1955_vm6, %v2836_v31, %v1952_v34 }
 0x536   :  { %v1961_v15 = vsel %vm1958_vm7, %v1960_v6, %v1956_v4 }
 0x53b   :  { %v2840_v43 = vpop.eup %2839 }
 0x53c   :  { %v4131_v53 = vmul.f32 %v2840_v43, %v1961_v15 }
 0x53e   :  { %1990 = vmatmul.f32.vlgmr.msra.gmra.mxu0 %v4131_v53  ;;  %2010 = vmatmul.f32.vlgmr.msra.gmra.mxu1 %v4131_v53 }
 0x53f   :  { %2030 = vmatmul.f32.vlgmr.msra.gmra.mxu2 %v4131_v53  ;;  %2050 = vmatmul.f32.vlgmr.msrb.gmra.mxu3 %v4131_v53 }
 0x540   :  { %2302 = vmatpush.msra.mxu0 %v2297_v48 }
 0x542   :  { %2303 = vmatpush.msra.mxu0 %v2296_v42 }
 0x544   :  { %2304 = vmatpush.msra.mxu0 %v2295_v61 }
 0x546   :  { %2305 = vmatpush.msra.mxu0 %v2294_v18 }
 0x548   :  { %2306 = vmatpush.msra.mxu0 %v2293_v49 }
 0x54a   :  { %2307 = vmatpush.msra.mxu0 %v2292_v51 }
 0x54c   :  { %2308 = vmatpush.msra.mxu0 %v2291_v33  ;;  %v4533_v33 = vld [vmem:[#allocation54_spill] sm:$0xff] }
 0x54e   :  { %2309 = vmatpush.msra.mxu0 %v2290_v19 }
 0x550   :  { %2310 = vmatpush.msra.mxu0 %v2289_v29 }
 0x552   :  { %2311 = vmatpush.msra.mxu0 %v2288_v39  ;;  %v4536_v39 = vld [vmem:[#allocation65_spill] sm:$0xff] }
 0x554   :  { %2312 = vmatpush.msra.mxu0 %v2287_v30 }
 0x556   :  { %2313 = vmatpush.msra.mxu0 %v2286_v63 }
 0x558   :  { %2314 = vmatpush.msra.mxu0 %v2285_v46 }
 0x55a   :  { %2315 = vmatpush.msra.mxu0 %v2284_v25 }
 0x55c   :  { %2316 = vmatpush.msra.mxu0 %v2283_v13 }
 0x55e   :  { %2317 = vmatpush.msra.mxu0 %v2282_v2  ;;  %v4539_v2 = vld [vmem:[#allocation76_spill] sm:$0xff] }
 0x5bb   :  { %v1991_v28 = vpop.f32.mrf.mxu0  ;;  %v2011_v58 = vpop.f32.mrf.mxu1 }
 0x5bc   :  { %v2054_v5 = vadd.f32 %v1991_v28, %v4528_v52  ;;  %v2055_v36 = vadd.f32 %v2011_v58, %v4529_v40 }
 0x5be   :  { %v2700_v9 = vmul.f32 -1.442695, %v2054_v5  ;;  %v2701_v12 = vmul.f32 -1.442695, %v2055_v36 }
 0x5c0   :  { %2841 = vpow2.f32 %v2700_v9  ;;  %v4534_v9 = vld [vmem:[#allocation58_spill] sm:$0xff] }
 0x5c1   :  { %2843 = vpow2.f32 %v2701_v12  ;;  %v4535_v12 = vld [vmem:[#allocation64_spill] sm:$0xff] }
 0x5c2   :  { %v2031_v44 = vpop.f32.mrf.mxu2  ;;  %v2051_v50 = vpop.f32.mrf.mxu3 }
 0x5c3   :  { %v2056_v22 = vadd.f32 %v2031_v44, %v4530_v27  ;;  %v2057_v37 = vadd.f32 %v2051_v50, %v4531_v24  ;;  %v4537_v27 = vld [vmem:[#allocation83_spill] sm:$0xff] }
 0x5c5   :  { %v2702_v41 = vmul.f32 -1.442695, %v2056_v22 }
 0x5c6   :  { %v2842_v45 = vpop.eup %2841 }
 0x5c7   :  { %v2844_v57 = vpop.eup %2843  ;;  %v2067_v14 = vadd.f32 1.0, %v2842_v45  ;;  %2845 = vpow2.f32 %v2702_v41  ;;  %v4538_v45 = vld [vmem:[#allocation84_spill] sm:$0xff] }
 0x5c8   :  { %v2068_v60 = vadd.f32 1.0, %v2844_v57 }
 0x5c9   :  { %2847 = vrcp.f32 %v2067_v14  ;;  %v2081_v55 = vand.u32 2147483648, %v2067_v14  ;;  %v2079_v0 = vand.u32 2147483647, %v2067_v14  ;;  %vm2075_vm10 = vweird.f32 %v2067_v14 }
 0x5ca   :  { %2849 = vrcp.f32 %v2068_v60  ;;  %v2096_v47 = vand.u32 2147483648, %v2068_v60  ;;  %v2094_v8 = vand.u32 2147483647, %v2068_v60  ;;  %vm2090_vm11 = vweird.f32 %v2068_v60 }
 0x5cb   :  { %v2082_v17 = vor.u32 1.1754944e-38, %v2081_v55  ;;  %vm2080_vm14 = vcmp.eq.f32.partialorder %v2079_v0, 8.507059e+37 }
 0x5cc   :  { %v2097_v34 = vor.u32 1.1754944e-38, %v2096_v47  ;;  %vm2095_vm15 = vcmp.eq.f32.partialorder %v2094_v8, 8.507059e+37 }
 0x5cd   :  { %v2846_v59 = vpop.eup %2845 }
 0x5ce   :  { %v2069_v21 = vadd.f32 1.0, %v2846_v59 }
 0x5cf   :  { %v2848_v54 = vpop.eup %2847 }
 0x5d0   :  { %v2850_v26 = vpop.eup %2849  ;;  %v2071_v31 = vmul.f32 %v2848_v54, %v2067_v14  ;;  %2851 = vrcp.f32 %v2069_v21  ;;  %vm2076_vm8 = vweird.f32 %v2848_v54  ;;  %v2111_v28 = vand.u32 2147483648, %v2069_v21 }
 0x5d1   :  { %v2086_v32 = vmul.f32 %v2850_v26, %v2068_v60  ;;  %2853 = vtanh.f32 %v2057_v37  ;;  %vm2091_vm9 = vweird.f32 %v2850_v26  ;;  %vm2077_vm12 = vmor %vm2075_vm10, %vm2076_vm8  ;;  %vm2105_vm1 = vweird.f32 %v2069_v21 }
 0x5d2   :  { %v2072_v38 = vsub.f32 1.0, %v2071_v31  ;;  %vm2092_vm13 = vmor %vm2090_vm11, %vm2091_vm9  ;;  %v2109_v58 = vand.u32 2147483647, %v2069_v21  ;;  %v2112_v52 = vor.u32 1.1754944e-38, %v2111_v28 }
 0x5d3   :  { %v2087_v35 = vsub.f32 1.0, %v2086_v32 }
 0x5d4   :  { %v2073_v23 = vmul.f32 %v2848_v54, %v2072_v38  ;;  %vm2110_vm3 = vcmp.eq.f32.partialorder %v2109_v58, 8.507059e+37 }
 0x5d5   :  { %v2088_v7 = vmul.f32 %v2850_v26, %v2087_v35 }
 0x5d6   :  { %v2852_v10 = vpop.eup %2851  ;;  %v2074_v11 = vadd.f32 %v2848_v54, %v2073_v23 }
 0x5d7   :  { %v2101_v16 = vmul.f32 %v2852_v10, %v2069_v21  ;;  %v2089_v20 = vadd.f32 %v2850_v26, %v2088_v7  ;;  %v2854_v3 = vpop.eup %2853  ;;  %vm2106_vm0 = vweird.f32 %v2852_v10 }
 0x5d8   :  { %v2078_v62 = vsel %vm2077_vm12, %v2848_v54, %v2074_v11  ;;  %vm2107_vm2 = vmor %vm2105_vm1, %vm2106_vm0 }
 0x5d9   :  { %v2102_v4 = vsub.f32 1.0, %v2101_v16  ;;  %v2083_v6 = vsel %vm2080_vm14, %v2082_v17, %v2078_v62  ;;  %v2093_v43 = vsel %vm2092_vm13, %v2850_v26, %v2089_v20 }
 0x5da   :  { %v2098_v15 = vsel %vm2095_vm15, %v2097_v34, %v2093_v43  ;;  %v2117_v48 = vmul.f32 %v2854_v3, %v2083_v6 }
 0x5db   :  { %v2103_v42 = vmul.f32 %v2852_v10, %v2102_v4  ;;  %v2116_v61 = vmul.f32 %v2098_v15, %v4128_v1  ;;  %v4532_v1 = vld [vmem:[#allocation85_spill] sm:$0xff] }
 0x5dd   :  { %v4190_v18 = vadd.f32 %v2117_v48, %v2116_v61  ;;  %v2104_v49 = vadd.f32 %v2852_v10, %v2103_v42 }
 0x5df   :  { %2855 = vtanh.f32 %v4190_v18  ;;  %v2108_v51 = vsel %vm2107_vm2, %v2852_v10, %v2104_v49 }
 0x5e0   :  { %v2113_v40 = vsel %vm2110_vm3, %v2112_v52, %v2108_v51 }
 0x5e5   :  { %v2856_v5 = vpop.eup %2855 }
 0x5e6   :  { %v2120_v36 = vmul.f32 %v2856_v5, %v2113_v40 }
 0x5e8   :  { %2142 = vmatmul.f32.vlgmr.msrb.gmra.mxu0 %v2120_v36  ;;  %2162 = vmatmul.f32.vlgmr.msrb.gmra.mxu1 %v2120_v36 }
 0x5e9   :  { %2182 = vmatmul.f32.vlgmr.msrb.gmra.mxu2 %v2120_v36  ;;  %2202 = vmatmul.f32.vlgmr.msra.gmra.mxu3 %v2120_v36 }
 0x5f0   :  { %2318 = vmatmul.f32.vlgmr.msra.gmra.mxu0 %v4532_v1 }
 0x5f8   :  { %2321 = vmatmul.f32.gmra.mxu0 %v4533_v33 }
 0x600   :  { %2324 = vmatmul.f32.gmra.mxu0 %v4534_v9  ;;  %v2744_v9 = vld [vmem:[%s4293_s6] ss:$0 sm:$0xff] }
 0x608   :  { %2327 = vmatmul.f32.gmra.mxu0 %v4535_v12 }
 0x610   :  { %2330 = vmatmul.f32.gmra.mxu0 %v4069_v56 }
 0x618   :  { %2333 = vmatmul.f32.gmra.mxu0 %v4131_v53 }
 0x620   :  { %2336 = vmatmul.f32.gmra.mxu0 %v2120_v36 }
 0x665   :  { %v2143_v19 = vpop.f32.mrf.mxu0  ;;  %v2163_v29 = vpop.f32.mrf.mxu1 }
 0x666   :  { %v2206_v44 = vadd.f32 %v2143_v19, %v4536_v39  ;;  %v2207_v22 = vadd.f32 %v2163_v29, %v4537_v27 }
 0x668   :  { %v2703_v30 = vmul.f32 -1.442695, %v2206_v44  ;;  %v2704_v41 = vmul.f32 -1.442695, %v2207_v22 }
 0x66a   :  { %2857 = vpow2.f32 %v2703_v30 }
 0x66b   :  { %2859 = vpow2.f32 %v2704_v41 }
 0x66c   :  { %v2183_v63 = vpop.f32.mrf.mxu2  ;;  %v2203_v25 = vpop.f32.mrf.mxu3 }
 0x66d   :  { %v2208_v57 = vadd.f32 %v2183_v63, %v4538_v45  ;;  %v2209_v21 = vadd.f32 %v2203_v25, %v4539_v2  ;;  %v2319_v40 = vpop.f32.mrf.mxu0 }
 0x66e   :  { %v2320_v29 = vadd.f32 %v2744_v9, %v2319_v40 }
 0x66f   :  { %v2705_v14 = vmul.f32 -1.442695, %v2208_v57 }
 0x670   :  { %v2858_v60 = vpop.eup %2857  ;;  %v4209_v22 = vmax.f32 %v2320_v29, 0.0 }
 0x671   :  { %v2860_v46 = vpop.eup %2859  ;;  %v2219_v56 = vadd.f32 1.0, %v2858_v60  ;;  %2861 = vpow2.f32 %v2705_v14 }
 0x672   :  { %v2220_v53 = vadd.f32 1.0, %v2860_v46  ;;  %vm2358_vm0 = vcmp.eq.f32.partialorder %v4209_v22, inf  ;;  %vm2360_vm2 = vcmp.eq.f32.partialorder %v4209_v22, 0.0  ;;  %v2361_v29 = vand.u32 2147483648, %v4209_v22 }
 0x673   :  { %2863 = vrcp.f32 %v2219_v56  ;;  %v2233_v32 = vand.u32 2147483648, %v2219_v56  ;;  %v2231_v55 = vand.u32 2147483647, %v2219_v56  ;;  %vm2227_vm6 = vweird.f32 %v2219_v56 }
 0x674   :  { %2865 = vrcp.f32 %v2220_v53  ;;  %v2248_v38 = vand.u32 2147483648, %v2220_v53  ;;  %v2246_v23 = vand.u32 2147483647, %v2220_v53  ;;  %vm2242_vm7 = vweird.f32 %v2220_v53 }
 0x675   :  { %v2234_v8 = vor.u32 1.1754944e-38, %v2233_v32  ;;  %vm2232_vm9 = vcmp.eq.f32.partialorder %v2231_v55, 8.507059e+37  ;;  %v2322_v36 = vpop.f32.mrf.mxu0 }
 0x676   :  { %v2249_v16 = vor.u32 1.1754944e-38, %v2248_v38  ;;  %vm2247_vm11 = vcmp.eq.f32.partialorder %v2246_v23, 8.507059e+37  ;;  %v2323_v19 = vadd.f32 %v2744_v9, %v2322_v36 }
 0x677   :  { %v2862_v13 = vpop.eup %2861 }
 0x678   :  { %v2221_v50 = vadd.f32 1.0, %v2862_v13  ;;  %v4207_v44 = vmax.f32 %v2323_v19, 0.0 }
 0x679   :  { %v2864_v59 = vpop.eup %2863 }
 0x67a   :  { %v2866_v54 = vpop.eup %2865  ;;  %v2223_v24 = vmul.f32 %v2864_v59, %v2219_v56  ;;  %2867 = vrcp.f32 %v2221_v50  ;;  %vm2228_vm4 = vweird.f32 %v2864_v59  ;;  %v2263_v61 = vand.u32 2147483648, %v2221_v50 }
 0x67b   :  { %v2238_v37 = vmul.f32 %v2866_v54, %v2220_v53  ;;  %2869 = vtanh.f32 %v2209_v21  ;;  %vm2243_vm5 = vweird.f32 %v2866_v54  ;;  %vm2229_vm8 = vmor %vm2227_vm6, %vm2228_vm4  ;;  %vm2257_vm13 = vweird.f32 %v2221_v50 }
 0x67c   :  { %v2224_v26 = vsub.f32 1.0, %v2223_v24  ;;  %vm2244_vm10 = vmor %vm2242_vm7, %vm2243_vm5  ;;  %v2261_v49 = vand.u32 2147483647, %v2221_v50  ;;  %v2264_v58 = vor.u32 1.1754944e-38, %v2263_v61  ;;  %vm2370_vm1 = vcmp.eq.f32.partialorder %v4207_v44, inf }
 0x67d   :  { %v2239_v31 = vsub.f32 1.0, %v2238_v37  ;;  %v2325_v1 = vpop.f32.mrf.mxu0  ;;  %vm2372_vm4 = vcmp.eq.f32.partialorder %v4207_v44, 0.0 }
 0x67e   :  { %v2225_v35 = vmul.f32 %v2864_v59, %v2224_v26  ;;  %vm2262_vm15 = vcmp.eq.f32.partialorder %v2261_v49, 8.507059e+37  ;;  %v2326_v39 = vadd.f32 %v2744_v9, %v2325_v1 }
 0x67f   :  { %v2240_v47 = vmul.f32 %v2866_v54, %v2239_v31 }
 0x680   :  { %v2868_v0 = vpop.eup %2867  ;;  %v2226_v7 = vadd.f32 %v2864_v59, %v2225_v35  ;;  %v4211_v30 = vmax.f32 %v2326_v39, 0.0  ;;  %v2373_v39 = vand.u32 2147483648, %v4207_v44 }
 0x681   :  { %v2241_v10 = vadd.f32 %v2866_v54, %v2240_v47  ;;  %v2253_v11 = vmul.f32 %v2868_v0, %v2221_v50  ;;  %v2870_v20 = vpop.eup %2869  ;;  %vm2258_vm12 = vweird.f32 %v2868_v0 }
 0x682   :  { %v2230_v17 = vsel %vm2229_vm8, %v2864_v59, %v2226_v7  ;;  %vm2259_vm14 = vmor %vm2257_vm13, %vm2258_vm12  ;;  %vm2382_vm3 = vcmp.eq.f32.partialorder %v4211_v30, inf  ;;  %vm2384_vm5 = vcmp.eq.f32.partialorder %v4211_v30, 0.0 }
 0x683   :  { %v2235_v34 = vsel %vm2232_vm9, %v2234_v8, %v2230_v17  ;;  %v2245_v62 = vsel %vm2244_vm10, %v2866_v54, %v2241_v10  ;;  %v2254_v3 = vsub.f32 1.0, %v2253_v11 }
 0x684   :  { %v2269_v4 = vmul.f32 %v2870_v20, %v2235_v34  ;;  %v2250_v6 = vsel %vm2247_vm11, %v2249_v16, %v2245_v62 }
 0x685   :  { %v2255_v43 = vmul.f32 %v2868_v0, %v2254_v3  ;;  %v2268_v15 = vmul.f32 %v2250_v6, %v4190_v18  ;;  %v2328_v33 = vpop.f32.mrf.mxu0 }
 0x686   :  { %v2329_v27 = vadd.f32 %v2744_v9, %v2328_v33 }
 0x687   :  { %v2270_v48 = vadd.f32 %v2269_v4, %v2268_v15  ;;  %v2256_v42 = vadd.f32 %v2868_v0, %v2255_v43 }
 0x688   :  { %v4214_v45 = vmax.f32 %v2329_v27, 0.0 }
 0x689   :  { %2871 = vtanh.f32 %v2270_v48  ;;  %v2260_v28 = vsel %vm2259_vm14, %v2868_v0, %v2256_v42 }
 0x68a   :  { %v2265_v52 = vsel %vm2262_vm15, %v2264_v58, %v2260_v28  ;;  %2873 = vrsqrt.f32 %v4207_v44  ;;  %vm2394_vm6 = vcmp.eq.f32.partialorder %v4214_v45, inf  ;;  %vm2396_vm7 = vcmp.eq.f32.partialorder %v4214_v45, 0.0 }
 0x68b   :  { %2875 = vrsqrt.f32 %v4209_v22 }
 0x68c   :  { %2877 = vrsqrt.f32 %v4211_v30 }
 0x68d   :  { %v2331_v18 = vpop.f32.mrf.mxu0  ;;  %2879 = vrsqrt.f32 %v4214_v45 }
 0x68e   :  { %v2332_v41 = vadd.f32 %v2744_v9, %v2331_v18 }
 0x68f   :  { %v2872_v51 = vpop.eup %2871 }
 0x690   :  { %v2272_v5 = vmul.f32 %v2872_v51, %v2265_v52  ;;  %v4218_v14 = vmax.f32 %v2332_v41, 0.0  ;;  %v2874_v56 = vpop.eup %2873 }
 0x691   :  { %v2876_v25 = vpop.eup %2875  ;;  %v2364_v50 = vmul.f32 %v2874_v56, %v4207_v44 }
 0x692   :  { %2339 = vmatmul.f32.gmra.mxu0 %v2272_v5  ;;  %2881 = vrsqrt.f32 %v4218_v14  ;;  %v2878_v13 = vpop.eup %2877  ;;  %v2352_v2 = vmul.f32 %v2876_v25, %v4209_v22  ;;  %vm2406_vm8 = vcmp.eq.f32.partialorder %v4218_v14, inf  ;;  %vm2408_vm10 = vcmp.eq.f32.partialorder %v4218_v14, 0.0 }
 0x693   :  { %v2880_v59 = vpop.eup %2879  ;;  %v2376_v21 = vmul.f32 %v2878_v13, %v4211_v30  ;;  %v2365_v24 = vmul.f32 %v2874_v56, %v2364_v50 }
 0x694   :  { %v2388_v37 = vmul.f32 %v2880_v59, %v4214_v45  ;;  %v2353_v31 = vmul.f32 %v2876_v25, %v2352_v2  ;;  %v2397_v2 = vand.u32 2147483648, %v4214_v45 }
 0x695   :  { %v2334_v12 = vpop.f32.mrf.mxu0  ;;  %v2377_v32 = vmul.f32 %v2878_v13, %v2376_v21  ;;  %v2366_v55 = vmul.f32 0.5, %v2365_v24 }
 0x696   :  { %v2335_v57 = vadd.f32 %v2744_v9, %v2334_v12  ;;  %v2389_v47 = vmul.f32 %v2880_v59, %v2388_v37  ;;  %v2354_v0 = vmul.f32 0.5, %v2353_v31  ;;  %v2409_v37 = vand.u32 2147483648, %v4218_v14 }
 0x697   :  { %v2378_v7 = vmul.f32 0.5, %v2377_v32  ;;  %v2367_v11 = vsub.f32 1.5, %v2366_v55 }
 0x698   :  { %v4221_v46 = vmax.f32 %v2335_v57, 0.0  ;;  %v2882_v54 = vpop.eup %2881  ;;  %v2390_v16 = vmul.f32 0.5, %v2389_v47  ;;  %v2355_v20 = vsub.f32 1.5, %v2354_v0 }
 0x699   :  { %v2400_v38 = vmul.f32 %v2882_v54, %v4218_v14  ;;  %v2379_v34 = vsub.f32 1.5, %v2378_v7  ;;  %v2368_v6 = vmul.f32 %v2874_v56, %v2367_v11  ;;  %v2385_v56 = vand.u32 2147483648, %v4211_v30 }
 0x69a   :  { %2883 = vrsqrt.f32 %v4221_v46  ;;  %v2391_v43 = vsub.f32 1.5, %v2390_v16  ;;  %v2356_v42 = vmul.f32 %v2876_v25, %v2355_v20  ;;  %vm2418_vm9 = vcmp.eq.f32.partialorder %v4221_v46, inf }
 0x69b   :  { %v2401_v8 = vmul.f32 %v2882_v54, %v2400_v38  ;;  %v2380_v61 = vmul.f32 %v2878_v13, %v2379_v34  ;;  %v2369_v51 = vmul.f32 %v2368_v6, %v4207_v44  ;;  %v2421_v38 = vand.u32 2147483648, %v4221_v46 }
 0x69c   :  { %v2392_v52 = vmul.f32 %v2880_v59, %v2391_v43  ;;  %v2357_v40 = vmul.f32 %v2356_v42, %v4209_v22  ;;  %vm2420_vm12 = vcmp.eq.f32.partialorder %v4221_v46, 0.0 }
 0x69d   :  { %v2337_v63 = vpop.f32.mrf.mxu0  ;;  %v2402_v62 = vmul.f32 0.5, %v2401_v8  ;;  %v2381_v36 = vmul.f32 %v2380_v61, %v4211_v30  ;;  %v2371_v18 = vsel %vm2370_vm1, %v4207_v44, %v2369_v51 }
 0x69e   :  { %v2338_v60 = vadd.f32 %v2744_v9, %v2337_v63  ;;  %v2359_v19 = vsel %vm2358_vm0, %v4209_v22, %v2357_v40  ;;  %vm2455_vm0 = vcmask 15360  }
 0x69f   :  { %v2403_v49 = vsub.f32 1.5, %v2402_v62  ;;  %v2383_v27 = vsel %vm2382_vm3, %v4211_v30, %v2381_v36  ;;  %v2362_v25 = vsel %vm2360_vm2, %v2361_v29, %v2359_v19 }
 0x6a0   :  { %v4224_v53 = vmax.f32 %v2338_v60, 0.0  ;;  %v2884_v26 = vpop.eup %2883  ;;  %v2374_v60 = vsel %vm2372_vm4, %v2373_v39, %v2371_v18  ;;  %v2386_v59 = vsel %vm2384_vm5, %v2385_v56, %v2383_v27 }
 0x6a1   :  { %v2412_v23 = vmul.f32 %v2884_v26, %v4221_v46  ;;  %v2404_v1 = vmul.f32 %v2882_v54, %v2403_v49  ;;  %v2447_v22 = vadd.f32 %v2374_v60, %v2362_v25 }
 0x6a2   :  { %2885 = vrsqrt.f32 %v4224_v53  ;;  %vm2430_vm11 = vcmp.eq.f32.partialorder %v4224_v53, inf  ;;  %v2433_v0 = vand.u32 2147483648, %v4224_v53  ;;  %vm2432_vm13 = vcmp.eq.f32.partialorder %v4224_v53, 0.0 }
 0x6a3   :  { %v2413_v17 = vmul.f32 %v2884_v26, %v2412_v23  ;;  %v2405_v41 = vmul.f32 %v2404_v1, %v4218_v14  ;;  %v2448_v32 = vadd.f32 %v2447_v22, %v2386_v59 }
 0x6a5   :  { %v2414_v15 = vmul.f32 0.5, %v2413_v17  ;;  %v2407_v30 = vsel %vm2406_vm8, %v4218_v14, %v2405_v41 }
 0x6a7   :  { %v2415_v5 = vsub.f32 1.5, %v2414_v15 }
 0x6a8   :  { %v2886_v35 = vpop.eup %2885 }
 0x6a9   :  { %v2424_v10 = vmul.f32 %v2886_v35, %v4224_v53  ;;  %v2416_v12 = vmul.f32 %v2884_v26, %v2415_v5 }
 0x6ab   :  { %v2425_v3 = vmul.f32 %v2886_v35, %v2424_v10  ;;  %v2417_v44 = vmul.f32 %v2416_v12, %v4221_v46 }
 0x6ad   :  { %v2426_v28 = vmul.f32 0.5, %v2425_v3  ;;  %v2419_v26 = vsel %vm2418_vm9, %v4221_v46, %v2417_v44 }
 0x6ae   :  { %v2422_v23 = vsel %vm2420_vm12, %v2421_v38, %v2419_v26 }
 0x6af   :  { %v2427_v33 = vsub.f32 1.5, %v2426_v28 }
 0x6b1   :  { %v2428_v63 = vmul.f32 %v2886_v35, %v2427_v33 }
 0x6b3   :  { %v2429_v21 = vmul.f32 %v2428_v63, %v4224_v53 }
 0x6b5   :  { %v2431_v35 = vsel %vm2430_vm11, %v4224_v53, %v2429_v21 }
 0x6b6   :  { %v2434_v8 = vsel %vm2432_vm13, %v2433_v0, %v2431_v35 }
 0x70f   :  { %v2340_v4 = vpop.f32.mrf.mxu0 }
 0x710   :  { %v2341_v48 = vadd.f32 %v2744_v9, %v2340_v4  ;;  %v2393_v9 = vmul.f32 %v2392_v52, %v4214_v45 }
 0x712   :  { %v4235_v58 = vmax.f32 %v2341_v48, 0.0  ;;  %v2395_v13 = vsel %vm2394_vm6, %v4214_v45, %v2393_v9  ;;  %v2410_v45 = vsel %vm2408_vm10, %v2409_v37, %v2407_v30 }
 0x713   :  { %v2398_v24 = vsel %vm2396_vm7, %v2397_v2, %v2395_v13 }
 0x714   :  { %2887 = vrsqrt.f32 %v4235_v58  ;;  %v2449_v47 = vadd.f32 %v2448_v32, %v2398_v24  ;;  %vm2442_vm14 = vcmp.eq.f32.partialorder %v4235_v58, inf  ;;  %v2445_v16 = vand.u32 2147483648, %v4235_v58 }
 0x715   :  { %vm2444_vm15 = vcmp.eq.f32.partialorder %v4235_v58, 0.0 }
 0x716   :  { %v2450_v7 = vadd.f32 %v2449_v47, %v2410_v45 }
 0x718   :  { %v2451_v11 = vadd.f32 %v2450_v7, %v2422_v23 }
 0x71a   :  { %v2888_v57 = vpop.eup %2887  ;;  %v2452_v17 = vadd.f32 %v2451_v11, %v2434_v8 }
 0x71b   :  { %v2436_v50 = vmul.f32 %v2888_v57, %v4235_v58 }
 0x71d   :  { %v2437_v54 = vmul.f32 %v2888_v57, %v2436_v50 }
 0x71f   :  { %v2438_v31 = vmul.f32 0.5, %v2437_v54 }
 0x721   :  { %v2439_v55 = vsub.f32 1.5, %v2438_v31 }
 0x723   :  { %v2440_v14 = vmul.f32 %v2888_v57, %v2439_v55 }
 0x725   :  { %v2441_v10 = vmul.f32 %v2440_v14, %v4235_v58 }
 0x727   :  { %v2443_v46 = vsel %vm2442_vm14, %v4235_v58, %v2441_v10 }
 0x728   :  { %v2446_v20 = vsel %vm2444_vm15, %v2445_v16, %v2443_v46 }
 0x729   :  { %v2453_v34 = vadd.f32 %v2452_v17, %v2446_v20 }
 0x72b   :  { %v2454_v62 = vmul.f32 0.125, %v2453_v34 }
 0x72d   :  { %v2456_v53 = vsel %vm2455_vm0, %v2454_v62, -inf }
 0x72e   :  { %2457 = vmax.xlane.f32.xlu0 %v2456_v53 }
 0x7a1   :  { %v2458_v3 = vpop.xlane.xlu0 %2457 }
 0x7a2   :  { %v2459_v4 = vsub.f32 %v2454_v62, %v2458_v3 }
 0x7a4   :  { %v2460_v6 = vmul.f32 1.442695, %v2459_v4 }
 0x7a6   :  { %2889 = vpow2.f32 %v2460_v6 }
 0x7ac   :  { %v2890_v43 = vpop.eup %2889 }
 0x7ad   :  { %v2462_v15 = vsel %vm2455_vm0, %v2890_v43, 0.0 }
 0x7ae   :  { %2463 = vadd.xlane.f32.xlu0 %v2462_v15 }
 0x821   :  { %v2464_v48 = vpop.xlane.xlu0 %2463 }
 0x822   :  { %2891 = vlog2.f32 %v2464_v48 }
 0x828   :  { %v2892_v42 = vpop.eup %2891 }
 0x829   :  { %v2466_v61 = vmul.f32 0.6931472, %v2892_v42 }
 0x82b   :  { %v2467_v49 = vsub.f32 %v2459_v4, %v2466_v61 }
 0x82d   :  { %2468 = vst.msk [vmem:[%s4294_s7] sm:$0xff] %vm2455_vm0, %v2467_v49 }
 0x82e   :  { %2473 = vsyncpa [#allocation7], 1 }
 0x82f   :  { %2474 = vsyncpa [#allocation11], 1 }
 0x830   :  { %2475 = vsyncpa [#allocation8], 1 }
 0x831   :  { %2476 = vsyncmov [#allocation5] }
 0x834   :  { %s2477_s9 = vpop.sfrf %2476 }
 0x835   :  { %p2706_p0 = scmp.ne.s32.totalorder %s2477_s9, 0 }
 0x837   :  { %2481 = shalt.err (%p2706_p0)  }
 0x838   :  { %2483 = vsyncmov [#allocation5 + $0x1] }
 0x83b   :  { %s2484_s10 = vpop.sfrf %2483 }
 0x83c   :  { %p2707_p1 = scmp.ne.s32.totalorder %s2484_s10, 0 }
 0x83e   :  { %2488 = shalt.err (%p2707_p1)  }
 0x83f   :  { %2490 = vsyncmov [#allocation5 + $0x2] }
 0x842   :  { %s2491_s11 = vpop.sfrf %2490 }
 0x843   :  { %p2708_p2 = scmp.ne.s32.totalorder %s2491_s11, 0 }
 0x845   :  { %2495 = shalt.err (%p2708_p2)  }
 0x846   :  { %2497 = vsyncmov [#allocation5 + $0x3] }
 0x849   :  { %s2498_s12 = vpop.sfrf %2497 }
 0x84a   :  { %p2709_p3 = scmp.ne.s32.totalorder %s2498_s12, 0 }
 0x84c   :  { %2502 = shalt.err (%p2709_p3)  }
 0x84d   :  { %2504 = vsyncmov [#allocation5 + $0x4] }
 0x850   :  { %s2505_s7 = vpop.sfrf %2504 }
 0x851   :  { %p2710_p4 = scmp.ne.s32.totalorder %s2505_s7, 0 }
 0x853   :  { %2509 = shalt.err (%p2710_p4)  }
 0x854   :  { %2511 = vsyncmov [#allocation5 + $0x5] }
 0x857   :  { %s2512_s13 = vpop.sfrf %2511 }
 0x858   :  { %p2711_p5 = scmp.ne.s32.totalorder %s2512_s13, 0 }
 0x85a   :  { %2516 = shalt.err (%p2711_p5)  }
 0x85b   :  { %2518 = vsyncmov [#allocation5 + $0x6] }
 0x85e   :  { %s2519_s14 = vpop.sfrf %2518 }
 0x85f   :  { %p2712_p6 = scmp.ne.s32.totalorder %s2519_s14, 0 }
 0x861   :  { %2523 = shalt.err (%p2712_p6)  }
 0x862   :  { %2525 = vsyncmov [#allocation5 + $0x7] }
 0x865   :  { %s2526_s0 = vpop.sfrf %2525 }
 0x866   :  { %p2713_p7 = scmp.ne.s32.totalorder %s2526_s0, 0 }
 0x868   :  { %2530 = shalt.err (%p2713_p7)  }
 0x869   :  { %2532 = vsyncmov [#allocation5 + $0x8] }
 0x86c   :  { %s2533_s15 = vpop.sfrf %2532 }
 0x86d   :  { %p2714_p8 = scmp.ne.s32.totalorder %s2533_s15, 0 }
 0x86f   :  { %2537 = shalt.err (%p2714_p8)  }
 0x870   :  { %2539 = vsyncmov [#allocation5 + $0x9] }
 0x873   :  { %s2540_s2 = vpop.sfrf %2539 }
 0x874   :  { %p2715_p9 = scmp.ne.s32.totalorder %s2540_s2, 0 }
 0x876   :  { %2544 = shalt.err (%p2715_p9)  }
 0x877   :  { %2546 = vsyncmov [#allocation5 + $0xa] }
 0x87a   :  { %s2547_s3 = vpop.sfrf %2546 }
 0x87b   :  { %p2716_p10 = scmp.ne.s32.totalorder %s2547_s3, 0 }
 0x87d   :  { %2551 = shalt.err (%p2716_p10)  }
 0x87e   :  { %2553 = vsyncmov [#allocation5 + $0xb] }
 0x881   :  { %s2554_s16 = vpop.sfrf %2553 }
 0x882   :  { %p2717_p11 = scmp.ne.s32.totalorder %s2554_s16, 0 }
 0x884   :  { %2558 = shalt.err (%p2717_p11)  }
 0x885   :  { %2560 = vsyncmov [#allocation5 + $0xc] }
 0x888   :  { %s2561_s17 = vpop.sfrf %2560 }
 0x889   :  { %p2718_p12 = scmp.ne.s32.totalorder %s2561_s17, 0 }
 0x88b   :  { %2565 = shalt.err (%p2718_p12)  }
 0x88c   :  { %2567 = vsyncmov [#allocation5 + $0xd] }
 0x88f   :  { %s2568_s18 = vpop.sfrf %2567 }
 0x890   :  { %p2719_p13 = scmp.ne.s32.totalorder %s2568_s18, 0 }
 0x892   :  { %2572 = shalt.err (%p2719_p13)  }
 0x893   :  { %2574 = vsyncmov [#allocation5 + $0xe] }
 0x896   :  { %s2575_s19 = vpop.sfrf %2574 }
 0x897   :  { %p2720_p0 = scmp.ne.s32.totalorder %s2575_s19, 0 }
 0x899   :  { %2579 = shalt.err (%p2720_p0)  }
 0x89a   :  { %2581 = vsyncmov [#allocation5 + $0xf] }
 0x89d   :  { %s2582_s20 = vpop.sfrf %2581 }
 0x89e   :  { %p2721_p1 = scmp.ne.s32.totalorder %s2582_s20, 0 }
 0x8a0   :  { %2586 = shalt.err (%p2721_p1)  }

</bundles_post_ra>
